<compile_context>
chip_gen: v6e
topology: v6e:2x2x1
jax: 0.10.0
libtpu: 0.0.40
codegen_flags: <defaults>
</compile_context>

<pallas_src>
import jax
import jax.numpy as jnp
from jax.experimental import pallas as pl
from jax.experimental.pallas import tpu as pltpu


_BT = 8  # images per grid step (BT*28 ~ 256 rows for the conv dots)


# ----------------------------- fused Pallas kernel ------------------------- #

def _lenet_fused_kernel(x_ref,
                        w1_ref, b1_ref, sr1e_ref, sr1o_ref, sc1e_ref, sc1o_ref,
                        w2_ref, b2_ref, sr2e_ref, sr2o_ref, sc2e_ref, sc2o_ref,
                        pg_ref, wf1_ref, bf1_ref, wf2_ref, bf2_ref, wf3_ref,
                        bf3_ref, out_ref):
    f32, bf16 = jnp.float32, jnp.bfloat16
    dot = lambda a, b: jnp.dot(a, b, preferred_element_type=f32)

    nb = out_ref.shape[0]          # images in this block (BT)
    r1n = nb * 32 - 4              # stacked conv1 output rows (32-row slots)
    r2n = nb * 16 - 4              # stacked conv2 output rows (16-row slots)

    x = x_ref[...]                 # (BT*32, 32) f32, one 32-row slot per image

    # ---- conv1 (1->6, k=5): 5 banded dy-taps, M = BT*32-4, K = 32, N = 168 --
    acc1 = dot(x[0:r1n, :].astype(bf16), w1_ref[0])
    for dy in range(1, 5):
        acc1 = acc1 + dot(x[dy:dy + r1n, :].astype(bf16), w1_ref[dy])
    y1 = jnp.maximum(acc1 + b1_ref[...], 0.0).astype(bf16)     # (BT*32-4, 168)

    # ---- maxpool1 2x2: exact 0/1 selection matmuls (rows block-diag, cols shared)
    r1 = jnp.maximum(dot(sr1e_ref[...], y1),
                     dot(sr1o_ref[...], y1)).astype(bf16)      # (BT*16, 168)
    p1 = jnp.maximum(dot(r1, sc1e_ref[...]),
                     dot(r1, sc1o_ref[...]))                   # (BT*16, 84) f32

    # ---- conv2 (6->16, k=5): 5 banded dy-taps, M = BT*16-4, K = 84, N = 160 -
    acc2 = dot(p1[0:r2n, :].astype(bf16), w2_ref[0])
    for dy in range(1, 5):
        acc2 = acc2 + dot(p1[dy:dy + r2n, :].astype(bf16), w2_ref[dy])
    y2 = jnp.maximum(acc2 + b2_ref[...], 0.0).astype(bf16)     # (BT*16-4, 160)

    # ---- maxpool2 2x2 ------------------------------------------------------
    r2 = jnp.maximum(dot(sr2e_ref[...], y2),
                     dot(sr2o_ref[...], y2)).astype(bf16)      # (BT*8, 160)
    p2 = jnp.maximum(dot(r2, sc2e_ref[...]),
                     dot(r2, sc2o_ref[...]))                   # (BT*8, 80) f32

    # ---- flatten + fc1: permutation matmul regroups rows hq-major, then
    #      5 accumulated (BT, 80) x (80, 120) dots (flatten order folded into wf1)
    p2g = dot(pg_ref[...], p2.astype(bf16)).astype(bf16)       # (5*BT, 80)
    h = dot(p2g[0:nb, :], wf1_ref[0])
    for hq in range(1, 5):
        h = h + dot(p2g[hq * nb:(hq + 1) * nb, :], wf1_ref[hq])
    h = jnp.maximum(h + bf1_ref[...], 0.0)                     # (BT, 120) f32

    # ---- fc2 + ReLU, fc3 (output padded to 128 lanes -> lane-dense store) ---
    h = jnp.maximum(dot(h.astype(bf16), wf2_ref[...]) + bf2_ref[...], 0.0)
    out = dot(h.astype(bf16), wf3_ref[...]) + bf3_ref[...]     # (BT, 128)
    out_ref[...] = out.astype(out_ref.dtype)


# ------------------- one-time weight repack (outside jit) ------------------ #

def prepare_params(params, bt=_BT):
    """Repack PyTorch-layout params for the batched kernel (run once).

    Note: the row-pool / regroup selection matrices are tied to the per-step
    image block size `bt` (must match the _BT used by net_forward).
    """
    f32, bf16 = jnp.float32, jnp.bfloat16
    w1 = params["conv1_w"].astype(f32)           # (6, 1, 5, 5)
    w2 = params["conv2_w"].astype(f32)           # (16, 6, 5, 5)

    # conv1 banded weights: w1c[dy, wi, wo*6+co] = w1[co, 0, dy, wi-wo], 0<=wi-wo<=4
    wi = jnp.arange(32)[:, None]
    wo = jnp.arange(28)[None, :]
    dx = wi - wo
    w1t = jnp.transpose(w1[:, 0], (1, 2, 0))     # (dy, dx, co)
    w1c = jnp.where(((dx >= 0) & (dx <= 4))[None, :, :, None],
                    w1t[:, jnp.clip(dx, 0, 4), :], 0.0)        # (5, 32, 28, 6)
    w1c = w1c.reshape(5, 32, 28 * 6).astype(bf16)
    b1 = jnp.tile(params["conv1_b"].astype(f32), 28).reshape(1, 28 * 6)

    # conv2 banded weights: w2c[dy, wp*6+ci, wr*16+co] = w2[co, ci, dy, wp-wr]
    wp = jnp.arange(14)[:, None]
    wr = jnp.arange(10)[None, :]
    dx2 = wp - wr
    w2t = jnp.transpose(w2, (2, 3, 1, 0))        # (dy, dx, ci, co)
    w2c = jnp.where(((dx2 >= 0) & (dx2 <= 4))[None, :, :, None, None],
                    w2t[:, jnp.clip(dx2, 0, 4), :, :], 0.0)    # (5,14,10,6,16)
    w2c = jnp.transpose(w2c, (0, 1, 3, 2, 4)).reshape(5, 14 * 6, 10 * 16).astype(bf16)
    b2 = jnp.tile(params["conv2_b"].astype(f32), 10).reshape(1, 10 * 16)

    # batched (block-diagonal) 0/1 row-pool selection matrices; out-of-range
    # targets (garbage row slots of the last image) give all-zero rows.
    def row_sel(slot_in, slot_out, rows_in):
        i = jnp.arange(bt * slot_out)
        m, t = i // slot_out, i % slot_out
        col = jnp.arange(rows_in)[None, :]
        even = (col == (m * slot_in + 2 * t)[:, None]).astype(bf16)
        odd = (col == (m * slot_in + 2 * t + 1)[:, None]).astype(bf16)
        return even, odd

    # shared 0/1 column-pool selection matrices (lane dim, batch-invariant)
    def col_sel(wpn, c):
        r = jnp.arange(2 * wpn * c)[:, None]     # input col  = wo*c + ci
        q = jnp.arange(wpn * c)[None, :]         # output col = wp*c + ci
        same_c = (r % c) == (q % c)
        even = (same_c & ((r // c) == 2 * (q // c))).astype(bf16)
        odd = (same_c & ((r // c) == 2 * (q // c) + 1)).astype(bf16)
        return even, odd

    sr1e, sr1o = row_sel(32, 16, bt * 32 - 4)    # (bt*16, bt*32-4)
    sc1e, sc1o = col_sel(14, 6)                  # (168, 84)
    sr2e, sr2o = row_sel(16, 8, bt * 16 - 4)     # (bt*8, bt*16-4)
    sc2e, sc2o = col_sel(5, 16)                  # (160, 80)

    # permutation gathering the 5 valid pool2 rows per image into hq-major,
    # bt-row contiguous groups (so fc1 is 5 accumulated (bt,80)x(80,120) dots)
    gi = jnp.arange(5 * bt)
    hq, m = gi // bt, gi % bt
    pgrp = (jnp.arange(bt * 8)[None, :] == (m * 8 + hq)[:, None]).astype(bf16)

    # fc1 repacked for the (hq, wq*16+co) layout (absorbs NCHW flatten order)
    wf1 = jnp.transpose(params["fc1_w"].astype(f32).reshape(120, 16, 5, 5),
                        (2, 3, 1, 0)).reshape(5, 80, 120).astype(bf16)
    bf1 = params["fc1_b"].astype(f32).reshape(1, 120)
    wf2 = params["fc2_w"].astype(f32).T.astype(bf16)          # (120, 84)
    bf2 = params["fc2_b"].astype(f32).reshape(1, 84)
    # fc3 padded to 128 output lanes (lane-dense store); wrapper slices [:, :2]
    wf3 = jnp.zeros((84, 128), f32).at[:, :2].set(
        params["fc3_w"].astype(f32).T).astype(bf16)
    bf3 = jnp.zeros((1, 128), f32).at[0, :2].set(params["fc3_b"].astype(f32))

    return dict(w1c=w1c, b1=b1, sr1e=sr1e, sr1o=sr1o, sc1e=sc1e, sc1o=sc1o,
                w2c=w2c, b2=b2, sr2e=sr2e, sr2o=sr2o, sc2e=sc2e, sc2o=sc2o,
                pgrp=pgrp, wf1=wf1, bf1=bf1, wf2=wf2, bf2=bf2, wf3=wf3, bf3=bf3)


_CONST_ORDER = ("w1c", "b1", "sr1e", "sr1o", "sc1e", "sc1o",
                "w2c", "b2", "sr2e", "sr2o", "sc2e", "sc2o",
                "pgrp", "wf1", "bf1", "wf2", "bf2", "wf3", "bf3")


# ------------------------------- forward pass ------------------------------ #

def net_forward(prep, x_nchw):
    """Fused forward: NCHW input (B,1,32,32) -> logits (B,2) in ONE pallas_call."""
    bt = _BT
    B = x_nchw.shape[0]
    nblk = (B + bt - 1) // bt
    bpad = nblk * bt

    x3 = x_nchw.astype(jnp.float32).reshape(B, 32, 32)
    if bpad != B:
        x3 = jnp.concatenate(
            [x3, jnp.zeros((bpad - B, 32, 32), jnp.float32)], axis=0)
    x2 = x3.reshape(bpad * 32, 32)           # 32-row slot per image, stacked

    consts = [prep[k] for k in _CONST_ORDER]

    def _const_spec(a):
        zeros = (0,) * a.ndim
        return pl.BlockSpec(a.shape, lambda i, _z=zeros: _z)

    out = pl.pallas_call(
        _lenet_fused_kernel,
        out_shape=jax.ShapeDtypeStruct((bpad, 128), jnp.float32),
        grid=(nblk,),
        in_specs=[pl.BlockSpec((bt * 32, 32), lambda i: (i, 0))]
                 + [_const_spec(a) for a in consts],
        out_specs=pl.BlockSpec((bt, 128), lambda i: (i, 0)),
        compiler_params=pltpu.CompilerParams(
            dimension_semantics=("parallel",)),
    )(x2, *consts)
    return out[:B, :2]


# --------------------------- pure-JAX reference ----------------------------- #

def ref_forward(params, x_nchw):
    dn = ("NCHW", "OIHW", "NCHW")
    hp = jax.lax.Precision.HIGHEST
    x = jax.lax.conv_general_dilated(x_nchw, params["conv1_w"], (1, 1), "VALID",
                                     dimension_numbers=dn, precision=hp)
    x = jnp.maximum(x + params["conv1_b"][None, :, None, None], 0.0)
    x = jax.lax.reduce_window(x, -jnp.inf, jax.lax.max, (1, 1, 2, 2), (1, 1, 2, 2), "VALID")
    x = jax.lax.conv_general_dilated(x, params["conv2_w"], (1, 1), "VALID",
                                     dimension_numbers=dn, precision=hp)
    x = jnp.maximum(x + params["conv2_b"][None, :, None, None], 0.0)
    x = jax.lax.reduce_window(x, -jnp.inf, jax.lax.max, (1, 1, 2, 2), (1, 1, 2, 2), "VALID")
    x = x.reshape(x.shape[0], -1)
    x = jnp.maximum(jnp.dot(x, params["fc1_w"].T, precision=hp) + params["fc1_b"], 0.0)
    x = jnp.maximum(jnp.dot(x, params["fc2_w"].T, precision=hp) + params["fc2_b"], 0.0)
    return jnp.dot(x, params["fc3_w"].T, precision=hp) + params["fc3_b"]


def init_params(key):
    ks = jax.random.split(key, 10)
    def w(k, shape, fan_in):
        return jax.random.normal(k, shape, jnp.float32) * (1.0 / jnp.sqrt(fan_in))
    return {
        "conv1_w": w(ks[0], (6, 1, 5, 5), 25),    "conv1_b": w(ks[1], (6,), 25),
        "conv2_w": w(ks[2], (16, 6, 5, 5), 150),  "conv2_b": w(ks[3], (16,), 150),
        "fc1_w":   w(ks[4], (120, 400), 400),     "fc1_b":   w(ks[5], (120,), 400),
        "fc2_w":   w(ks[6], (84, 120), 120),      "fc2_b":   w(ks[7], (84,), 120),
        "fc3_w":   w(ks[8], (2, 84), 84),         "fc3_b":   w(ks[9], (2,), 84),
    }


if __name__ == "__main__":
    key = jax.random.PRNGKey(0)
    pkey, xkey = jax.random.split(key)
    params = init_params(pkey)
    # 32x32 input so the flatten sees 16*5*5 = 400 features.  B=10 -> two
    # "parallel" grid steps of 8 images (last block zero-padded), so both v7x
    # TensorCores get work; on v5e/v6e the steps just pipeline.
    x = jax.random.normal(xkey, (10, 1, 32, 32), jnp.float32)

    prep = prepare_params(params)            # one-time weight repack, outside jit
    fwd = jax.jit(net_forward)
    out = jax.block_until_ready(fwd(prep, x))
    assert out.shape == (10, 2) and out.dtype == jnp.float32

    ref = jax.block_until_ready(ref_forward(params, x))
    # bf16 MXU operands (per perf review) vs. the f32 HIGHEST-precision
    # reference: genuine layout/semantics bugs show up as O(1) errors, while
    # bf16 rounding with f32 accumulation stays well inside this tolerance.
    assert jnp.allclose(out, ref, rtol=4e-2, atol=4e-2), (out, ref)

    print("KERNEL_OK")
</pallas_src>

<mosaic_0001>
module attributes {stable_mosaic.version = 11 : i64} {
  func.func @_lenet_fused_kernel(%arg0: i32, %arg1: memref<256x32xf32, #tpu.memory_space<vmem>>, %arg2: memref<5x32x168xbf16, #tpu.memory_space<vmem>>, %arg3: memref<1x168xf32, #tpu.memory_space<vmem>>, %arg4: memref<128x252xbf16, #tpu.memory_space<vmem>>, %arg5: memref<128x252xbf16, #tpu.memory_space<vmem>>, %arg6: memref<168x84xbf16, #tpu.memory_space<vmem>>, %arg7: memref<168x84xbf16, #tpu.memory_space<vmem>>, %arg8: memref<5x84x160xbf16, #tpu.memory_space<vmem>>, %arg9: memref<1x160xf32, #tpu.memory_space<vmem>>, %arg10: memref<64x124xbf16, #tpu.memory_space<vmem>>, %arg11: memref<64x124xbf16, #tpu.memory_space<vmem>>, %arg12: memref<160x80xbf16, #tpu.memory_space<vmem>>, %arg13: memref<160x80xbf16, #tpu.memory_space<vmem>>, %arg14: memref<40x64xbf16, #tpu.memory_space<vmem>>, %arg15: memref<5x80x120xbf16, #tpu.memory_space<vmem>>, %arg16: memref<1x120xf32, #tpu.memory_space<vmem>>, %arg17: memref<120x84xbf16, #tpu.memory_space<vmem>>, %arg18: memref<1x84xf32, #tpu.memory_space<vmem>>, %arg19: memref<84x128xbf16, #tpu.memory_space<vmem>>, %arg20: memref<1x128xf32, #tpu.memory_space<vmem>>, %arg21: memref<8x128xf32, #tpu.memory_space<vmem>>) attributes {dimension_semantics = [#tpu.dimension_semantics<parallel>], iteration_bounds = array<i64: 2>, scalar_prefetch = 0 : i64, scratch_operands = 0 : i64, tpu.core_type = #tpu.core_type<tc>, window_params = [{transform_indices = @transform_0, window_bounds = array<i64: 256, 32>}, {pipeline_mode = #tpu.pipeline_mode<synchronous>, transform_indices = @transform_1, window_bounds = array<i64: 5, 32, 168>}, {pipeline_mode = #tpu.pipeline_mode<synchronous>, transform_indices = @transform_2, window_bounds = array<i64: 1, 168>}, {pipeline_mode = #tpu.pipeline_mode<synchronous>, transform_indices = @transform_3, window_bounds = array<i64: 128, 252>}, {pipeline_mode = #tpu.pipeline_mode<synchronous>, transform_indices = @transform_4, window_bounds = array<i64: 128, 252>}, {pipeline_mode = #tpu.pipeline_mode<synchronous>, transform_indices = @transform_5, window_bounds = array<i64: 168, 84>}, {pipeline_mode = #tpu.pipeline_mode<synchronous>, transform_indices = @transform_6, window_bounds = array<i64: 168, 84>}, {pipeline_mode = #tpu.pipeline_mode<synchronous>, transform_indices = @transform_7, window_bounds = array<i64: 5, 84, 160>}, {pipeline_mode = #tpu.pipeline_mode<synchronous>, transform_indices = @transform_8, window_bounds = array<i64: 1, 160>}, {pipeline_mode = #tpu.pipeline_mode<synchronous>, transform_indices = @transform_9, window_bounds = array<i64: 64, 124>}, {pipeline_mode = #tpu.pipeline_mode<synchronous>, transform_indices = @transform_10, window_bounds = array<i64: 64, 124>}, {pipeline_mode = #tpu.pipeline_mode<synchronous>, transform_indices = @transform_11, window_bounds = array<i64: 160, 80>}, {pipeline_mode = #tpu.pipeline_mode<synchronous>, transform_indices = @transform_12, window_bounds = array<i64: 160, 80>}, {pipeline_mode = #tpu.pipeline_mode<synchronous>, transform_indices = @transform_13, window_bounds = array<i64: 40, 64>}, {pipeline_mode = #tpu.pipeline_mode<synchronous>, transform_indices = @transform_14, window_bounds = array<i64: 5, 80, 120>}, {pipeline_mode = #tpu.pipeline_mode<synchronous>, transform_indices = @transform_15, window_bounds = array<i64: 1, 120>}, {pipeline_mode = #tpu.pipeline_mode<synchronous>, transform_indices = @transform_16, window_bounds = array<i64: 120, 84>}, {pipeline_mode = #tpu.pipeline_mode<synchronous>, transform_indices = @transform_17, window_bounds = array<i64: 1, 84>}, {pipeline_mode = #tpu.pipeline_mode<synchronous>, transform_indices = @transform_18, window_bounds = array<i64: 84, 128>}, {pipeline_mode = #tpu.pipeline_mode<synchronous>, transform_indices = @transform_19, window_bounds = array<i64: 1, 128>}, {transform_indices = @transform_20, window_bounds = array<i64: 8, 128>}]} {
    %c0 = arith.constant 0 : index
    %c0_0 = arith.constant 0 : index
    %0 = vector.load %arg1[%c0, %c0_0] : memref<256x32xf32, #tpu.memory_space<vmem>>, vector<256x32xf32>
    %1 = vector.extract_strided_slice %0 {offsets = [0, 0], sizes = [252, 32], strides = [1, 1]} : vector<256x32xf32> to vector<252x32xf32>
    %2 = arith.truncf %1 : vector<252x32xf32> to vector<252x32xbf16>
    %c0_1 = arith.constant 0 : index
    %c0_2 = arith.constant 0 : index
    %c0_3 = arith.constant 0 : index
    %3 = vector.load %arg2[%c0_1, %c0_2, %c0_3] : memref<5x32x168xbf16, #tpu.memory_space<vmem>>, vector<1x32x168xbf16>
    %4 = vector.shape_cast %3 : vector<1x32x168xbf16> to vector<32x168xbf16>
    %cst = arith.constant dense<0.000000e+00> : vector<252x168xf32>
    %5 = tpu.matmul %2, %4, %cst {dimension_numbers = #tpu.dot_dimension_numbers<[1], [0], [0], [1], [0, 0, 1, 1], [], []>} : vector<252x32xbf16>, vector<32x168xbf16>, vector<252x168xf32> -> vector<252x168xf32>
    %6 = vector.extract_strided_slice %0 {offsets = [1, 0], sizes = [252, 32], strides = [1, 1]} : vector<256x32xf32> to vector<252x32xf32>
    %7 = arith.truncf %6 : vector<252x32xf32> to vector<252x32xbf16>
    %c1 = arith.constant 1 : index
    %c0_4 = arith.constant 0 : index
    %c0_5 = arith.constant 0 : index
    %8 = vector.load %arg2[%c1, %c0_4, %c0_5] : memref<5x32x168xbf16, #tpu.memory_space<vmem>>, vector<1x32x168xbf16>
    %9 = vector.shape_cast %8 : vector<1x32x168xbf16> to vector<32x168xbf16>
    %cst_6 = arith.constant dense<0.000000e+00> : vector<252x168xf32>
    %10 = tpu.matmul %7, %9, %cst_6 {dimension_numbers = #tpu.dot_dimension_numbers<[1], [0], [0], [1], [0, 0, 1, 1], [], []>} : vector<252x32xbf16>, vector<32x168xbf16>, vector<252x168xf32> -> vector<252x168xf32>
    %11 = arith.addf %5, %10 : vector<252x168xf32>
    %12 = vector.extract_strided_slice %0 {offsets = [2, 0], sizes = [252, 32], strides = [1, 1]} : vector<256x32xf32> to vector<252x32xf32>
    %13 = arith.truncf %12 : vector<252x32xf32> to vector<252x32xbf16>
    %c2 = arith.constant 2 : index
    %c0_7 = arith.constant 0 : index
    %c0_8 = arith.constant 0 : index
    %14 = vector.load %arg2[%c2, %c0_7, %c0_8] : memref<5x32x168xbf16, #tpu.memory_space<vmem>>, vector<1x32x168xbf16>
    %15 = vector.shape_cast %14 : vector<1x32x168xbf16> to vector<32x168xbf16>
    %cst_9 = arith.constant dense<0.000000e+00> : vector<252x168xf32>
    %16 = tpu.matmul %13, %15, %cst_9 {dimension_numbers = #tpu.dot_dimension_numbers<[1], [0], [0], [1], [0, 0, 1, 1], [], []>} : vector<252x32xbf16>, vector<32x168xbf16>, vector<252x168xf32> -> vector<252x168xf32>
    %17 = arith.addf %11, %16 : vector<252x168xf32>
    %18 = vector.extract_strided_slice %0 {offsets = [3, 0], sizes = [252, 32], strides = [1, 1]} : vector<256x32xf32> to vector<252x32xf32>
    %19 = arith.truncf %18 : vector<252x32xf32> to vector<252x32xbf16>
    %c3 = arith.constant 3 : index
    %c0_10 = arith.constant 0 : index
    %c0_11 = arith.constant 0 : index
    %20 = vector.load %arg2[%c3, %c0_10, %c0_11] : memref<5x32x168xbf16, #tpu.memory_space<vmem>>, vector<1x32x168xbf16>
    %21 = vector.shape_cast %20 : vector<1x32x168xbf16> to vector<32x168xbf16>
    %cst_12 = arith.constant dense<0.000000e+00> : vector<252x168xf32>
    %22 = tpu.matmul %19, %21, %cst_12 {dimension_numbers = #tpu.dot_dimension_numbers<[1], [0], [0], [1], [0, 0, 1, 1], [], []>} : vector<252x32xbf16>, vector<32x168xbf16>, vector<252x168xf32> -> vector<252x168xf32>
    %23 = arith.addf %17, %22 : vector<252x168xf32>
    %24 = vector.extract_strided_slice %0 {offsets = [4, 0], sizes = [252, 32], strides = [1, 1]} : vector<256x32xf32> to vector<252x32xf32>
    %25 = arith.truncf %24 : vector<252x32xf32> to vector<252x32xbf16>
    %c4 = arith.constant 4 : index
    %c0_13 = arith.constant 0 : index
    %c0_14 = arith.constant 0 : index
    %26 = vector.load %arg2[%c4, %c0_13, %c0_14] : memref<5x32x168xbf16, #tpu.memory_space<vmem>>, vector<1x32x168xbf16>
    %27 = vector.shape_cast %26 : vector<1x32x168xbf16> to vector<32x168xbf16>
    %cst_15 = arith.constant dense<0.000000e+00> : vector<252x168xf32>
    %28 = tpu.matmul %25, %27, %cst_15 {dimension_numbers = #tpu.dot_dimension_numbers<[1], [0], [0], [1], [0, 0, 1, 1], [], []>} : vector<252x32xbf16>, vector<32x168xbf16>, vector<252x168xf32> -> vector<252x168xf32>
    %29 = arith.addf %23, %28 : vector<252x168xf32>
    %c0_16 = arith.constant 0 : index
    %c0_17 = arith.constant 0 : index
    %30 = vector.load %arg3[%c0_16, %c0_17] : memref<1x168xf32, #tpu.memory_space<vmem>>, vector<1x168xf32>
    %31 = vector.broadcast %30 : vector<1x168xf32> to vector<252x168xf32>
    %32 = arith.addf %29, %31 : vector<252x168xf32>
    %cst_18 = arith.constant 0.000000e+00 : f32
    %33 = vector.broadcast %cst_18 : f32 to vector<252x168xf32>
    %34 = arith.maximumf %32, %33 : vector<252x168xf32>
    %35 = arith.truncf %34 : vector<252x168xf32> to vector<252x168xbf16>
    %c0_19 = arith.constant 0 : index
    %c0_20 = arith.constant 0 : index
    %36 = vector.load %arg4[%c0_19, %c0_20] : memref<128x252xbf16, #tpu.memory_space<vmem>>, vector<128x252xbf16>
    %cst_21 = arith.constant dense<0.000000e+00> : vector<128x168xf32>
    %37 = tpu.matmul %36, %35, %cst_21 {dimension_numbers = #tpu.dot_dimension_numbers<[1], [0], [0], [1], [0, 0, 1, 1], [], []>} : vector<128x252xbf16>, vector<252x168xbf16>, vector<128x168xf32> -> vector<128x168xf32>
    %c0_22 = arith.constant 0 : index
    %c0_23 = arith.constant 0 : index
    %38 = vector.load %arg5[%c0_22, %c0_23] : memref<128x252xbf16, #tpu.memory_space<vmem>>, vector<128x252xbf16>
    %cst_24 = arith.constant dense<0.000000e+00> : vector<128x168xf32>
    %39 = tpu.matmul %38, %35, %cst_24 {dimension_numbers = #tpu.dot_dimension_numbers<[1], [0], [0], [1], [0, 0, 1, 1], [], []>} : vector<128x252xbf16>, vector<252x168xbf16>, vector<128x168xf32> -> vector<128x168xf32>
    %40 = arith.maximumf %37, %39 : vector<128x168xf32>
    %41 = arith.truncf %40 : vector<128x168xf32> to vector<128x168xbf16>
    %c0_25 = arith.constant 0 : index
    %c0_26 = arith.constant 0 : index
    %42 = vector.load %arg6[%c0_25, %c0_26] : memref<168x84xbf16, #tpu.memory_space<vmem>>, vector<168x84xbf16>
    %cst_27 = arith.constant dense<0.000000e+00> : vector<128x84xf32>
    %43 = tpu.matmul %41, %42, %cst_27 {dimension_numbers = #tpu.dot_dimension_numbers<[1], [0], [0], [1], [0, 0, 1, 1], [], []>} : vector<128x168xbf16>, vector<168x84xbf16>, vector<128x84xf32> -> vector<128x84xf32>
    %c0_28 = arith.constant 0 : index
    %c0_29 = arith.constant 0 : index
    %44 = vector.load %arg7[%c0_28, %c0_29] : memref<168x84xbf16, #tpu.memory_space<vmem>>, vector<168x84xbf16>
    %cst_30 = arith.constant dense<0.000000e+00> : vector<128x84xf32>
    %45 = tpu.matmul %41, %44, %cst_30 {dimension_numbers = #tpu.dot_dimension_numbers<[1], [0], [0], [1], [0, 0, 1, 1], [], []>} : vector<128x168xbf16>, vector<168x84xbf16>, vector<128x84xf32> -> vector<128x84xf32>
    %46 = arith.maximumf %43, %45 : vector<128x84xf32>
    %47 = vector.extract_strided_slice %46 {offsets = [0, 0], sizes = [124, 84], strides = [1, 1]} : vector<128x84xf32> to vector<124x84xf32>
    %48 = arith.truncf %47 : vector<124x84xf32> to vector<124x84xbf16>
    %c0_31 = arith.constant 0 : index
    %c0_32 = arith.constant 0 : index
    %c0_33 = arith.constant 0 : index
    %49 = vector.load %arg8[%c0_31, %c0_32, %c0_33] : memref<5x84x160xbf16, #tpu.memory_space<vmem>>, vector<1x84x160xbf16>
    %50 = vector.shape_cast %49 : vector<1x84x160xbf16> to vector<84x160xbf16>
    %cst_34 = arith.constant dense<0.000000e+00> : vector<124x160xf32>
    %51 = tpu.matmul %48, %50, %cst_34 {dimension_numbers = #tpu.dot_dimension_numbers<[1], [0], [0], [1], [0, 0, 1, 1], [], []>} : vector<124x84xbf16>, vector<84x160xbf16>, vector<124x160xf32> -> vector<124x160xf32>
    %52 = vector.extract_strided_slice %46 {offsets = [1, 0], sizes = [124, 84], strides = [1, 1]} : vector<128x84xf32> to vector<124x84xf32>
    %53 = arith.truncf %52 : vector<124x84xf32> to vector<124x84xbf16>
    %c1_35 = arith.constant 1 : index
    %c0_36 = arith.constant 0 : index
    %c0_37 = arith.constant 0 : index
    %54 = vector.load %arg8[%c1_35, %c0_36, %c0_37] : memref<5x84x160xbf16, #tpu.memory_space<vmem>>, vector<1x84x160xbf16>
    %55 = vector.shape_cast %54 : vector<1x84x160xbf16> to vector<84x160xbf16>
    %cst_38 = arith.constant dense<0.000000e+00> : vector<124x160xf32>
    %56 = tpu.matmul %53, %55, %cst_38 {dimension_numbers = #tpu.dot_dimension_numbers<[1], [0], [0], [1], [0, 0, 1, 1], [], []>} : vector<124x84xbf16>, vector<84x160xbf16>, vector<124x160xf32> -> vector<124x160xf32>
    %57 = arith.addf %51, %56 : vector<124x160xf32>
    %58 = vector.extract_strided_slice %46 {offsets = [2, 0], sizes = [124, 84], strides = [1, 1]} : vector<128x84xf32> to vector<124x84xf32>
    %59 = arith.truncf %58 : vector<124x84xf32> to vector<124x84xbf16>
    %c2_39 = arith.constant 2 : index
    %c0_40 = arith.constant 0 : index
    %c0_41 = arith.constant 0 : index
    %60 = vector.load %arg8[%c2_39, %c0_40, %c0_41] : memref<5x84x160xbf16, #tpu.memory_space<vmem>>, vector<1x84x160xbf16>
    %61 = vector.shape_cast %60 : vector<1x84x160xbf16> to vector<84x160xbf16>
    %cst_42 = arith.constant dense<0.000000e+00> : vector<124x160xf32>
    %62 = tpu.matmul %59, %61, %cst_42 {dimension_numbers = #tpu.dot_dimension_numbers<[1], [0], [0], [1], [0, 0, 1, 1], [], []>} : vector<124x84xbf16>, vector<84x160xbf16>, vector<124x160xf32> -> vector<124x160xf32>
    %63 = arith.addf %57, %62 : vector<124x160xf32>
    %64 = vector.extract_strided_slice %46 {offsets = [3, 0], sizes = [124, 84], strides = [1, 1]} : vector<128x84xf32> to vector<124x84xf32>
    %65 = arith.truncf %64 : vector<124x84xf32> to vector<124x84xbf16>
    %c3_43 = arith.constant 3 : index
    %c0_44 = arith.constant 0 : index
    %c0_45 = arith.constant 0 : index
    %66 = vector.load %arg8[%c3_43, %c0_44, %c0_45] : memref<5x84x160xbf16, #tpu.memory_space<vmem>>, vector<1x84x160xbf16>
    %67 = vector.shape_cast %66 : vector<1x84x160xbf16> to vector<84x160xbf16>
    %cst_46 = arith.constant dense<0.000000e+00> : vector<124x160xf32>
    %68 = tpu.matmul %65, %67, %cst_46 {dimension_numbers = #tpu.dot_dimension_numbers<[1], [0], [0], [1], [0, 0, 1, 1], [], []>} : vector<124x84xbf16>, vector<84x160xbf16>, vector<124x160xf32> -> vector<124x160xf32>
    %69 = arith.addf %63, %68 : vector<124x160xf32>
    %70 = vector.extract_strided_slice %46 {offsets = [4, 0], sizes = [124, 84], strides = [1, 1]} : vector<128x84xf32> to vector<124x84xf32>
    %71 = arith.truncf %70 : vector<124x84xf32> to vector<124x84xbf16>
    %c4_47 = arith.constant 4 : index
    %c0_48 = arith.constant 0 : index
    %c0_49 = arith.constant 0 : index
    %72 = vector.load %arg8[%c4_47, %c0_48, %c0_49] : memref<5x84x160xbf16, #tpu.memory_space<vmem>>, vector<1x84x160xbf16>
    %73 = vector.shape_cast %72 : vector<1x84x160xbf16> to vector<84x160xbf16>
    %cst_50 = arith.constant dense<0.000000e+00> : vector<124x160xf32>
    %74 = tpu.matmul %71, %73, %cst_50 {dimension_numbers = #tpu.dot_dimension_numbers<[1], [0], [0], [1], [0, 0, 1, 1], [], []>} : vector<124x84xbf16>, vector<84x160xbf16>, vector<124x160xf32> -> vector<124x160xf32>
    %75 = arith.addf %69, %74 : vector<124x160xf32>
    %c0_51 = arith.constant 0 : index
    %c0_52 = arith.constant 0 : index
    %76 = vector.load %arg9[%c0_51, %c0_52] : memref<1x160xf32, #tpu.memory_space<vmem>>, vector<1x160xf32>
    %77 = vector.broadcast %76 : vector<1x160xf32> to vector<124x160xf32>
    %78 = arith.addf %75, %77 : vector<124x160xf32>
    %cst_53 = arith.constant 0.000000e+00 : f32
    %79 = vector.broadcast %cst_53 : f32 to vector<124x160xf32>
    %80 = arith.maximumf %78, %79 : vector<124x160xf32>
    %81 = arith.truncf %80 : vector<124x160xf32> to vector<124x160xbf16>
    %c0_54 = arith.constant 0 : index
    %c0_55 = arith.constant 0 : index
    %82 = vector.load %arg10[%c0_54, %c0_55] : memref<64x124xbf16, #tpu.memory_space<vmem>>, vector<64x124xbf16>
    %cst_56 = arith.constant dense<0.000000e+00> : vector<64x160xf32>
    %83 = tpu.matmul %82, %81, %cst_56 {dimension_numbers = #tpu.dot_dimension_numbers<[1], [0], [0], [1], [0, 0, 1, 1], [], []>} : vector<64x124xbf16>, vector<124x160xbf16>, vector<64x160xf32> -> vector<64x160xf32>
    %c0_57 = arith.constant 0 : index
    %c0_58 = arith.constant 0 : index
    %84 = vector.load %arg11[%c0_57, %c0_58] : memref<64x124xbf16, #tpu.memory_space<vmem>>, vector<64x124xbf16>
    %cst_59 = arith.constant dense<0.000000e+00> : vector<64x160xf32>
    %85 = tpu.matmul %84, %81, %cst_59 {dimension_numbers = #tpu.dot_dimension_numbers<[1], [0], [0], [1], [0, 0, 1, 1], [], []>} : vector<64x124xbf16>, vector<124x160xbf16>, vector<64x160xf32> -> vector<64x160xf32>
    %86 = arith.maximumf %83, %85 : vector<64x160xf32>
    %87 = arith.truncf %86 : vector<64x160xf32> to vector<64x160xbf16>
    %c0_60 = arith.constant 0 : index
    %c0_61 = arith.constant 0 : index
    %88 = vector.load %arg12[%c0_60, %c0_61] : memref<160x80xbf16, #tpu.memory_space<vmem>>, vector<160x80xbf16>
    %cst_62 = arith.constant dense<0.000000e+00> : vector<64x80xf32>
    %89 = tpu.matmul %87, %88, %cst_62 {dimension_numbers = #tpu.dot_dimension_numbers<[1], [0], [0], [1], [0, 0, 1, 1], [], []>} : vector<64x160xbf16>, vector<160x80xbf16>, vector<64x80xf32> -> vector<64x80xf32>
    %c0_63 = arith.constant 0 : index
    %c0_64 = arith.constant 0 : index
    %90 = vector.load %arg13[%c0_63, %c0_64] : memref<160x80xbf16, #tpu.memory_space<vmem>>, vector<160x80xbf16>
    %cst_65 = arith.constant dense<0.000000e+00> : vector<64x80xf32>
    %91 = tpu.matmul %87, %90, %cst_65 {dimension_numbers = #tpu.dot_dimension_numbers<[1], [0], [0], [1], [0, 0, 1, 1], [], []>} : vector<64x160xbf16>, vector<160x80xbf16>, vector<64x80xf32> -> vector<64x80xf32>
    %92 = arith.maximumf %89, %91 : vector<64x80xf32>
    %c0_66 = arith.constant 0 : index
    %c0_67 = arith.constant 0 : index
    %93 = vector.load %arg14[%c0_66, %c0_67] : memref<40x64xbf16, #tpu.memory_space<vmem>>, vector<40x64xbf16>
    %94 = arith.truncf %92 : vector<64x80xf32> to vector<64x80xbf16>
    %cst_68 = arith.constant dense<0.000000e+00> : vector<40x80xf32>
    %95 = tpu.matmul %93, %94, %cst_68 {dimension_numbers = #tpu.dot_dimension_numbers<[1], [0], [0], [1], [0, 0, 1, 1], [], []>} : vector<40x64xbf16>, vector<64x80xbf16>, vector<40x80xf32> -> vector<40x80xf32>
    %96 = arith.truncf %95 : vector<40x80xf32> to vector<40x80xbf16>
    %97 = vector.extract_strided_slice %96 {offsets = [0, 0], sizes = [8, 80], strides = [1, 1]} : vector<40x80xbf16> to vector<8x80xbf16>
    %c0_69 = arith.constant 0 : index
    %c0_70 = arith.constant 0 : index
    %c0_71 = arith.constant 0 : index
    %98 = vector.load %arg15[%c0_69, %c0_70, %c0_71] : memref<5x80x120xbf16, #tpu.memory_space<vmem>>, vector<1x80x120xbf16>
    %99 = vector.shape_cast %98 : vector<1x80x120xbf16> to vector<80x120xbf16>
    %cst_72 = arith.constant dense<0.000000e+00> : vector<8x120xf32>
    %100 = tpu.matmul %97, %99, %cst_72 {dimension_numbers = #tpu.dot_dimension_numbers<[1], [0], [0], [1], [0, 0, 1, 1], [], []>} : vector<8x80xbf16>, vector<80x120xbf16>, vector<8x120xf32> -> vector<8x120xf32>
    %101 = vector.extract_strided_slice %96 {offsets = [8, 0], sizes = [8, 80], strides = [1, 1]} : vector<40x80xbf16> to vector<8x80xbf16>
    %c1_73 = arith.constant 1 : index
    %c0_74 = arith.constant 0 : index
    %c0_75 = arith.constant 0 : index
    %102 = vector.load %arg15[%c1_73, %c0_74, %c0_75] : memref<5x80x120xbf16, #tpu.memory_space<vmem>>, vector<1x80x120xbf16>
    %103 = vector.shape_cast %102 : vector<1x80x120xbf16> to vector<80x120xbf16>
    %cst_76 = arith.constant dense<0.000000e+00> : vector<8x120xf32>
    %104 = tpu.matmul %101, %103, %cst_76 {dimension_numbers = #tpu.dot_dimension_numbers<[1], [0], [0], [1], [0, 0, 1, 1], [], []>} : vector<8x80xbf16>, vector<80x120xbf16>, vector<8x120xf32> -> vector<8x120xf32>
    %105 = arith.addf %100, %104 : vector<8x120xf32>
    %106 = vector.extract_strided_slice %96 {offsets = [16, 0], sizes = [8, 80], strides = [1, 1]} : vector<40x80xbf16> to vector<8x80xbf16>
    %c2_77 = arith.constant 2 : index
    %c0_78 = arith.constant 0 : index
    %c0_79 = arith.constant 0 : index
    %107 = vector.load %arg15[%c2_77, %c0_78, %c0_79] : memref<5x80x120xbf16, #tpu.memory_space<vmem>>, vector<1x80x120xbf16>
    %108 = vector.shape_cast %107 : vector<1x80x120xbf16> to vector<80x120xbf16>
    %cst_80 = arith.constant dense<0.000000e+00> : vector<8x120xf32>
    %109 = tpu.matmul %106, %108, %cst_80 {dimension_numbers = #tpu.dot_dimension_numbers<[1], [0], [0], [1], [0, 0, 1, 1], [], []>} : vector<8x80xbf16>, vector<80x120xbf16>, vector<8x120xf32> -> vector<8x120xf32>
    %110 = arith.addf %105, %109 : vector<8x120xf32>
    %111 = vector.extract_strided_slice %96 {offsets = [24, 0], sizes = [8, 80], strides = [1, 1]} : vector<40x80xbf16> to vector<8x80xbf16>
    %c3_81 = arith.constant 3 : index
    %c0_82 = arith.constant 0 : index
    %c0_83 = arith.constant 0 : index
    %112 = vector.load %arg15[%c3_81, %c0_82, %c0_83] : memref<5x80x120xbf16, #tpu.memory_space<vmem>>, vector<1x80x120xbf16>
    %113 = vector.shape_cast %112 : vector<1x80x120xbf16> to vector<80x120xbf16>
    %cst_84 = arith.constant dense<0.000000e+00> : vector<8x120xf32>
    %114 = tpu.matmul %111, %113, %cst_84 {dimension_numbers = #tpu.dot_dimension_numbers<[1], [0], [0], [1], [0, 0, 1, 1], [], []>} : vector<8x80xbf16>, vector<80x120xbf16>, vector<8x120xf32> -> vector<8x120xf32>
    %115 = arith.addf %110, %114 : vector<8x120xf32>
    %116 = vector.extract_strided_slice %96 {offsets = [32, 0], sizes = [8, 80], strides = [1, 1]} : vector<40x80xbf16> to vector<8x80xbf16>
    %c4_85 = arith.constant 4 : index
    %c0_86 = arith.constant 0 : index
    %c0_87 = arith.constant 0 : index
    %117 = vector.load %arg15[%c4_85, %c0_86, %c0_87] : memref<5x80x120xbf16, #tpu.memory_space<vmem>>, vector<1x80x120xbf16>
    %118 = vector.shape_cast %117 : vector<1x80x120xbf16> to vector<80x120xbf16>
    %cst_88 = arith.constant dense<0.000000e+00> : vector<8x120xf32>
    %119 = tpu.matmul %116, %118, %cst_88 {dimension_numbers = #tpu.dot_dimension_numbers<[1], [0], [0], [1], [0, 0, 1, 1], [], []>} : vector<8x80xbf16>, vector<80x120xbf16>, vector<8x120xf32> -> vector<8x120xf32>
    %120 = arith.addf %115, %119 : vector<8x120xf32>
    %c0_89 = arith.constant 0 : index
    %c0_90 = arith.constant 0 : index
    %121 = vector.load %arg16[%c0_89, %c0_90] : memref<1x120xf32, #tpu.memory_space<vmem>>, vector<1x120xf32>
    %122 = vector.broadcast %121 : vector<1x120xf32> to vector<8x120xf32>
    %123 = arith.addf %120, %122 : vector<8x120xf32>
    %cst_91 = arith.constant 0.000000e+00 : f32
    %124 = vector.broadcast %cst_91 : f32 to vector<8x120xf32>
    %125 = arith.maximumf %123, %124 : vector<8x120xf32>
    %126 = arith.truncf %125 : vector<8x120xf32> to vector<8x120xbf16>
    %c0_92 = arith.constant 0 : index
    %c0_93 = arith.constant 0 : index
    %127 = vector.load %arg17[%c0_92, %c0_93] : memref<120x84xbf16, #tpu.memory_space<vmem>>, vector<120x84xbf16>
    %cst_94 = arith.constant dense<0.000000e+00> : vector<8x84xf32>
    %128 = tpu.matmul %126, %127, %cst_94 {dimension_numbers = #tpu.dot_dimension_numbers<[1], [0], [0], [1], [0, 0, 1, 1], [], []>} : vector<8x120xbf16>, vector<120x84xbf16>, vector<8x84xf32> -> vector<8x84xf32>
    %c0_95 = arith.constant 0 : index
    %c0_96 = arith.constant 0 : index
    %129 = vector.load %arg18[%c0_95, %c0_96] : memref<1x84xf32, #tpu.memory_space<vmem>>, vector<1x84xf32>
    %130 = vector.broadcast %129 : vector<1x84xf32> to vector<8x84xf32>
    %131 = arith.addf %128, %130 : vector<8x84xf32>
    %cst_97 = arith.constant 0.000000e+00 : f32
    %132 = vector.broadcast %cst_97 : f32 to vector<8x84xf32>
    %133 = arith.maximumf %131, %132 : vector<8x84xf32>
    %134 = arith.truncf %133 : vector<8x84xf32> to vector<8x84xbf16>
    %c0_98 = arith.constant 0 : index
    %c0_99 = arith.constant 0 : index
    %135 = vector.load %arg19[%c0_98, %c0_99] : memref<84x128xbf16, #tpu.memory_space<vmem>>, vector<84x128xbf16>
    %cst_100 = arith.constant dense<0.000000e+00> : vector<8x128xf32>
    %136 = tpu.matmul %134, %135, %cst_100 {dimension_numbers = #tpu.dot_dimension_numbers<[1], [0], [0], [1], [0, 0, 1, 1], [], []>} : vector<8x84xbf16>, vector<84x128xbf16>, vector<8x128xf32> -> vector<8x128xf32>
    %c0_101 = arith.constant 0 : index
    %c0_102 = arith.constant 0 : index
    %137 = vector.load %arg20[%c0_101, %c0_102] : memref<1x128xf32, #tpu.memory_space<vmem>>, vector<1x128xf32>
    %138 = vector.broadcast %137 : vector<1x128xf32> to vector<8x128xf32>
    %139 = arith.addf %136, %138 : vector<8x128xf32>
    %c0_103 = arith.constant 0 : index
    %c0_104 = arith.constant 0 : index
    %140 = vector.load %arg21[%c0_103, %c0_104] : memref<8x128xf32, #tpu.memory_space<vmem>>, vector<8x128xf32>
    tpu.vector_store %arg21[%c0_103, %c0_104], %139 {strides = array<i32>} : memref<8x128xf32, #tpu.memory_space<vmem>>, vector<8x128xf32>,
    return
  }
  func.func @transform_0(%arg0: i32) -> (i32, i32) {
    %c0_i32 = arith.constant 0 : i32
    %c0_i32_0 = arith.constant 0 : i32
    return %arg0, %c0_i32 : i32, i32
  }
  func.func @transform_1(%arg0: i32) -> (i32, i32, i32) {
    %c0_i32 = arith.constant 0 : i32
    %c0_i32_0 = arith.constant 0 : i32
    %c0_i32_1 = arith.constant 0 : i32
    %c0_i32_2 = arith.constant 0 : i32
    return %c0_i32, %c0_i32_0, %c0_i32_1 : i32, i32, i32
  }
  func.func @transform_2(%arg0: i32) -> (i32, i32) {
    %c0_i32 = arith.constant 0 : i32
    %c0_i32_0 = arith.constant 0 : i32
    %c0_i32_1 = arith.constant 0 : i32
    return %c0_i32, %c0_i32_0 : i32, i32
  }
  func.func @transform_3(%arg0: i32) -> (i32, i32) {
    %c0_i32 = arith.constant 0 : i32
    %c0_i32_0 = arith.constant 0 : i32
    %c0_i32_1 = arith.constant 0 : i32
    return %c0_i32, %c0_i32_0 : i32, i32
  }
  func.func @transform_4(%arg0: i32) -> (i32, i32) {
    %c0_i32 = arith.constant 0 : i32
    %c0_i32_0 = arith.constant 0 : i32
    %c0_i32_1 = arith.constant 0 : i32
    return %c0_i32, %c0_i32_0 : i32, i32
  }
  func.func @transform_5(%arg0: i32) -> (i32, i32) {
    %c0_i32 = arith.constant 0 : i32
    %c0_i32_0 = arith.constant 0 : i32
    %c0_i32_1 = arith.constant 0 : i32
    return %c0_i32, %c0_i32_0 : i32, i32
  }
  func.func @transform_6(%arg0: i32) -> (i32, i32) {
    %c0_i32 = arith.constant 0 : i32
    %c0_i32_0 = arith.constant 0 : i32
    %c0_i32_1 = arith.constant 0 : i32
    return %c0_i32, %c0_i32_0 : i32, i32
  }
  func.func @transform_7(%arg0: i32) -> (i32, i32, i32) {
    %c0_i32 = arith.constant 0 : i32
    %c0_i32_0 = arith.constant 0 : i32
    %c0_i32_1 = arith.constant 0 : i32
    %c0_i32_2 = arith.constant 0 : i32
    return %c0_i32, %c0_i32_0, %c0_i32_1 : i32, i32, i32
  }
  func.func @transform_8(%arg0: i32) -> (i32, i32) {
    %c0_i32 = arith.constant 0 : i32
    %c0_i32_0 = arith.constant 0 : i32
    %c0_i32_1 = arith.constant 0 : i32
    return %c0_i32, %c0_i32_0 : i32, i32
  }
  func.func @transform_9(%arg0: i32) -> (i32, i32) {
    %c0_i32 = arith.constant 0 : i32
    %c0_i32_0 = arith.constant 0 : i32
    %c0_i32_1 = arith.constant 0 : i32
    return %c0_i32, %c0_i32_0 : i32, i32
  }
  func.func @transform_10(%arg0: i32) -> (i32, i32) {
    %c0_i32 = arith.constant 0 : i32
    %c0_i32_0 = arith.constant 0 : i32
    %c0_i32_1 = arith.constant 0 : i32
    return %c0_i32, %c0_i32_0 : i32, i32
  }
  func.func @transform_11(%arg0: i32) -> (i32, i32) {
    %c0_i32 = arith.constant 0 : i32
    %c0_i32_0 = arith.constant 0 : i32
    %c0_i32_1 = arith.constant 0 : i32
    return %c0_i32, %c0_i32_0 : i32, i32
  }
  func.func @transform_12(%arg0: i32) -> (i32, i32) {
    %c0_i32 = arith.constant 0 : i32
    %c0_i32_0 = arith.constant 0 : i32
    %c0_i32_1 = arith.constant 0 : i32
    return %c0_i32, %c0_i32_0 : i32, i32
  }
  func.func @transform_13(%arg0: i32) -> (i32, i32) {
    %c0_i32 = arith.constant 0 : i32
    %c0_i32_0 = arith.constant 0 : i32
    %c0_i32_1 = arith.constant 0 : i32
    return %c0_i32, %c0_i32_0 : i32, i32
  }
  func.func @transform_14(%arg0: i32) -> (i32, i32, i32) {
    %c0_i32 = arith.constant 0 : i32
    %c0_i32_0 = arith.constant 0 : i32
    %c0_i32_1 = arith.constant 0 : i32
    %c0_i32_2 = arith.constant 0 : i32
    return %c0_i32, %c0_i32_0, %c0_i32_1 : i32, i32, i32
  }
  func.func @transform_15(%arg0: i32) -> (i32, i32) {
    %c0_i32 = arith.constant 0 : i32
    %c0_i32_0 = arith.constant 0 : i32
    %c0_i32_1 = arith.constant 0 : i32
    return %c0_i32, %c0_i32_0 : i32, i32
  }
  func.func @transform_16(%arg0: i32) -> (i32, i32) {
    %c0_i32 = arith.constant 0 : i32
    %c0_i32_0 = arith.constant 0 : i32
    %c0_i32_1 = arith.constant 0 : i32
    return %c0_i32, %c0_i32_0 : i32, i32
  }
  func.func @transform_17(%arg0: i32) -> (i32, i32) {
    %c0_i32 = arith.constant 0 : i32
    %c0_i32_0 = arith.constant 0 : i32
    %c0_i32_1 = arith.constant 0 : i32
    return %c0_i32, %c0_i32_0 : i32, i32
  }
  func.func @transform_18(%arg0: i32) -> (i32, i32) {
    %c0_i32 = arith.constant 0 : i32
    %c0_i32_0 = arith.constant 0 : i32
    %c0_i32_1 = arith.constant 0 : i32
    return %c0_i32, %c0_i32_0 : i32, i32
  }
  func.func @transform_19(%arg0: i32) -> (i32, i32) {
    %c0_i32 = arith.constant 0 : i32
    %c0_i32_0 = arith.constant 0 : i32
    %c0_i32_1 = arith.constant 0 : i32
    return %c0_i32, %c0_i32_0 : i32, i32
  }
  func.func @transform_20(%arg0: i32) -> (i32, i32) {
    %c0_i32 = arith.constant 0 : i32
    %c0_i32_0 = arith.constant 0 : i32
    return %arg0, %c0_i32 : i32, i32
  }
}

</mosaic_0001>

<bundles_post_ra>
// kernel: net_forward.1
= control target key start
LH: loop header
LB: loop body
LE: loop exit
PB: predicated region body
PF: predicated region fallthrough
CT: control target
= control target key end

     0   :  { %s10038_s0 = inlined_call_operand.vmem [shape: f32[512,32], index: 0, kind: input, shape index: {}]   ;;  %s10039_s1 = inlined_call_operand.vmem [shape: bf16[5,32,168], index: 1, kind: input, shape index: {}]   ;;  %s10040_s2 = inlined_call_operand.vmem [shape: f32[1,168], index: 2, kind: input, shape index: {}]   ;;  %s10041_s3 = inlined_call_operand.vmem [shape: bf16[128,252], index: 3, kind: input, shape index: {}]   ;;  %s10042_s4 = inlined_call_operand.vmem [shape: bf16[128,252], index: 4, kind: input, shape index: {}]   ;;  %s10043_s5 = inlined_call_operand.vmem [shape: bf16[168,84], index: 5, kind: input, shape index: {}]   ;;  %s10044_s6 = inlined_call_operand.vmem [shape: bf16[168,84], index: 6, kind: input, shape index: {}]   ;;  %s10045_s7 = inlined_call_operand.vmem [shape: bf16[5,84,160], index: 7, kind: input, shape index: {}]   ;;  %s10046_s8 = inlined_call_operand.vmem [shape: f32[1,160], index: 8, kind: input, shape index: {}]   ;;  %s10047_s9 = inlined_call_operand.vmem [shape: bf16[64,124], index: 9, kind: input, shape index: {}]   ;;  %s10048_s10 = inlined_call_operand.vmem [shape: bf16[64,124], index: 10, kind: input, shape index: {}]   ;;  %s10049_s11 = inlined_call_operand.vmem [shape: bf16[160,80], index: 11, kind: input, shape index: {}]   ;;  %s10050_s12 = inlined_call_operand.vmem [shape: bf16[160,80], index: 12, kind: input, shape index: {}]   ;;  %s10051_s13 = inlined_call_operand.vmem [shape: bf16[40,64], index: 13, kind: input, shape index: {}]   ;;  %s10052_s14 = inlined_call_operand.vmem [shape: bf16[5,80,120], index: 14, kind: input, shape index: {}]   ;;  %s10053_s15 = inlined_call_operand.vmem [shape: f32[1,120], index: 15, kind: input, shape index: {}]   ;;  %s10054_s16 = inlined_call_operand.vmem [shape: bf16[120,84], index: 16, kind: input, shape index: {}]   ;;  %s10055_s17 = inlined_call_operand.vmem [shape: f32[1,84], index: 17, kind: input, shape index: {}]   ;;  %s10056_s18 = inlined_call_operand.vmem [shape: bf16[84,128], index: 18, kind: input, shape index: {}]   ;;  %s10057_s19 = inlined_call_operand.vmem [shape: f32[1,128], index: 19, kind: input, shape index: {}]   ;;  %s10058_s20 = inlined_call_operand.vmem [shape: f32[16,128], index: 20, kind: output, shape index: {}]  }
   0x1   :  { %10071 = sst [smem:[#allocation73_spill]] %s10038_s0 }
   0x2   :  { %10072 = sst [smem:[#allocation74_spill]] %s10039_s1  ;;  %s7342_s1 = smov 0  }
   0x3   :  { %10073 = sst [smem:[#allocation75_spill]] %s10040_s2 }
   0x4   :  { %10074 = sst [smem:[#allocation76_spill]] %s10041_s3 }
   0x5   :  { %10075 = sst [smem:[#allocation77_spill]] %s10042_s4 }
   0x6   :  { %10076 = sst [smem:[#allocation78_spill]] %s10058_s20 }
   0x7 LB: > { %10077 = sst [smem:[#allocation2_spill]] %s7232_s1  ;;  %s7348_s22 = sadd.s32 4294967295, %s7232_s1   ;;  %s7232_s1 = sphi %s7342_s1, %s30_s1  }
   0x8   : > { %p6281_p0 = scmp.ge.s32.totalorder %s7232_s1, 1  ;;  %p563_p1 = scmp.lt.s32.totalorder %s7232_s1, 3 }
   0xa   : > { %p564_p2 = pnand %p6281_p0, %p563_p1 }
   0xc   : > { %567 = sbr.rel (%p564_p2) target bundleno = 2873 (0xb39), region = 100 }
  0x11   : > { %s10078_s2 = sld [smem:[#allocation74_spill]]  ;;  %s6282_s25 = sshll.u32 %s7348_s22, 5  ;;  %v10063_v2 = vmov 0   ;;  %vm836_vm0 = vcmask 261120   ;;  %vm688_vm1 = vsmask.f32 7424 }
  0x12   : > { %917 = vmatprep.mubr.bf16.mxu0 %v10063_v2  ;;  %1162 = vmatprep.mubr.bf16.mxu1 %v10063_v2  ;;  %p621_p3 = scmp.lt.s32.totalorder %s6282_s25, 63  ;;  %s10079_s30 = sld [smem:[#allocation73_spill]]  ;;  %vm1706_vm2 = vsmask.f32 6400  ;;  %vm1344_vm3 = vcmask 1046528   ;;  %vm2100_vm4 = vcmask 1045504  }
  0x13   : > { %s10175_s4 = sld [smem:[#allocation75_spill]]  ;;  %vm2717_vm5 = vcmask 1014784   ;;  %vm3244_vm6 = vcmask 1043456   ;;  %vm3719_vm7 = vcmask 1041408   ;;  %vm3219_vm8 = vcmask 326656   ;;  %p626_p4 = scmp.lt.s32.totalorder %s7348_s22, 1 }
  0x14   : > { %s10259_s25 = smov (!%p621_p3, %s6282_s25), 63  ;;  %s10181_s20 = sld [smem:[#allocation76_spill]]  ;;  %vm3694_vm9 = vcmask 687104   ;;  %vm7236_vm10 = vmmov 0   ;;  %vm5504_vm11 = vcmask 523264   ;;  %vm5626_vm12 = vcmask 654336  }
  0x15   : > { %s6283_s28 = sshll.u32 %s10259_s25, 3  ;;  %vm6077_vm13 = vcmask 982016   ;;  %s10261_s22 = smov (!%p626_p4, %s7348_s22), 1 }
  0x16   : > { %s6284_s1 = sshll.u32 %s10261_s22, 3  ;;  %s10256_s24 = sld [smem:[#allocation78_spill]] }
  0x17   : > { %v6971_v0 = vld [vmem:[%s10078_s2 + $0x34] ss:$8 sps:$4 sm:$0xff]   ;;  %v6975_v3 = vld [vmem:[%s10078_s2 + $0x30] ss:$8 sps:$4 sm:$0xff]   ;;  %v6977_v5 = vld [vmem:[%s10078_s2 + $0x24] ss:$8 sps:$4 sm:$0xff]  }
  0x18   : > { %v6973_v1 = vld [vmem:[%s10078_s2 + $0x14] ss:$8 sps:$4 sm:$0xff]   ;;  %897 = vmatprep.subr.bf16.mxu0 %v6971_v0  ;;  %v6976_v4 = vld [vmem:[%s10078_s2 + $0x10] ss:$8 sps:$4 sm:$0xff]   ;;  %v6979_v6 = vld [vmem:[%s10078_s2 + $0x4] ss:$8 sps:$4 sm:$0xff]   ;;  %s7382_s0 = scalar_lea.vmem %s10079_s30, %s6283_s28 }
  0x19   : > { %1142 = vmatprep.subr.bf16.mxu1 %v6973_v1  ;;  %898 = vmatpush1.bf16.msra.mxu0 %v6975_v3  ;;  %v6981_v7 = vld [vmem:[%s10078_s2 + $0x20] ss:$8 sps:$4 sm:$0xff]   ;;  %v6985_v9 = vld [vmem:[%s10078_s2 + $0x54] ss:$8 sps:$4 sm:$0xff]   ;;  %v6983_v27 = vld [vmem:[%s10078_s2 + $0x50] ss:$8 sps:$4 sm:$0xff]  }
  0x1a   : > { %1143 = vmatpush1.bf16.msra.mxu1 %v6976_v4  ;;  %899 = vmatprep.subr.bf16.mxu0 %v6977_v5  ;;  %v6982_v8 = vld [vmem:[%s10078_s2] ss:$8 sps:$4 sm:$0xff]   ;;  %v633_v12 = vld [vmem:[%s7382_s0 + $0x10] sm:$0xff]  ;;  %v634_v13 = vld [vmem:[%s7382_s0 + $0x18] sm:$0xff] }
  0x1b   : > { %1144 = vmatprep.subr.bf16.mxu1 %v6979_v6  ;;  %v631_v10 = vld [vmem:[%s7382_s0] sm:$0xff]  ;;  %v632_v11 = vld [vmem:[%s7382_s0 + $0x8] sm:$0xff]  ;;  %v7395_v17 = vpack.c.bf16 %v634_v13, %v633_v12  ;;  %v637_v28 = vld [vmem:[%s7382_s0 + $0x30] sm:$0xff] }
  0x1c   : > { %v7391_v14 = vpack.c.bf16 %v632_v11, %v631_v10  ;;  %v635_v15 = vld [vmem:[%s7382_s0 + $0x20] sm:$0xff]  ;;  %v636_v16 = vld [vmem:[%s7382_s0 + $0x28] sm:$0xff]  ;;  %v638_v29 = vld [vmem:[%s7382_s0 + $0x38] sm:$0xff]  ;;  %s629_s3 = scalar_lea.vmem %s10256_s24, %s6284_s1 }
  0x1d   : > { %900 = vmatpush1.bf16.msra.mxu0 %v6981_v7  ;;  %v7399_v20 = vpack.c.bf16 %v636_v16, %v635_v15  ;;  %v697_v21 = vshll.u32 %v7395_v17, 16  ;;  %v701_v25 = vshrl.u32 %v7395_v17, 16  ;;  %v7415_v33 = vpack.c.bf16 %v638_v29, %v637_v28  ;;  %v6986_v34 = vld [vmem:[%s10078_s2 + $0x40] ss:$8 sps:$4 sm:$0xff]   ;;  %v6988_v35 = vld [vmem:[%s10078_s2 + $0x44] ss:$8 sps:$4 sm:$0xff]  }
  0x1e   : > { %1145 = vmatpush1.bf16.msra.mxu1 %v6982_v8  ;;  %1456 = vmatprep.subr.bf16.mxu0 %v6985_v9  ;;  %v690_v18 = vshrl.u32 %v7391_v14, 16  ;;  %v692_v19 = vshll.u32 %v7391_v14, 16  ;;  %v639_v36 = vld [vmem:[%s7382_s0 + $0x40] sm:$0xff]  ;;  %v6989_v37 = vld [vmem:[%s10078_s2 + $0x70] ss:$8 sps:$4 sm:$0xff]   ;;  %v640_v42 = vld [vmem:[%s7382_s0 + $0x48] sm:$0xff] }
  0x1f   : > { %v699_v23 = vrot.slane %v697_v21, 1  ;;  %v705_v26 = vshll.u32 %v7399_v20, 16  ;;  %v709_v39 = vshrl.u32 %v7399_v20, 16  ;;  %v713_v40 = vshll.u32 %v7415_v33, 16  ;;  %v6991_v41 = vld [vmem:[%s10078_s2 + $0x74] ss:$8 sps:$4 sm:$0xff]  }
  0x20   : > { %v694_v22 = vrot.slane %v692_v19, 1  ;;  %v6992_v43 = vld [vmem:[%s10078_s2 + $0x60] ss:$8 sps:$4 sm:$0xff]   ;;  %1850 = vmatprep.subr.bf16.mxu1 %v6991_v41  ;;  %v6994_v44 = vld [vmem:[%s10078_s2 + $0x64] ss:$8 sps:$4 sm:$0xff]   ;;  %v7445_v47 = vpack.c.bf16 %v640_v42, %v639_v36  ;;  %v641_v48 = vld [vmem:[%s7382_s0 + $0x50] sm:$0xff] }
  0x21   : > { %6313 = vmatmul.mubr.msk.bf16.vlgmr.msra.gmra.mxu1 %vm836_vm0, %v7391_v14  ;;  %v703_v31 = vor.u32 %v701_v25, %v699_v23  ;;  %v707_v32 = vrot.slane %v705_v26, 1  ;;  %v715_v46 = vrot.slane %v713_v40, 1  ;;  %v642_v49 = vld [vmem:[%s7382_s0 + $0x58] sm:$0xff]  ;;  %v717_v51 = vshrl.u32 %v7415_v33, 16  ;;  %v643_v53 = vld [vmem:[%s7382_s0 + $0x60] sm:$0xff]  ;;  %v644_v54 = vld [vmem:[%s7382_s0 + $0x68] sm:$0xff] }
  0x22   : > { %1172 = vmatprep.mubr.bf16.mxu1 %v10063_v2  ;;  %v695_v24 = vor.u32 %v694_v22, %v690_v18  ;;  %1851 = vmatpush1.bf16.msra.mxu1 %v6989_v37  ;;  %v721_v52 = vshll.u32 %v7445_v47, 16  ;;  %v1707_v55 = vrot.slane %v690_v18, 1  ;;  %v7457_v56 = vpack.c.bf16 %v642_v49, %v641_v48  ;;  %v650_v41 = vld [vmem:[%s7382_s0 + $0x98] sm:$0xff] }
  0x23   : > { %v708_v38 = vsel %vm688_vm1, %v703_v31, %v707_v32  ;;  %v711_v45 = vor.u32 %v709_v39, %v707_v32  ;;  %1852 = vmatprep.subr.bf16.mxu1 %v6994_v44  ;;  %v1708_v57 = vrot.slane %v692_v19, 2  ;;  %v1711_v58 = vrot.slane %v697_v21, 2  ;;  %v6997_v32 = vld [vmem:[%s10078_s2 + $0x94] ss:$8 sps:$4 sm:$0xff]   ;;  %v651_v44 = vld [vmem:[%s7382_s0 + $0xa0] sm:$0xff] }
  0x24   : > { %v700_v30 = vsel %vm688_vm1, %v695_v24, %v699_v23  ;;  %v1710_v59 = vrot.slane %v701_v25, 1  ;;  %v719_v60 = vor.u32 %v717_v51, %v715_v46  ;;  %v723_v61 = vrot.slane %v721_v52, 1  ;;  %v645_v25 = vld [vmem:[%s7382_s0 + $0x70] sm:$0xff] }
  0x25   : > { %6293 = vmatmul.mubr.msk.bf16.vlgmr.msra.gmra.mxu0 %vm836_vm0, %v700_v30  ;;  %v716_v50 = vsel %vm688_vm1, %v711_v45, %v715_v46  ;;  %v725_v62 = vshrl.u32 %v7445_v47, 16  ;;  %v729_v63 = vshll.u32 %v7457_v56, 16  ;;  %v7465_v0 = vpack.c.bf16 %v644_v54, %v643_v53  ;;  %v652_v45 = vld [vmem:[%s7382_s0 + $0xa8] sm:$0xff]  ;;  %v653_v54 = vld [vmem:[%s7382_s0 + $0xb0] sm:$0xff] }
  0x26   : > { %927 = vmatprep.mubr.bf16.mxu0 %v10063_v2  ;;  %1457 = vmatpush1.bf16.msra.mxu0 %v6983_v27  ;;  %v1709_v1 = vor.u32 %v1708_v57, %v1707_v55  ;;  %v1712_v3 = vor.u32 %v1711_v58, %v1710_v59  ;;  %v733_v4 = vshrl.u32 %v7457_v56, 16  ;;  %v1714_v5 = vrot.slane %v709_v39, 1  ;;  %v648_v39 = vld [vmem:[%s7382_s0 + $0x88] sm:$0xff]  ;;  %v654_v55 = vld [vmem:[%s7382_s0 + $0xb8] sm:$0xff]  ;;  %v655_v59 = vld [vmem:[%s7382_s0 + $0xc0] sm:$0xff] }
  0x27   : > { %1458 = vmatprep.subr.bf16.mxu0 %v6988_v35  ;;  %1853 = vmatpush1.bf16.msra.mxu1 %v6992_v43  ;;  %v1715_v6 = vrot.slane %v705_v26, 2  ;;  %v724_v7 = vsel %vm688_vm1, %v719_v60, %v723_v61  ;;  %v1718_v9 = vrot.slane %v717_v51, 1  ;;  %v1719_v10 = vrot.slane %v713_v40, 2  ;;  %v646_v26 = vld [vmem:[%s7382_s0 + $0x78] sm:$0xff]  ;;  %v649_v40 = vld [vmem:[%s7382_s0 + $0x90] sm:$0xff]  ;;  %v656_v60 = vld [vmem:[%s7382_s0 + $0xc8] sm:$0xff] }
  0x28   : > { %v7471_v8 = vsel %vm1706_vm2, %v1709_v1, %v1712_v3  ;;  %v737_v11 = vshll.u32 %v7465_v0, 16  ;;  %v1722_v13 = vrot.slane %v725_v62, 1  ;;  %v1723_v16 = vrot.slane %v721_v52, 2 }
  0x29   : > { %6314 = vmatmul.mubr.msk.bf16.gmra.mxu1 %vm836_vm0, %v7395_v17  ;;  %v1716_v12 = vor.u32 %v1715_v6, %v1714_v5  ;;  %v1720_v15 = vor.u32 %v1719_v10, %v1718_v9  ;;  %v727_v19 = vor.u32 %v725_v62, %v723_v61  ;;  %v731_v21 = vrot.slane %v729_v63, 1 }
  0x2a   : > { %1182 = vmatprep.mubr.bf16.mxu1 %v10063_v2  ;;  %1459 = vmatpush1.bf16.msra.mxu0 %v6986_v34  ;;  %v1724_v23 = vor.u32 %v1723_v16, %v1722_v13  ;;  %v1726_v28 = vrot.slane %v733_v4, 1  ;;  %v1727_v29 = vrot.slane %v729_v63, 2  ;;  %v741_v31 = vshrl.u32 %v7465_v0, 16 }
  0x2b   : > { %v7476_v18 = vsel %vm1706_vm2, %v1712_v3, %v1716_v12  ;;  %v7480_v22 = vsel %vm1706_vm2, %v1716_v12, %v1720_v15  ;;  %v732_v27 = vsel %vm688_vm1, %v727_v19, %v731_v21  ;;  %v735_v34 = vor.u32 %v733_v4, %v731_v21  ;;  %2212 = vmatprep.subr.bf16.mxu0 %v6997_v32 }
  0x2c   : > { %v7486_v24 = vsel %vm1706_vm2, %v1720_v15, %v1724_v23  ;;  %v1728_v30 = vor.u32 %v1727_v29, %v1726_v28  ;;  %v739_v35 = vrot.slane %v737_v11, 1  ;;  %v7497_v36 = vpack.c.bf16 %v646_v26, %v645_v25 }
  0x2d   : > { %6294 = vmatmul.mubr.msk.bf16.gmra.mxu0 %vm836_vm0, %v708_v38  ;;  %v647_v38 = vld [vmem:[%s7382_s0 + $0x80] sm:$0xff]  ;;  %v1730_v46 = vrot.slane %v741_v31, 1  ;;  %v1731_v48 = vrot.slane %v737_v11, 2  ;;  %v7517_v53 = vpack.c.bf16 %v650_v41, %v649_v40  ;;  %v7526_v58 = vpack.c.bf16 %v652_v45, %v651_v44 }
  0x2e   : > { %937 = vmatprep.mubr.bf16.mxu0 %v10063_v2  ;;  %v7500_v37 = vsel %vm1706_vm2, %v1724_v23, %v1728_v30  ;;  %v740_v42 = vsel %vm688_vm1, %v735_v34, %v739_v35  ;;  %v745_v43 = vshll.u32 %v7497_v36, 16  ;;  %v743_v51 = vor.u32 %v741_v31, %v739_v35  ;;  %v657_v35 = vld [vmem:[%s7382_s0 + $0xd0] sm:$0xff] }
  0x2f   : > { %v1732_v49 = vor.u32 %v1731_v48, %v1730_v46  ;;  %v749_v61 = vshrl.u32 %v7497_v36, 16  ;;  %v761_v1 = vshll.u32 %v7517_v53, 16  ;;  %v769_v5 = vshll.u32 %v7526_v58, 16 }
  0x30   : > { %v747_v52 = vrot.slane %v745_v43, 1  ;;  %v1735_v4 = vrot.slane %v745_v43, 2  ;;  %v7536_v6 = vpack.c.bf16 %v654_v55, %v653_v54  ;;  %v765_v15 = vshrl.u32 %v7517_v53, 16 }
  0x31   : > { %6315 = vmatmul.mubr.msk.bf16.gmra.mxu1 %vm836_vm0, %v7399_v20  ;;  %v7522_v57 = vsel %vm1706_vm2, %v1728_v30, %v1732_v49  ;;  %v1734_v3 = vrot.slane %v749_v61, 1  ;;  %v763_v13 = vrot.slane %v761_v1, 1  ;;  %v771_v19 = vrot.slane %v769_v5, 1 }
  0x32   : > { %1192 = vmatprep.mubr.bf16.mxu1 %v10063_v2  ;;  %v748_v63 = vsel %vm688_vm1, %v743_v51, %v747_v52  ;;  %v751_v12 = vor.u32 %v749_v61, %v747_v52  ;;  %v773_v21 = vshrl.u32 %v7526_v58, 16  ;;  %v777_v23 = vshll.u32 %v7536_v6, 16 }
  0x33   : > { %v1736_v9 = vor.u32 %v1735_v4, %v1734_v3  ;;  %v781_v25 = vshrl.u32 %v7536_v6, 16  ;;  %v1742_v41 = vrot.slane %v765_v15, 1  ;;  %v767_v44 = vor.u32 %v765_v15, %v763_v13 }
  0x34   : > { %v1746_v52 = vrot.slane %v773_v21, 1  ;;  %v1747_v54 = vrot.slane %v769_v5, 2 }
  0x35   : > { %6295 = vmatmul.mubr.msk.bf16.gmra.mxu0 %vm836_vm0, %v716_v50  ;;  %v7514_v50 = vpack.c.bf16 %v648_v39, %v647_v38  ;;  %v7545_v16 = vsel %vm1706_vm2, %v1732_v49, %v1736_v9  ;;  %v658_v38 = vld [vmem:[%s7382_s0 + $0xd8] sm:$0xff]  ;;  %v779_v39 = vrot.slane %v777_v23, 1  ;;  %v772_v48 = vsel %vm688_vm1, %v767_v44, %v771_v19 }
  0x36   : > { %947 = vmatprep.mubr.bf16.mxu0 %v10063_v2  ;;  %v7569_v45 = vpack.c.bf16 %v658_v38, %v657_v35  ;;  %v1748_v55 = vor.u32 %v1747_v54, %v1746_v52 }
  0x37   : > { %v753_v62 = vshll.u32 %v7514_v50, 16  ;;  %v757_v11 = vshrl.u32 %v7514_v50, 16  ;;  %v783_v4 = vor.u32 %v781_v25, %v779_v39 }
  0x38   : > { %v793_v51 = vshll.u32 %v7569_v45, 16 }
  0x39   : > { %6316 = vmatmul.mubr.msk.bf16.gmra.mxu1 %vm836_vm0, %v7415_v33  ;;  %v755_v10 = vrot.slane %v753_v62, 1  ;;  %v1738_v28 = vrot.slane %v757_v11, 1  ;;  %v1739_v29 = vrot.slane %v753_v62, 2  ;;  %v797_v62 = vshrl.u32 %v7569_v45, 16 }
  0x3a   : > { %1202 = vmatprep.mubr.bf16.mxu1 %v10063_v2 }
  0x3b   : > { %v1740_v30 = vor.u32 %v1739_v29, %v1738_v28  ;;  %v759_v31 = vor.u32 %v757_v11, %v755_v10  ;;  %v795_v11 = vrot.slane %v793_v51, 1  ;;  %v1758_v15 = vrot.slane %v797_v62, 1 }
  0x3d   : > { %6296 = vmatmul.mubr.msk.bf16.gmra.mxu0 %vm836_vm0, %v724_v7  ;;  %v7538_v7 = vpack.c.bf16 %v656_v60, %v655_v59  ;;  %v7558_v32 = vsel %vm1706_vm2, %v1736_v9, %v1740_v30  ;;  %v764_v34 = vsel %vm688_vm1, %v759_v31, %v763_v13  ;;  %v775_v59 = vor.u32 %v773_v21, %v771_v19  ;;  %v659_v9 = vld [vmem:[%s7382_s0 + $0xe0] sm:$0xff]  ;;  %v660_v13 = vld [vmem:[%s7382_s0 + $0xe8] sm:$0xff] }
  0x3e   : > { %957 = vmatprep.mubr.bf16.mxu0 %v10063_v2  ;;  %v7609_v21 = vpack.c.bf16 %v660_v13, %v659_v9  ;;  %v6995_v9 = vld [vmem:[%s10078_s2 + $0x90] ss:$8 sps:$4 sm:$0xff]   ;;  %v1350_v13 = vrot.slane %v7415_v33, 1 }
  0x3f   : > { %v785_v26 = vshll.u32 %v7538_v7, 16  ;;  %v789_v40 = vshrl.u32 %v7538_v7, 16  ;;  %v780_v61 = vsel %vm688_vm1, %v775_v59, %v779_v39 }
  0x40   : > { %v801_v28 = vshll.u32 %v7609_v21, 16  ;;  %v805_v29 = vshrl.u32 %v7609_v21, 16 }
  0x41   : > { %6317 = vmatmul.mubr.msk.bf16.gmra.mxu1 %vm836_vm0, %v7445_v47  ;;  %v787_v49 = vrot.slane %v785_v26, 1 }
  0x42   : > { %1212 = vmatprep.mubr.bf16.mxu1 %v10063_v2  ;;  %v803_v35 = vrot.slane %v801_v28, 1  ;;  %v1763_v38 = vrot.slane %v801_v28, 2  ;;  %v1762_v39 = vrot.slane %v805_v29, 1 }
  0x43   : > { %v791_v19 = vor.u32 %v789_v40, %v787_v49 }
  0x44   : > { %v807_v44 = vor.u32 %v805_v29, %v803_v35 }
  0x45   : > { %6297 = vmatmul.mubr.msk.bf16.gmra.mxu0 %vm836_vm0, %v732_v27  ;;  %v756_v27 = vsel %vm688_vm1, %v751_v12, %v755_v10  ;;  %v788_v10 = vsel %vm688_vm1, %v783_v4, %v787_v49  ;;  %v1759_v12 = vrot.slane %v793_v51, 2 }
  0x46   : > { %967 = vmatprep.mubr.bf16.mxu0 %v10063_v2 }
  0x49   : > { %6318 = vmatmul.mubr.msk.bf16.gmra.mxu1 %vm836_vm0, %v7457_v56 }
  0x4a   : > { %1222 = vmatprep.mubr.bf16.mxu1 %v10063_v2 }
  0x4d   : > { %6298 = vmatmul.mubr.msk.bf16.gmra.mxu0 %vm836_vm0, %v740_v42  ;;  %v1743_v42 = vrot.slane %v761_v1, 2  ;;  %v1751_v1 = vrot.slane %v777_v23, 2  ;;  %v661_v23 = vld [vmem:[%s7382_s0 + $0xf0] sm:$0xff] }
  0x4e   : > { %977 = vmatprep.mubr.bf16.mxu0 %v10063_v2 }
  0x4f   : > { %v1744_v43 = vor.u32 %v1743_v42, %v1742_v41 }
  0x51   : > { %6319 = vmatmul.mubr.msk.bf16.gmra.mxu1 %vm836_vm0, %v7465_v0  ;;  %v7572_v46 = vsel %vm1706_vm2, %v1740_v30, %v1744_v43  ;;  %v7584_v60 = vsel %vm1706_vm2, %v1744_v43, %v1748_v55  ;;  %v7619_v30 = vor.u32 %v1759_v12, %v1758_v15  ;;  %v1764_v43 = vor.u32 %v1763_v38, %v1762_v39 }
  0x52   : > { %1232 = vmatprep.mubr.bf16.mxu1 %v10063_v2  ;;  %v1352_v15 = vrot.slane %v7445_v47, 1 }
  0x53   : > { %v7635_v51 = vsel %vm1706_vm2, %v7619_v30, %v1764_v43 }
  0x55   : > { %6299 = vmatmul.mubr.msk.bf16.gmra.mxu0 %vm836_vm0, %v748_v63  ;;  %v1750_v63 = vrot.slane %v781_v25, 1  ;;  %v662_v25 = vld [vmem:[%s7382_s0 + $0xf8] sm:$0xff] }
  0x56   : > { %987 = vmatprep.mubr.bf16.mxu0 %v10063_v2  ;;  %v7622_v31 = vpack.c.bf16 %v662_v25, %v661_v23 }
  0x57   : > { %v7591_v3 = vor.u32 %v1751_v1, %v1750_v63  ;;  %v1345_v63 = vrot.slane %v7391_v14, 1  ;;  %v1346_v1 = vrot.slane %v7395_v17, 1 }
  0x58   : > { %v809_v42 = vshll.u32 %v7622_v31, 16  ;;  %v813_v49 = vshrl.u32 %v7622_v31, 16 }
  0x59   : > { %6320 = vmatmul.mubr.msk.bf16.gmra.mxu1 %vm836_vm0, %v7497_v36  ;;  %v7597_v5 = vsel %vm1706_vm2, %v1748_v55, %v7591_v3  ;;  %v1347_v4 = vsel %vm1344_vm3, %v1345_v63, %v1346_v1 }
  0x5a   : > { %1242 = vmatprep.mubr.bf16.mxu1 %v10063_v2  ;;  %v1767_v52 = vrot.slane %v809_v42, 2  ;;  %v1766_v54 = vrot.slane %v813_v49, 1 }
  0x5c   : > { %v7641_v59 = vor.u32 %v1767_v52, %v1766_v54 }
  0x5d   : > { %6300 = vmatmul.mubr.msk.bf16.gmra.mxu0 %vm836_vm0, %v756_v27  ;;  %v796_v27 = vsel %vm688_vm1, %v791_v19, %v795_v11  ;;  %v1353_v19 = vsel %vm1344_vm3, %v1350_v13, %v1352_v15 }
  0x5e   : > { %997 = vmatprep.mubr.bf16.mxu0 %v10063_v2 }
  0x61   : > { %6321 = vmatmul.mubr.msk.bf16.gmra.mxu1 %vm836_vm0, %v7514_v50 }
  0x62   : > { %1252 = vmatprep.mubr.bf16.mxu1 %v10063_v2 }
  0x65   : > { %6301 = vmatmul.mubr.msk.bf16.gmra.mxu0 %vm836_vm0, %v764_v34  ;;  %v799_v34 = vor.u32 %v797_v62, %v795_v11  ;;  %v1348_v11 = vrot.slane %v7399_v20, 1 }
  0x66   : > { %1007 = vmatprep.mubr.bf16.mxu0 %v10063_v2 }
  0x67   : > { %v804_v41 = vsel %vm688_vm1, %v799_v34, %v803_v35  ;;  %v1349_v12 = vsel %vm1344_vm3, %v1346_v1, %v1348_v11  ;;  %v1754_v1 = vrot.slane %v789_v40, 1 }
  0x69   : > { %6322 = vmatmul.mubr.msk.bf16.gmra.mxu1 %vm836_vm0, %v7517_v53 }
  0x6a   : > { %1262 = vmatprep.mubr.bf16.mxu1 %v10063_v2 }
  0x6d   : > { %6302 = vmatmul.mubr.msk.bf16.gmra.mxu0 %vm836_vm0, %v772_v48  ;;  %v811_v48 = vrot.slane %v809_v42, 1  ;;  %v1364_v42 = vrot.slane %v7526_v58, 1 }
  0x6e   : > { %1017 = vmatprep.mubr.bf16.mxu0 %v10063_v2 }
  0x6f   : > { %v812_v55 = vsel %vm688_vm1, %v807_v44, %v811_v48  ;;  %v815_v62 = vor.u32 %v813_v49, %v811_v48 }
  0x71   : > { %6323 = vmatmul.mubr.msk.bf16.gmra.mxu1 %vm836_vm0, %v7526_v58 }
  0x72   : > { %1272 = vmatprep.mubr.bf16.mxu1 %v10063_v2 }
  0x75   : > { %6303 = vmatmul.mubr.msk.bf16.gmra.mxu0 %vm836_vm0, %v780_v61  ;;  %v7647_v61 = vsel %vm1706_vm2, %v1764_v43, %v7641_v59 }
  0x76   : > { %1027 = vmatprep.mubr.bf16.mxu0 %v10063_v2 }
  0x79   : > { %6324 = vmatmul.mubr.msk.bf16.gmra.mxu1 %vm836_vm0, %v7536_v6 }
  0x7a   : > { %1282 = vmatprep.mubr.bf16.mxu1 %v10063_v2 }
  0x7d   : > { %6304 = vmatmul.mubr.msk.bf16.gmra.mxu0 %vm836_vm0, %v788_v10  ;;  %v7000_v10 = vld [vmem:[%s10078_s2 + $0x84] ss:$8 sps:$4 sm:$0xff]  }
  0x7e   : > { %1037 = vmatprep.mubr.bf16.mxu0 %v10063_v2 }
  0x81   : > { %6325 = vmatmul.mubr.msk.bf16.gmra.mxu1 %vm836_vm0, %v7538_v7 }
  0x82   : > { %1292 = vmatprep.mubr.bf16.mxu1 %v10063_v2 }
  0x85   : > { %6305 = vmatmul.mubr.msk.bf16.gmra.mxu0 %vm836_vm0, %v796_v27 }
  0x86   : > { %1047 = vmatprep.mubr.bf16.mxu0 %v10063_v2 }
  0x89   : > { %6326 = vmatmul.mubr.msk.bf16.gmra.mxu1 %vm836_vm0, %v7569_v45 }
  0x8a   : > { %1302 = vmatprep.mubr.bf16.mxu1 %v10063_v2 }
  0x8d   : > { %6306 = vmatmul.mubr.msk.bf16.gmra.mxu0 %vm836_vm0, %v804_v41 }
  0x8e   : > { %1057 = vmatprep.mubr.bf16.mxu0 %v10063_v2 }
  0x91   : > { %6327 = vmatmul.mubr.msk.bf16.gmra.mxu1 %vm836_vm0, %v7609_v21 }
  0x92   : > { %1312 = vmatprep.mubr.bf16.mxu1 %v10063_v2 }
  0x95   : > { %6307 = vmatmul.mubr.msk.bf16.gmra.mxu0 %vm836_vm0, %v812_v55 }
  0x96   : > { %1067 = vmatprep.mubr.bf16.mxu0 %v10063_v2 }
  0x99   : > { %6328 = vmatmul.mubr.msk.bf16.gmra.mxu1 %vm836_vm0, %v7622_v31 }
  0x9a   : > { %1870 = vmatprep.mubr.bf16.mxu1 %v10063_v2 }
  0x9d   : > { %6308 = vmatmul.mubr.msk.bf16.gmra.mxu0 %vm836_vm0, %v815_v62 }
  0x9e   : > { %1476 = vmatprep.mubr.bf16.mxu0 %v10063_v2 }
  0xa1   : > { %6361 = vmatmul.mubr.msk.bf16.vlgmr.msra.gmra.mxu1 %vm836_vm0, %v7471_v8  ;;  %v6998_v8 = vld [vmem:[%s10078_s2 + $0x80] ss:$8 sps:$4 sm:$0xff]  }
  0xa2   : > { %1880 = vmatprep.mubr.bf16.mxu1 %v10063_v2 }
  0xa5   : > { %6337 = vmatmul.mubr.msk.bf16.vlgmr.msra.gmra.mxu0 %vm836_vm0, %v1347_v4 }
  0xa6   : > { %1486 = vmatprep.mubr.bf16.mxu0 %v10063_v2  ;;  %2213 = vmatpush1.bf16.msra.mxu0 %v6995_v9 }
  0xa7   : > { %2214 = vmatprep.subr.bf16.mxu0 %v7000_v10 }
  0xa9   : > { %6362 = vmatmul.mubr.msk.bf16.gmra.mxu1 %vm836_vm0, %v7476_v18  ;;  %v1351_v18 = vsel %vm1344_vm3, %v1348_v11, %v1350_v13  ;;  %v1366_v11 = vrot.slane %v7536_v6, 1 }
  0xaa   : > { %1890 = vmatprep.mubr.bf16.mxu1 %v10063_v2  ;;  %2215 = vmatpush1.bf16.msra.mxu0 %v6998_v8 }
  0xab   : > { %3248 = vmatprep.subr.bf16.mxu0 %v10063_v2 }
  0xad   : > { %6338 = vmatmul.mubr.msk.bf16.gmra.mxu0 %vm836_vm0, %v1349_v12 }
  0xae   : > { %1496 = vmatprep.mubr.bf16.mxu0 %v10063_v2 }
  0xb1   : > { %6363 = vmatmul.mubr.msk.bf16.gmra.mxu1 %vm836_vm0, %v7480_v22  ;;  %v1354_v22 = vrot.slane %v7457_v56, 1 }
  0xb2   : > { %1900 = vmatprep.mubr.bf16.mxu1 %v10063_v2 }
  0xb3   : > { %v1355_v23 = vsel %vm1344_vm3, %v1352_v15, %v1354_v22 }
  0xb5   : > { %6339 = vmatmul.mubr.msk.bf16.gmra.mxu0 %vm836_vm0, %v1351_v18 }
  0xb6   : > { %1506 = vmatprep.mubr.bf16.mxu0 %v10063_v2 }
  0xb9   : > { %6364 = vmatmul.mubr.msk.bf16.gmra.mxu1 %vm836_vm0, %v7486_v24  ;;  %v1356_v24 = vrot.slane %v7465_v0, 1 }
  0xba   : > { %1910 = vmatprep.mubr.bf16.mxu1 %v10063_v2 }
  0xbb   : > { %v1357_v25 = vsel %vm1344_vm3, %v1354_v22, %v1356_v24 }
  0xbd   : > { %6340 = vmatmul.mubr.msk.bf16.gmra.mxu0 %vm836_vm0, %v1353_v19  ;;  %v1367_v19 = vsel %vm1344_vm3, %v1364_v42, %v1366_v11 }
  0xbe   : > { %1516 = vmatprep.mubr.bf16.mxu0 %v10063_v2 }
  0xc1   : > { %6365 = vmatmul.mubr.msk.bf16.gmra.mxu1 %vm836_vm0, %v7500_v37  ;;  %v1358_v37 = vrot.slane %v7497_v36, 1 }
  0xc2   : > { %1920 = vmatprep.mubr.bf16.mxu1 %v10063_v2 }
  0xc3   : > { %v1359_v27 = vsel %vm1344_vm3, %v1356_v24, %v1358_v37 }
  0xc5   : > { %6341 = vmatmul.mubr.msk.bf16.gmra.mxu0 %vm836_vm0, %v1355_v23 }
  0xc6   : > { %1526 = vmatprep.mubr.bf16.mxu0 %v10063_v2 }
  0xc9   : > { %6366 = vmatmul.mubr.msk.bf16.gmra.mxu1 %vm836_vm0, %v7522_v57  ;;  %v1360_v57 = vrot.slane %v7514_v50, 1 }
  0xca   : > { %1930 = vmatprep.mubr.bf16.mxu1 %v10063_v2 }
  0xcb   : > { %v1361_v28 = vsel %vm1344_vm3, %v1358_v37, %v1360_v57 }
  0xcd   : > { %6342 = vmatmul.mubr.msk.bf16.gmra.mxu0 %vm836_vm0, %v1357_v25 }
  0xce   : > { %1536 = vmatprep.mubr.bf16.mxu0 %v10063_v2 }
  0xd1   : > { %6367 = vmatmul.mubr.msk.bf16.gmra.mxu1 %vm836_vm0, %v7545_v16  ;;  %v1362_v16 = vrot.slane %v7517_v53, 1 }
  0xd2   : > { %1940 = vmatprep.mubr.bf16.mxu1 %v10063_v2 }
  0xd3   : > { %v1363_v35 = vsel %vm1344_vm3, %v1360_v57, %v1362_v16  ;;  %v1365_v54 = vsel %vm1344_vm3, %v1362_v16, %v1364_v42  ;;  %v1368_v57 = vrot.slane %v7538_v7, 1 }
  0xd5   : > { %6343 = vmatmul.mubr.msk.bf16.gmra.mxu0 %vm836_vm0, %v1359_v27 }
  0xd6   : > { %1546 = vmatprep.mubr.bf16.mxu0 %v10063_v2 }
  0xd9   : > { %6368 = vmatmul.mubr.msk.bf16.gmra.mxu1 %vm836_vm0, %v7558_v32 }
  0xda   : > { %1950 = vmatprep.mubr.bf16.mxu1 %v10063_v2 }
  0xdd   : > { %6344 = vmatmul.mubr.msk.bf16.gmra.mxu0 %vm836_vm0, %v1361_v28 }
  0xde   : > { %1556 = vmatprep.mubr.bf16.mxu0 %v10063_v2 }
  0xe1   : > { %v1164_v29 = vpop.f32.mrf.mxu1  ;;  %6369 = vmatmul.mubr.msk.bf16.gmra.mxu1 %vm836_vm0, %v7572_v46 }
  0xe2   : > { %1960 = vmatprep.mubr.bf16.mxu1 %v10063_v2 }
  0xe3   : > { %v1166_v34 = vpop.f32.mrf.mxu1 }
  0xe5   : > { %v1168_v32 = vpop.f32.mrf.mxu1  ;;  %v919_v38 = vpop.f32.mrf.mxu0  ;;  %6345 = vmatmul.mubr.msk.bf16.gmra.mxu0 %vm836_vm0, %v1363_v35 }
  0xe6   : > { %v7727_v41 = vadd.f32 %v1164_v29, %v919_v38  ;;  %1566 = vmatprep.mubr.bf16.mxu0 %v10063_v2 }
  0xe7   : > { %v1170_v39 = vpop.f32.mrf.mxu1  ;;  %v921_v43 = vpop.f32.mrf.mxu0 }
  0xe8   : > { %v7733_v46 = vadd.f32 %v1166_v34, %v921_v43 }
  0xe9   : > { %v1174_v44 = vpop.f32.mrf.mxu1  ;;  %6370 = vmatmul.mubr.msk.bf16.gmra.mxu1 %vm836_vm0, %v7584_v60  ;;  %v923_v48 = vpop.f32.mrf.mxu0  ;;  %v1755_v60 = vrot.slane %v785_v26, 2 }
  0xea   : > { %1970 = vmatprep.mubr.bf16.mxu1 %v10063_v2  ;;  %v7736_v52 = vadd.f32 %v1168_v32, %v923_v48  ;;  %v1369_v32 = vsel %vm1344_vm3, %v1366_v11, %v1368_v57 }
  0xeb   : > { %v1176_v49 = vpop.f32.mrf.mxu1  ;;  %v925_v55 = vpop.f32.mrf.mxu0  ;;  %v1756_v26 = vor.u32 %v1755_v60, %v1754_v1 }
  0xec   : > { %v7739_v63 = vadd.f32 %v1170_v39, %v925_v55 }
  0xed   : > { %v1178_v62 = vpop.f32.mrf.mxu1  ;;  %v929_v4 = vpop.f32.mrf.mxu0  ;;  %6346 = vmatmul.mubr.msk.bf16.gmra.mxu0 %vm836_vm0, %v1365_v54  ;;  %v1757_v25 = vsel %vm1706_vm2, %v7591_v3, %v1756_v26  ;;  %v1761_v43 = vsel %vm1706_vm2, %v1756_v26, %v7619_v30  ;;  %v1370_v54 = vrot.slane %v7569_v45, 1 }
  0xee   : > { %v7746_v10 = vadd.f32 %v1174_v44, %v929_v4  ;;  %1576 = vmatprep.mubr.bf16.mxu0 %v10063_v2 }
  0xef   : > { %v1180_v9 = vpop.f32.mrf.mxu1  ;;  %v931_v8 = vpop.f32.mrf.mxu0 }
  0xf0   : > { %v7752_v13 = vadd.f32 %v1176_v49, %v931_v8 }
  0xf1   : > { %v1184_v12 = vpop.f32.mrf.mxu1  ;;  %6371 = vmatmul.mubr.msk.bf16.gmra.mxu1 %vm836_vm0, %v7597_v5  ;;  %v933_v40 = vpop.f32.mrf.mxu0 }
  0xf2   : > { %1980 = vmatprep.mubr.bf16.mxu1 %v10063_v2  ;;  %v7755_v15 = vadd.f32 %v1178_v62, %v933_v40 }
  0xf3   : > { %v1186_v18 = vpop.f32.mrf.mxu1  ;;  %v935_v22 = vpop.f32.mrf.mxu0 }
  0xf4   : > { %v7758_v24 = vadd.f32 %v1180_v9, %v935_v22  ;;  %v1371_v9 = vsel %vm1344_vm3, %v1368_v57, %v1370_v54 }
  0xf5   : > { %v1188_v23 = vpop.f32.mrf.mxu1  ;;  %v939_v37 = vpop.f32.mrf.mxu0  ;;  %6347 = vmatmul.mubr.msk.bf16.gmra.mxu0 %vm836_vm0, %v1367_v19  ;;  %v1372_v19 = vrot.slane %v7609_v21, 1 }
  0xf6   : > { %v7763_v27 = vadd.f32 %v1184_v12, %v939_v37  ;;  %1586 = vmatprep.mubr.bf16.mxu0 %v10063_v2 }
  0xf7   : > { %v1190_v5 = vpop.f32.mrf.mxu1  ;;  %v941_v28 = vpop.f32.mrf.mxu0 }
  0xf8   : > { %v7768_v29 = vadd.f32 %v1186_v18, %v941_v28  ;;  %v1373_v28 = vsel %vm1344_vm3, %v1370_v54, %v1372_v19 }
  0xf9   : > { %v1194_v16 = vpop.f32.mrf.mxu1  ;;  %6372 = vmatmul.mubr.msk.bf16.gmra.mxu1 %vm836_vm0, %v1757_v25  ;;  %v943_v34 = vpop.f32.mrf.mxu0 }
  0xfa   : > { %1990 = vmatprep.mubr.bf16.mxu1 %v10063_v2  ;;  %v7771_v35 = vadd.f32 %v1188_v23, %v943_v34 }
  0xfb   : > { %v1196_v3 = vpop.f32.mrf.mxu1  ;;  %v945_v38 = vpop.f32.mrf.mxu0 }
  0xfc   : > { %v7774_v42 = vadd.f32 %v1190_v5, %v945_v38 }
  0xfd   : > { %v1198_v39 = vpop.f32.mrf.mxu1  ;;  %v949_v44 = vpop.f32.mrf.mxu0  ;;  %6348 = vmatmul.mubr.msk.bf16.gmra.mxu0 %vm836_vm0, %v1369_v32 }
  0xfe   : > { %v7779_v49 = vadd.f32 %v1194_v16, %v949_v44  ;;  %1596 = vmatprep.mubr.bf16.mxu0 %v10063_v2 }
  0xff   : > { %v1200_v48 = vpop.f32.mrf.mxu1  ;;  %v951_v55 = vpop.f32.mrf.mxu0 }
 0x100   : > { %v7784_v1 = vadd.f32 %v1196_v3, %v951_v55 }
 0x101   : > { %v1204_v62 = vpop.f32.mrf.mxu1  ;;  %6373 = vmatmul.mubr.msk.bf16.gmra.mxu1 %vm836_vm0, %v1761_v43  ;;  %v953_v60 = vpop.f32.mrf.mxu0 }
 0x102   : > { %2000 = vmatprep.mubr.bf16.mxu1 %v10063_v2  ;;  %v7787_v4 = vadd.f32 %v1198_v39, %v953_v60 }
 0x103   : > { %v1206_v30 = vpop.f32.mrf.mxu1  ;;  %v955_v11 = vpop.f32.mrf.mxu0 }
 0x104   : > { %v7790_v12 = vadd.f32 %v1200_v48, %v955_v11 }
 0x105   : > { %v1208_v8 = vpop.f32.mrf.mxu1  ;;  %v959_v26 = vpop.f32.mrf.mxu0  ;;  %6349 = vmatmul.mubr.msk.bf16.gmra.mxu0 %vm836_vm0, %v1371_v9 }
 0x106   : > { %v7795_v18 = vadd.f32 %v1204_v62, %v959_v26  ;;  %1606 = vmatprep.mubr.bf16.mxu0 %v10063_v2 }
 0x107   : > { %v7793_v40 = vpop.f32.mrf.mxu1  ;;  %v961_v22 = vpop.f32.mrf.mxu0 }
 0x108   : > { %10080 = vst [vmem:[#allocation3_spill] sm:$0xff] %v7793_v40  ;;  %v7801_v25 = vadd.f32 %v1206_v30, %v961_v22 }
 0x109   : > { %v1214_v23 = vpop.f32.mrf.mxu1  ;;  %6374 = vmatmul.mubr.msk.bf16.gmra.mxu1 %vm836_vm0, %v7635_v51  ;;  %v963_v37 = vpop.f32.mrf.mxu0  ;;  %v1374_v51 = vrot.slane %v7622_v31, 1 }
 0x10a   : > { %2010 = vmatprep.mubr.bf16.mxu1 %v10063_v2  ;;  %v7804_v57 = vadd.f32 %v1208_v8, %v963_v37 }
 0x10b   : > { %v1216_v5 = vpop.f32.mrf.mxu1  ;;  %v7807_v16 = vpop.f32.mrf.mxu0  ;;  %v1375_v62 = vsel %vm1344_vm3, %v1372_v19, %v1374_v51 }
 0x10c   : > { %10081 = vst [vmem:[#allocation4_spill] sm:$0xff] %v7807_v16 }
 0x10d   : > { %v1218_v34 = vpop.f32.mrf.mxu1  ;;  %v969_v3 = vpop.f32.mrf.mxu0  ;;  %6350 = vmatmul.mubr.msk.bf16.gmra.mxu0 %vm836_vm0, %v1373_v28 }
 0x10e   : > { %v7812_v38 = vadd.f32 %v1214_v23, %v969_v3  ;;  %1616 = vmatprep.mubr.bf16.mxu0 %v10063_v2 }
 0x10f   : > { %v7810_v32 = vpop.f32.mrf.mxu1  ;;  %v971_v39 = vpop.f32.mrf.mxu0 }
 0x110   : > { %10082 = vst [vmem:[#allocation5_spill] sm:$0xff] %v7810_v32  ;;  %v7818_v44 = vadd.f32 %v1216_v5, %v971_v39 }
 0x111   : > { %v1224_v43 = vpop.f32.mrf.mxu1  ;;  %6375 = vmatmul.mubr.msk.bf16.gmra.mxu1 %vm836_vm0, %v7647_v61  ;;  %v973_v48 = vpop.f32.mrf.mxu0 }
 0x112   : > { %2020 = vmatprep.mubr.bf16.mxu1 %v10063_v2  ;;  %v7821_v55 = vadd.f32 %v1218_v34, %v973_v48 }
 0x113   : > { %v1226_v54 = vpop.f32.mrf.mxu1  ;;  %v7824_v60 = vpop.f32.mrf.mxu0 }
 0x114   : > { %10083 = vst [vmem:[#allocation6_spill] sm:$0xff] %v7824_v60 }
 0x115   : > { %v1228_v30 = vpop.f32.mrf.mxu1  ;;  %v979_v9 = vpop.f32.mrf.mxu0  ;;  %6351 = vmatmul.mubr.msk.bf16.gmra.mxu0 %vm836_vm0, %v1375_v62 }
 0x116   : > { %v7829_v8 = vadd.f32 %v1224_v43, %v979_v9  ;;  %1626 = vmatprep.mubr.bf16.mxu0 %v10063_v2  ;;  %v2102_v43 = vrot.slane %v7395_v17, 2 }
 0x117   : > { %v7827_v11 = vpop.f32.mrf.mxu1  ;;  %v981_v61 = vpop.f32.mrf.mxu0 }
 0x118   : > { %10084 = vst [vmem:[#allocation7_spill] sm:$0xff] %v7827_v11  ;;  %v7834_v22 = vadd.f32 %v1226_v54, %v981_v61 }
 0x119   : > { %v1234_v26 = vpop.f32.mrf.mxu1  ;;  %6376 = vmatmul.mubr.msk.bf16.gmra.mxu1 %vm836_vm0, %v7641_v59  ;;  %v983_v19 = vpop.f32.mrf.mxu0  ;;  %v2101_v59 = vrot.slane %v7391_v14, 2 }
 0x11a   : > { %v7836_v37 = vadd.f32 %v1228_v30, %v983_v19 }
 0x11b   : > { %v1236_v23 = vpop.f32.mrf.mxu1  ;;  %v7838_v5 = vpop.f32.mrf.mxu0 }
 0x11c   : > { %10085 = vst [vmem:[#allocation8_spill] sm:$0xff] %v7838_v5 }
 0x11d   : > { %v1238_v28 = vpop.f32.mrf.mxu1  ;;  %v989_v34 = vpop.f32.mrf.mxu0  ;;  %6352 = vmatmul.mubr.msk.bf16.gmra.mxu0 %vm836_vm0, %v1374_v51  ;;  %v2103_v51 = vsel %vm2100_vm4, %v2101_v59, %v2102_v43 }
 0x11e   : > { %v7843_v39 = vadd.f32 %v1234_v26, %v989_v34  ;;  %2232 = vmatprep.mubr.bf16.mxu0 %v10063_v2 }
 0x11f   : > { %v7841_v3 = vpop.f32.mrf.mxu1  ;;  %v991_v48 = vpop.f32.mrf.mxu0 }
 0x120   : > { %10086 = vst [vmem:[#allocation9_spill] sm:$0xff] %v7841_v3  ;;  %v7848_v62 = vadd.f32 %v1236_v23, %v991_v48  ;;  %v2104_v23 = vrot.slane %v7399_v20, 2  ;;  %v2106_v20 = vrot.slane %v7415_v33, 2  ;;  %v2108_v33 = vrot.slane %v7445_v47, 2 }
 0x121   : > { %v1244_v54 = vpop.f32.mrf.mxu1  ;;  %v993_v30 = vpop.f32.mrf.mxu0  ;;  %v2110_v47 = vrot.slane %v7457_v56, 2  ;;  %v2112_v56 = vrot.slane %v7465_v0, 2  ;;  %v2114_v0 = vrot.slane %v7497_v36, 2  ;;  %v2116_v36 = vrot.slane %v7514_v50, 2 }
 0x122   : > { %v7850_v61 = vadd.f32 %v1238_v28, %v993_v30  ;;  %v2118_v50 = vrot.slane %v7517_v53, 2 }
 0x123   : > { %v1246_v9 = vpop.f32.mrf.mxu1  ;;  %v7853_v19 = vpop.f32.mrf.mxu0 }
 0x124   : > { %10087 = vst [vmem:[#allocation10_spill] sm:$0xff] %v7853_v19  ;;  %v2105_v19 = vsel %vm2100_vm4, %v2102_v43, %v2104_v23 }
 0x125   : > { %v1248_v26 = vpop.f32.mrf.mxu1  ;;  %v999_v34 = vpop.f32.mrf.mxu0  ;;  %6385 = vmatmul.mubr.msk.bf16.vlgmr.msra.gmra.mxu0 %vm836_vm0, %v2103_v51 }
 0x126   : > { %v7858_v17 = vadd.f32 %v1244_v54, %v999_v34  ;;  %2242 = vmatprep.mubr.bf16.mxu0 %v10063_v2 }
 0x127   : > { %v7856_v14 = vpop.f32.mrf.mxu1  ;;  %v1001_v48 = vpop.f32.mrf.mxu0 }
 0x128   : > { %10088 = vst [vmem:[#allocation11_spill] sm:$0xff] %v7856_v14  ;;  %v7862_v28 = vadd.f32 %v1246_v9, %v1001_v48 }
 0x129   : > { %v1254_v3 = vpop.f32.mrf.mxu1  ;;  %v1003_v30 = vpop.f32.mrf.mxu0 }
 0x12a   : > { %v7864_v11 = vadd.f32 %v1248_v26, %v1003_v30 }
 0x12b   : > { %v1256_v59 = vpop.f32.mrf.mxu1  ;;  %v7867_v5 = vpop.f32.mrf.mxu0 }
 0x12c   : > { %10089 = vst [vmem:[#allocation12_spill] sm:$0xff] %v7867_v5  ;;  %v2107_v5 = vsel %vm2100_vm4, %v2104_v23, %v2106_v20 }
 0x12d   : > { %v1258_v51 = vpop.f32.mrf.mxu1  ;;  %v1009_v14 = vpop.f32.mrf.mxu0  ;;  %6386 = vmatmul.mubr.msk.bf16.gmra.mxu0 %vm836_vm0, %v2105_v19 }
 0x12e   : > { %v7872_v34 = vadd.f32 %v1254_v3, %v1009_v14  ;;  %2252 = vmatprep.mubr.bf16.mxu0 %v10063_v2 }
 0x12f   : > { %v7870_v54 = vpop.f32.mrf.mxu1  ;;  %v1011_v9 = vpop.f32.mrf.mxu0 }
 0x130   : > { %10090 = vst [vmem:[#allocation13_spill] sm:$0xff] %v7870_v54  ;;  %v7876_v26 = vadd.f32 %v1256_v59, %v1011_v9 }
 0x131   : > { %v1264_v48 = vpop.f32.mrf.mxu1  ;;  %v1013_v30 = vpop.f32.mrf.mxu0 }
 0x132   : > { %v7878_v32 = vadd.f32 %v1258_v51, %v1013_v30 }
 0x133   : > { %v1266_v43 = vpop.f32.mrf.mxu1  ;;  %v7881_v60 = vpop.f32.mrf.mxu0 }
 0x134   : > { %10091 = vst [vmem:[#allocation14_spill] sm:$0xff] %v7881_v60  ;;  %v2109_v60 = vsel %vm2100_vm4, %v2106_v20, %v2108_v33 }
 0x135   : > { %v1268_v19 = vpop.f32.mrf.mxu1  ;;  %v1019_v54 = vpop.f32.mrf.mxu0  ;;  %6387 = vmatmul.mubr.msk.bf16.gmra.mxu0 %vm836_vm0, %v2107_v5 }
 0x136   : > { %v7886_v14 = vadd.f32 %v1264_v48, %v1019_v54  ;;  %2262 = vmatprep.mubr.bf16.mxu0 %v10063_v2 }
 0x137   : > { %v7884_v3 = vpop.f32.mrf.mxu1  ;;  %v1021_v59 = vpop.f32.mrf.mxu0 }
 0x138   : > { %10092 = vst [vmem:[#allocation15_spill] sm:$0xff] %v7884_v3  ;;  %v7890_v51 = vadd.f32 %v1266_v43, %v1021_v59 }
 0x139   : > { %v1274_v9 = vpop.f32.mrf.mxu1  ;;  %v1023_v30 = vpop.f32.mrf.mxu0 }
 0x13a   : > { %10093 = vst [vmem:[#allocation16_spill] sm:$0xff] %v7890_v51  ;;  %v7892_v40 = vadd.f32 %v1268_v19, %v1023_v30 }
 0x13b   : > { %v1276_v23 = vpop.f32.mrf.mxu1  ;;  %v7895_v16 = vpop.f32.mrf.mxu0 }
 0x13c   : > { %10094 = vst [vmem:[#allocation17_spill] sm:$0xff] %v7892_v40  ;;  %10095 = vst [vmem:[#allocation18_spill] sm:$0xff] %v7895_v16  ;;  %v2111_v16 = vsel %vm2100_vm4, %v2108_v33, %v2110_v47 }
 0x13d   : > { %v1278_v5 = vpop.f32.mrf.mxu1  ;;  %v1029_v3 = vpop.f32.mrf.mxu0  ;;  %6388 = vmatmul.mubr.msk.bf16.gmra.mxu0 %vm836_vm0, %v2109_v60 }
 0x13e   : > { %v7900_v48 = vadd.f32 %v1274_v9, %v1029_v3  ;;  %2272 = vmatprep.mubr.bf16.mxu0 %v10063_v2 }
 0x13f   : > { %v7898_v54 = vpop.f32.mrf.mxu1  ;;  %v1031_v43 = vpop.f32.mrf.mxu0 }
 0x140   : > { %10096 = vst [vmem:[#allocation19_spill] sm:$0xff] %v7898_v54  ;;  %v7904_v19 = vadd.f32 %v1276_v23, %v1031_v43 }
 0x141   : > { %v1284_v59 = vpop.f32.mrf.mxu1  ;;  %v1033_v30 = vpop.f32.mrf.mxu0 }
 0x142   : > { %10097 = vst [vmem:[#allocation20_spill] sm:$0xff] %v7904_v19  ;;  %v7906_v40 = vadd.f32 %v1278_v5, %v1033_v30 }
 0x143   : > { %v1286_v20 = vpop.f32.mrf.mxu1  ;;  %v7909_v51 = vpop.f32.mrf.mxu0 }
 0x144   : > { %10098 = vst [vmem:[#allocation21_spill] sm:$0xff] %v7906_v40  ;;  %10099 = vst [vmem:[#allocation22_spill] sm:$0xff] %v7909_v51  ;;  %v2113_v51 = vsel %vm2100_vm4, %v2110_v47, %v2112_v56 }
 0x145   : > { %v1288_v60 = vpop.f32.mrf.mxu1  ;;  %v1039_v54 = vpop.f32.mrf.mxu0  ;;  %6389 = vmatmul.mubr.msk.bf16.gmra.mxu0 %vm836_vm0, %v2111_v16 }
 0x146   : > { %v7914_v9 = vadd.f32 %v1284_v59, %v1039_v54  ;;  %2282 = vmatprep.mubr.bf16.mxu0 %v10063_v2 }
 0x147   : > { %v7912_v3 = vpop.f32.mrf.mxu1  ;;  %v1041_v23 = vpop.f32.mrf.mxu0 }
 0x148   : > { %10100 = vst [vmem:[#allocation23_spill] sm:$0xff] %v7912_v3  ;;  %v7918_v5 = vadd.f32 %v1286_v20, %v1041_v23 }
 0x149   : > { %v1294_v43 = vpop.f32.mrf.mxu1  ;;  %v1043_v30 = vpop.f32.mrf.mxu0 }
 0x14a   : > { %10101 = vst [vmem:[#allocation24_spill] sm:$0xff] %v7918_v5  ;;  %v7920_v40 = vadd.f32 %v1288_v60, %v1043_v30 }
 0x14b   : > { %v1296_v33 = vpop.f32.mrf.mxu1  ;;  %v7923_v19 = vpop.f32.mrf.mxu0 }
 0x14c   : > { %10102 = vst [vmem:[#allocation25_spill] sm:$0xff] %v7920_v40  ;;  %10103 = vst [vmem:[#allocation26_spill] sm:$0xff] %v7923_v19  ;;  %v2115_v19 = vsel %vm2100_vm4, %v2112_v56, %v2114_v0 }
 0x14d   : > { %v1298_v16 = vpop.f32.mrf.mxu1  ;;  %v1049_v3 = vpop.f32.mrf.mxu0  ;;  %6390 = vmatmul.mubr.msk.bf16.gmra.mxu0 %vm836_vm0, %v2113_v51 }
 0x14e   : > { %v7928_v59 = vadd.f32 %v1294_v43, %v1049_v3  ;;  %2292 = vmatprep.mubr.bf16.mxu0 %v10063_v2 }
 0x14f   : > { %v7926_v54 = vpop.f32.mrf.mxu1  ;;  %v1051_v20 = vpop.f32.mrf.mxu0 }
 0x150   : > { %10104 = vst [vmem:[#allocation27_spill] sm:$0xff] %v7926_v54  ;;  %v7932_v60 = vadd.f32 %v1296_v33, %v1051_v20 }
 0x151   : > { %v1304_v23 = vpop.f32.mrf.mxu1  ;;  %v1053_v30 = vpop.f32.mrf.mxu0 }
 0x152   : > { %10105 = vst [vmem:[#allocation28_spill] sm:$0xff] %v7932_v60  ;;  %v7934_v40 = vadd.f32 %v1298_v16, %v1053_v30 }
 0x153   : > { %v1306_v47 = vpop.f32.mrf.mxu1  ;;  %v7937_v5 = vpop.f32.mrf.mxu0 }
 0x154   : > { %10106 = vst [vmem:[#allocation29_spill] sm:$0xff] %v7934_v40  ;;  %10107 = vst [vmem:[#allocation30_spill] sm:$0xff] %v7937_v5  ;;  %v2117_v5 = vsel %vm2100_vm4, %v2114_v0, %v2116_v36 }
 0x155   : > { %v1308_v51 = vpop.f32.mrf.mxu1  ;;  %v1059_v54 = vpop.f32.mrf.mxu0  ;;  %6391 = vmatmul.mubr.msk.bf16.gmra.mxu0 %vm836_vm0, %v2115_v19 }
 0x156   : > { %v7942_v43 = vadd.f32 %v1304_v23, %v1059_v54  ;;  %2302 = vmatprep.mubr.bf16.mxu0 %v10063_v2 }
 0x157   : > { %v7940_v3 = vpop.f32.mrf.mxu1  ;;  %v1061_v33 = vpop.f32.mrf.mxu0 }
 0x158   : > { %10108 = vst [vmem:[#allocation31_spill] sm:$0xff] %v7940_v3  ;;  %v7946_v16 = vadd.f32 %v1306_v47, %v1061_v33 }
 0x159   : > { %v1314_v20 = vpop.f32.mrf.mxu1  ;;  %v1063_v30 = vpop.f32.mrf.mxu0 }
 0x15a   : > { %10109 = vst [vmem:[#allocation32_spill] sm:$0xff] %v7946_v16  ;;  %v7948_v40 = vadd.f32 %v1308_v51, %v1063_v30 }
 0x15b   : > { %v1316_v56 = vpop.f32.mrf.mxu1  ;;  %v7951_v60 = vpop.f32.mrf.mxu0 }
 0x15c   : > { %10110 = vst [vmem:[#allocation33_spill] sm:$0xff] %v7948_v40  ;;  %10111 = vst [vmem:[#allocation34_spill] sm:$0xff] %v7951_v60  ;;  %v2119_v60 = vsel %vm2100_vm4, %v2116_v36, %v2118_v50 }
 0x15d   : > { %v1318_v19 = vpop.f32.mrf.mxu1  ;;  %v1069_v3 = vpop.f32.mrf.mxu0  ;;  %6392 = vmatmul.mubr.msk.bf16.gmra.mxu0 %vm836_vm0, %v2117_v5 }
 0x15e   : > { %v7956_v23 = vadd.f32 %v1314_v20, %v1069_v3  ;;  %2312 = vmatprep.mubr.bf16.mxu0 %v10063_v2  ;;  %v2120_v20 = vrot.slane %v7526_v58, 2 }
 0x15f   : > { %v7954_v54 = vpop.f32.mrf.mxu1  ;;  %v1071_v47 = vpop.f32.mrf.mxu0 }
 0x160   : > { %10112 = vst [vmem:[#allocation35_spill] sm:$0xff] %v7954_v54  ;;  %v7960_v51 = vadd.f32 %v1316_v56, %v1071_v47 }
 0x161   : > { %v1872_v33 = vpop.f32.mrf.mxu1  ;;  %v1073_v30 = vpop.f32.mrf.mxu0 }
 0x162   : > { %10113 = vst [vmem:[#allocation36_spill] sm:$0xff] %v7960_v51  ;;  %v7962_v40 = vadd.f32 %v1318_v19, %v1073_v30 }
 0x163   : > { %v1874_v0 = vpop.f32.mrf.mxu1  ;;  %v7965_v16 = vpop.f32.mrf.mxu0 }
 0x164   : > { %10114 = vst [vmem:[#allocation37_spill] sm:$0xff] %v7962_v40  ;;  %10115 = vst [vmem:[#allocation38_spill] sm:$0xff] %v7965_v16 }
 0x165   : > { %v1876_v5 = vpop.f32.mrf.mxu1  ;;  %v1478_v54 = vpop.f32.mrf.mxu0  ;;  %6393 = vmatmul.mubr.msk.bf16.gmra.mxu0 %vm836_vm0, %v2119_v60  ;;  %v2121_v60 = vsel %vm2100_vm4, %v2118_v50, %v2120_v20 }
 0x166   : > { %v1637_v53 = vadd.f32 %v1478_v54, %v7727_v41  ;;  %2322 = vmatprep.mubr.bf16.mxu0 %v10063_v2 }
 0x167   : > { %v7968_v3 = vpop.f32.mrf.mxu1  ;;  %v1480_v56 = vpop.f32.mrf.mxu0 }
 0x168   : > { %10116 = vst [vmem:[#allocation39_spill] sm:$0xff] %v7968_v3  ;;  %v1638_v19 = vadd.f32 %v1480_v56, %v7733_v46  ;;  %v7974_v30 = vadd.f32 %v1872_v33, %v1637_v53  ;;  %v10117_v53 = vmov 0  }
 0x169   : > { %v1882_v47 = vpop.f32.mrf.mxu1  ;;  %v1482_v36 = vpop.f32.mrf.mxu0 }
 0x16a   : > { %v1639_v40 = vadd.f32 %v1482_v36, %v7736_v52  ;;  %v7977_v51 = vadd.f32 %v1874_v0, %v1638_v19  ;;  %v2122_v52 = vrot.slane %v7536_v6, 2 }
 0x16b   : > { %v1884_v16 = vpop.f32.mrf.mxu1  ;;  %v1484_v3 = vpop.f32.mrf.mxu0 }
 0x16c   : > { %v7981_v54 = vadd.f32 %v1484_v3, %v7739_v63  ;;  %v7983_v58 = vadd.f32 %v1876_v5, %v1639_v40  ;;  %v2123_v36 = vsel %vm2100_vm4, %v2120_v20, %v2122_v52 }
 0x16d   : > { %v1886_v41 = vpop.f32.mrf.mxu1  ;;  %v1488_v2 = vpop.f32.mrf.mxu0  ;;  %6394 = vmatmul.mubr.msk.bf16.gmra.mxu0 %vm836_vm0, %v2121_v60 }
 0x16e   : > { %v1641_v33 = vadd.f32 %v1488_v2, %v7746_v10  ;;  %2332 = vmatprep.mubr.bf16.mxu0 %v10117_v53 }
 0x16f   : > { %v7986_v46 = vpop.f32.mrf.mxu1  ;;  %v1490_v0 = vpop.f32.mrf.mxu0 }
 0x170   : > { %v1642_v56 = vadd.f32 %v1490_v0, %v7752_v13  ;;  %v7992_v19 = vadd.f32 %v1882_v47, %v1641_v33 }
 0x171   : > { %v1892_v50 = vpop.f32.mrf.mxu1  ;;  %v1492_v63 = vpop.f32.mrf.mxu0 }
 0x172   : > { %v1643_v5 = vadd.f32 %v1492_v63, %v7755_v15  ;;  %v7997_v3 = vadd.f32 %v1884_v16, %v1642_v56  ;;  %v2124_v15 = vrot.slane %v7538_v7, 2 }
 0x173   : > { %v7994_v40 = vpop.f32.mrf.mxu1  ;;  %v1494_v2 = vpop.f32.mrf.mxu0 }
 0x174   : > { %v8003_v6 = vadd.f32 %v1494_v2, %v7758_v24  ;;  %v8005_v60 = vadd.f32 %v1886_v41, %v1643_v5 }
 0x175   : > { %v8000_v10 = vpop.f32.mrf.mxu1  ;;  %v1498_v13 = vpop.f32.mrf.mxu0  ;;  %6395 = vmatmul.mubr.msk.bf16.gmra.mxu0 %vm836_vm0, %v2123_v36 }
 0x176   : > { %v1645_v33 = vadd.f32 %v1498_v13, %v7763_v27  ;;  %2342 = vmatprep.mubr.bf16.mxu0 %v10117_v53  ;;  %v2125_v27 = vsel %vm2100_vm4, %v2122_v52, %v2124_v15 }
 0x177   : > { %v8008_v47 = vpop.f32.mrf.mxu1  ;;  %v1500_v16 = vpop.f32.mrf.mxu0 }
 0x178   : > { %v8016_v0 = vadd.f32 %v1500_v16, %v7768_v29  ;;  %v8018_v24 = vadd.f32 %v1892_v50, %v1645_v33 }
 0x179   : > { %v8013_v20 = vpop.f32.mrf.mxu1  ;;  %v1502_v41 = vpop.f32.mrf.mxu0 }
 0x17a   : > { %v8023_v63 = vadd.f32 %v1502_v41, %v7771_v35  ;;  %v2126_v35 = vrot.slane %v7569_v45, 2 }
 0x17b   : > { %v8020_v56 = vpop.f32.mrf.mxu1  ;;  %v1504_v5 = vpop.f32.mrf.mxu0 }
 0x17c   : > { %v8029_v7 = vadd.f32 %v1504_v5, %v7774_v42 }
 0x17d   : > { %v8026_v36 = vpop.f32.mrf.mxu1  ;;  %v1508_v2 = vpop.f32.mrf.mxu0  ;;  %6396 = vmatmul.mubr.msk.bf16.gmra.mxu0 %vm836_vm0, %v2125_v27  ;;  %v2127_v27 = vsel %vm2100_vm4, %v2124_v15, %v2126_v35 }
 0x17e   : > { %v8035_v50 = vadd.f32 %v1508_v2, %v7779_v49  ;;  %2352 = vmatprep.mubr.bf16.mxu0 %v10117_v53 }
 0x17f   : > { %v8032_v29 = vpop.f32.mrf.mxu1  ;;  %v1510_v13 = vpop.f32.mrf.mxu0 }
 0x180   : > { %v8042_v33 = vadd.f32 %v1510_v13, %v7784_v1 }
 0x181   : > { %v8039_v52 = vpop.f32.mrf.mxu1  ;;  %v1512_v42 = vpop.f32.mrf.mxu0 }
 0x182   : > { %10118 = vst [vmem:[#allocation40_spill] sm:$0xff] %v8039_v52  ;;  %v8047_v41 = vadd.f32 %v1512_v42, %v7787_v4  ;;  %v2128_v4 = vrot.slane %v7609_v21, 2 }
 0x183   : > { %v8044_v16 = vpop.f32.mrf.mxu1  ;;  %v1514_v49 = vpop.f32.mrf.mxu0 }
 0x184   : > { %v8053_v2 = vadd.f32 %v1514_v49, %v7790_v12 }
 0x185   : > { %v8050_v5 = vpop.f32.mrf.mxu1  ;;  %v1518_v45 = vpop.f32.mrf.mxu0  ;;  %6397 = vmatmul.mubr.msk.bf16.gmra.mxu0 %vm836_vm0, %v2127_v27 }
 0x186   : > { %10119 = vst [vmem:[#allocation41_spill] sm:$0xff] %v8050_v5  ;;  %v8059_v1 = vadd.f32 %v1518_v45, %v7795_v18  ;;  %2362 = vmatprep.mubr.bf16.mxu0 %v10117_v53 }
 0x187   : > { %v8056_v52 = vpop.f32.mrf.mxu1  ;;  %v1520_v13 = vpop.f32.mrf.mxu0 }
 0x188   : > { %10120 = vst [vmem:[#allocation42_spill] sm:$0xff] %v8056_v52  ;;  %v8066_v42 = vadd.f32 %v1520_v13, %v7801_v25  ;;  %v2129_v52 = vsel %vm2100_vm4, %v2126_v35, %v2128_v4  ;;  %v2130_v13 = vrot.slane %v7622_v31, 2 }
 0x189   : > { %v8063_v15 = vpop.f32.mrf.mxu1  ;;  %v1522_v12 = vpop.f32.mrf.mxu0 }
 0x18a   : > { %10121 = vst [vmem:[#allocation43_spill] sm:$0xff] %v8063_v15  ;;  %v8071_v27 = vadd.f32 %v1522_v12, %v7804_v57 }
 0x18b   : > { %v8068_v49 = vpop.f32.mrf.mxu1  ;;  %v8074_v18 = vpop.f32.mrf.mxu0 }
 0x18c   : > { %10122 = vst [vmem:[#allocation44_spill] sm:$0xff] %v8068_v49 }
 0x18d   : > { %v8076_v45 = vpop.f32.mrf.mxu1  ;;  %v1528_v5 = vpop.f32.mrf.mxu0  ;;  %6398 = vmatmul.mubr.msk.bf16.gmra.mxu0 %vm836_vm0, %v2129_v52 }
 0x18e   : > { %10123 = vst [vmem:[#allocation45_spill] sm:$0xff] %v8076_v45  ;;  %v8082_v25 = vadd.f32 %v1528_v5, %v7812_v38  ;;  %2372 = vmatprep.mubr.bf16.mxu0 %v10117_v53 }
 0x18f   : > { %v8079_v21 = vpop.f32.mrf.mxu1  ;;  %v1530_v57 = vpop.f32.mrf.mxu0 }
 0x190   : > { %10124 = vst [vmem:[#allocation46_spill] sm:$0xff] %v8079_v21  ;;  %v8089_v35 = vadd.f32 %v1530_v57, %v7818_v44  ;;  %v2131_v21 = vsel %vm2100_vm4, %v2128_v4, %v2130_v13 }
 0x191   : > { %v8086_v12 = vpop.f32.mrf.mxu1  ;;  %v1532_v49 = vpop.f32.mrf.mxu0 }
 0x192   : > { %10125 = vst [vmem:[#allocation47_spill] sm:$0xff] %v8086_v12  ;;  %v8094_v52 = vadd.f32 %v1532_v49, %v7821_v55 }
 0x193   : > { %v8091_v45 = vpop.f32.mrf.mxu1  ;;  %v8097_v38 = vpop.f32.mrf.mxu0 }
 0x194   : > { %10126 = vst [vmem:[#allocation48_spill] sm:$0xff] %v8091_v45 }
 0x195   : > { %v8099_v5 = vpop.f32.mrf.mxu1  ;;  %v1538_v15 = vpop.f32.mrf.mxu0  ;;  %6399 = vmatmul.mubr.msk.bf16.gmra.mxu0 %vm836_vm0, %v2131_v21 }
 0x196   : > { %10127 = vst [vmem:[#allocation49_spill] sm:$0xff] %v8099_v5  ;;  %v8105_v44 = vadd.f32 %v1538_v15, %v7829_v8  ;;  %2382 = vmatprep.mubr.bf16.mxu0 %v10117_v53 }
 0x197   : > { %v8102_v31 = vpop.f32.mrf.mxu1  ;;  %v1540_v57 = vpop.f32.mrf.mxu0 }
 0x198   : > { %10128 = vst [vmem:[#allocation50_spill] sm:$0xff] %v8102_v31  ;;  %v8111_v55 = vadd.f32 %v1540_v57, %v7834_v22 }
 0x199   : > { %v8108_v45 = vpop.f32.mrf.mxu1  ;;  %v1542_v4 = vpop.f32.mrf.mxu0 }
 0x19a   : > { %10129 = vst [vmem:[#allocation51_spill] sm:$0xff] %v8108_v45  ;;  %10130 = vst [vmem:[#allocation52_spill] sm:$0xff] %v8111_v55  ;;  %v8116_v5 = vadd.f32 %v1542_v4, %v7836_v37 }
 0x19b   : > { %v8113_v49 = vpop.f32.mrf.mxu1  ;;  %v8118_v21 = vpop.f32.mrf.mxu0 }
 0x19c   : > { %10131 = vst [vmem:[#allocation53_spill] sm:$0xff] %v8113_v49  ;;  %10132 = vst [vmem:[#allocation54_spill] sm:$0xff] %v8116_v5 }
 0x19d   : > { %10133 = vst [vmem:[#allocation55_spill] sm:$0xff] %v8118_v21  ;;  %v8120_v31 = vpop.f32.mrf.mxu1  ;;  %v1548_v8 = vpop.f32.mrf.mxu0  ;;  %6400 = vmatmul.mubr.msk.bf16.gmra.mxu0 %vm836_vm0, %v2130_v13 }
 0x19e   : > { %10134 = vst [vmem:[#allocation56_spill] sm:$0xff] %v8120_v31  ;;  %v8126_v53 = vadd.f32 %v1548_v8, %v7843_v39 }
 0x19f   : > { %v8123_v15 = vpop.f32.mrf.mxu1  ;;  %v1550_v22 = vpop.f32.mrf.mxu0 }
 0x1a0   : > { %10135 = vst [vmem:[#allocation57_spill] sm:$0xff] %v8123_v15  ;;  %10136 = vst [vmem:[#allocation58_spill] sm:$0xff] %v8126_v53  ;;  %v8129_v45 = vadd.f32 %v1550_v22, %v7848_v62 }
 0x1a1   : > { %v1952_v57 = vpop.f32.mrf.mxu1  ;;  %v1552_v49 = vpop.f32.mrf.mxu0 }
 0x1a2   : > { %10137 = vst [vmem:[#allocation59_spill] sm:$0xff] %v8129_v45  ;;  %v8132_v4 = vadd.f32 %v1552_v49, %v7850_v61 }
 0x1a3   : > { %v1954_v37 = vpop.f32.mrf.mxu1  ;;  %v8134_v5 = vpop.f32.mrf.mxu0 }
 0x1a4   : > { %10138 = vst [vmem:[#allocation60_spill] sm:$0xff] %v8132_v4  ;;  %10139 = vst [vmem:[#allocation61_spill] sm:$0xff] %v8134_v5 }
 0x1a5   : > { %v1956_v31 = vpop.f32.mrf.mxu1  ;;  %v1558_v21 = vpop.f32.mrf.mxu0 }
 0x1a6   : > { %v1669_v15 = vadd.f32 %v1558_v21, %v7858_v17 }
 0x1a7   : > { %v8136_v13 = vpop.f32.mrf.mxu1  ;;  %v1560_v39 = vpop.f32.mrf.mxu0 }
 0x1a8   : > { %10140 = vst [vmem:[#allocation62_spill] sm:$0xff] %v8136_v13  ;;  %v1670_v53 = vadd.f32 %v1560_v39, %v7862_v28  ;;  %v8140_v55 = vadd.f32 %v1952_v57, %v1669_v15 }
 0x1a9   : > { %v1962_v8 = vpop.f32.mrf.mxu1  ;;  %v1562_v62 = vpop.f32.mrf.mxu0 }
 0x1aa   : > { %v1671_v45 = vadd.f32 %v1562_v62, %v7864_v11  ;;  %v8143_v61 = vadd.f32 %v1954_v37, %v1670_v53  ;;  %v10142_v62 = vld [vmem:[#allocation16_spill] sm:$0xff] }
 0x1ab   : > { %v1964_v22 = vpop.f32.mrf.mxu1  ;;  %v8145_v49 = vpop.f32.mrf.mxu0 }
 0x1ac   : > { %v8147_v4 = vadd.f32 %v1956_v31, %v1671_v45 }
 0x1ad   : > { %v1568_v5 = vpop.f32.mrf.mxu0  ;;  %v1966_v13 = vpop.f32.mrf.mxu1 }
 0x1ae   : > { %v1673_v17 = vadd.f32 %v1568_v5, %v7872_v34 }
 0x1af   : > { %v1570_v21 = vpop.f32.mrf.mxu0  ;;  %v8153_v57 = vpop.f32.mrf.mxu1 }
 0x1b0   : > { %v1674_v12 = vadd.f32 %v1570_v21, %v7876_v26  ;;  %v8151_v28 = vadd.f32 %v1962_v8, %v1673_v17  ;;  %10141 = vst [vmem:[#allocation63_spill] sm:$0xff] %v8153_v57  ;;  %v10143_v21 = vld [vmem:[#allocation17_spill] sm:$0xff] }
 0x1b1   : > { %v1572_v15 = vpop.f32.mrf.mxu0  ;;  %v1972_v39 = vpop.f32.mrf.mxu1 }
 0x1b2   : > { %v1675_v11 = vadd.f32 %v1572_v15, %v7878_v32  ;;  %v8156_v53 = vadd.f32 %v1964_v22, %v1674_v12  ;;  %v10146_v15 = vld [vmem:[#allocation20_spill] sm:$0xff] }
 0x1b3   : > { %v8158_v37 = vpop.f32.mrf.mxu0 }
 0x1b4   : > { %v8160_v45 = vadd.f32 %v1966_v13, %v1675_v11 }
 0x1b5   : > { %v1578_v31 = vpop.f32.mrf.mxu0 }
 0x1b6   : > { %v1677_v34 = vadd.f32 %v1578_v31, %v7886_v14  ;;  %v10147_v31 = vld [vmem:[#allocation21_spill] sm:$0xff] }
 0x1b7   : > { %v1580_v5 = vpop.f32.mrf.mxu0 }
 0x1b8   : > { %v8164_v26 = vadd.f32 %v1580_v5, %v10142_v62  ;;  %v8166_v8 = vadd.f32 %v1972_v39, %v1677_v34 }
 0x1b9   : > { %v1582_v17 = vpop.f32.mrf.mxu0 }
 0x1ba   : > { %v8169_v57 = vadd.f32 %v1582_v17, %v10143_v21  ;;  %v10151_v21 = vld [vmem:[#allocation24_spill] sm:$0xff] }
 0x1bb   : > { %v8171_v32 = vpop.f32.mrf.mxu0 }
 0x1bc   : > { %10144 = vst [vmem:[#allocation16_spill] sm:$0xff] %v8169_v57 }
 0x1bd   : > { %v1588_v12 = vpop.f32.mrf.mxu0 }
 0x1be   : > { %v8174_v13 = vadd.f32 %v1588_v12, %v7900_v48  ;;  %v10153_v12 = vld [vmem:[#allocation25_spill] sm:$0xff] }
 0x1bf   : > { %v1590_v22 = vpop.f32.mrf.mxu0 }
 0x1c0   : > { %10145 = vst [vmem:[#allocation17_spill] sm:$0xff] %v8174_v13  ;;  %v8177_v11 = vadd.f32 %v1590_v22, %v10146_v15 }
 0x1c1   : > { %v1592_v14 = vpop.f32.mrf.mxu0 }
 0x1c2   : > { %v8180_v5 = vadd.f32 %v1592_v14, %v10147_v31 }
 0x1c3   : > { %v8182_v39 = vpop.f32.mrf.mxu0 }
 0x1c4   : > { %10148 = vst [vmem:[#allocation20_spill] sm:$0xff] %v8180_v5  ;;  %10149 = vst [vmem:[#allocation21_spill] sm:$0xff] %v8182_v39  ;;  %v10157_v5 = vld [vmem:[#allocation28_spill] sm:$0xff] }
 0x1c5   : > { %v1598_v34 = vpop.f32.mrf.mxu0 }
 0x1c6   : > { %v8185_v62 = vadd.f32 %v1598_v34, %v7914_v9  ;;  %v10159_v34 = vld [vmem:[#allocation29_spill] sm:$0xff] }
 0x1c7   : > { %v1600_v17 = vpop.f32.mrf.mxu0 }
 0x1c8   : > { %10150 = vst [vmem:[#allocation64_spill] sm:$0xff] %v8185_v62  ;;  %v8188_v57 = vadd.f32 %v1600_v17, %v10151_v21 }
 0x1c9   : > { %v1602_v48 = vpop.f32.mrf.mxu0 }
 0x1ca   : > { %10152 = vst [vmem:[#allocation24_spill] sm:$0xff] %v8188_v57  ;;  %v8191_v13 = vadd.f32 %v1602_v48, %v10153_v12 }
 0x1cb   : > { %v8193_v22 = vpop.f32.mrf.mxu0 }
 0x1cc   : > { %10154 = vst [vmem:[#allocation25_spill] sm:$0xff] %v8191_v13  ;;  %10155 = vst [vmem:[#allocation65_spill] sm:$0xff] %v8193_v22  ;;  %v10163_v13 = vld [vmem:[#allocation32_spill] sm:$0xff] }
 0x1cd   : > { %v1608_v15 = vpop.f32.mrf.mxu0 }
 0x1ce   : > { %v8196_v14 = vadd.f32 %v1608_v15, %v7928_v59  ;;  %v10165_v15 = vld [vmem:[#allocation33_spill] sm:$0xff] }
 0x1cf   : > { %v1610_v31 = vpop.f32.mrf.mxu0 }
 0x1d0   : > { %10156 = vst [vmem:[#allocation66_spill] sm:$0xff] %v8196_v14  ;;  %v8199_v39 = vadd.f32 %v1610_v31, %v10157_v5  ;;  %v2459_v5 = vlaneseq }
 0x1d1   : > { %v1612_v9 = vpop.f32.mrf.mxu0 }
 0x1d2   : > { %10158 = vst [vmem:[#allocation28_spill] sm:$0xff] %v8199_v39  ;;  %v8202_v62 = vadd.f32 %v1612_v9, %v10159_v34  ;;  %v8220_v34 = vshrl.u32 %v2459_v5, 7 }
 0x1d3   : > { %v8204_v17 = vpop.f32.mrf.mxu0 }
 0x1d4   : > { %10160 = vst [vmem:[#allocation29_spill] sm:$0xff] %v8202_v62  ;;  %10161 = vst [vmem:[#allocation67_spill] sm:$0xff] %v8204_v17 }
 0x1d5   : > { %v1618_v21 = vpop.f32.mrf.mxu0  ;;  %10169 = vst [vmem:[#allocation71_spill] sm:$0xff] %v8220_v34 }
 0x1d6   : > { %v8207_v48 = vadd.f32 %v1618_v21, %v7942_v43  ;;  %v10170_v43 = vld [vmem:[#allocation36_spill] sm:$0xff] }
 0x1d7   : > { %v1620_v12 = vpop.f32.mrf.mxu0 }
 0x1d8   : > { %10162 = vst [vmem:[#allocation68_spill] sm:$0xff] %v8207_v48  ;;  %v8210_v22 = vadd.f32 %v1620_v12, %v10163_v13  ;;  %v10172_v13 = vld [vmem:[#allocation37_spill] sm:$0xff] }
 0x1d9   : > { %v1622_v59 = vpop.f32.mrf.mxu0 }
 0x1da   : > { %10164 = vst [vmem:[#allocation32_spill] sm:$0xff] %v8210_v22  ;;  %v8213_v14 = vadd.f32 %v1622_v59, %v10165_v15  ;;  %v10066_v59 = vsub.s32 0, %v8220_v34 }
 0x1db   : > { %v8215_v31 = vpop.f32.mrf.mxu0 }
 0x1dc   : > { %10166 = vst [vmem:[#allocation33_spill] sm:$0xff] %v8213_v14  ;;  %10167 = vst [vmem:[#allocation69_spill] sm:$0xff] %v8215_v31  ;;  %v2457_v14 = vld [vmem:[%s10175_s4] sm:$0x3]  ;;  %s10247_s4 = sld [smem:[#allocation77_spill]] }
 0x1dd   : > { %v1628_v39 = vpop.f32.mrf.mxu0 }
 0x1de   : > { %v8218_v9 = vadd.f32 %v1628_v39, %v7956_v23  ;;  %v10067_v23 = vsub.s32 1, %v8220_v34 }
 0x1df   : > { %v1630_v62 = vpop.f32.mrf.mxu0 }
 0x1e0   : > { %10168 = vst [vmem:[#allocation70_spill] sm:$0xff] %v8218_v9  ;;  %v8223_v21 = vadd.f32 %v1630_v62, %v10170_v43  ;;  %v8238_v62 = vrot.slane %v2457_v14, %v10066_v59 }
 0x1e1   : > { %v1632_v48 = vpop.f32.mrf.mxu0 }
 0x1e2   : > { %10171 = vst [vmem:[#allocation36_spill] sm:$0xff] %v8223_v21  ;;  %v8226_v12 = vadd.f32 %v1632_v48, %v10172_v13  ;;  %v8243_v13 = vrot.slane %v2457_v14, %v10067_v23 }
 0x1e3   : > { %v8229_v15 = vpop.f32.mrf.mxu0 }
 0x1e4   : > { %10173 = vst [vmem:[#allocation37_spill] sm:$0xff] %v8226_v12  ;;  %10174 = vst [vmem:[#allocation72_spill] sm:$0xff] %v8229_v15  ;;  %v10176_v15 = vld [vmem:[#allocation39_spill] sm:$0xff] }
 0x1e5   : > { %v2234_v39 = vpop.f32.mrf.mxu0  ;;  %v2034_v21 = vadd.f32 %v10176_v15, %v7981_v54 }
 0x1e6   : > { %v2393_v5 = vadd.f32 %v2234_v39, %v7974_v30 }
 0x1e7   : > { %v2236_v43 = vpop.f32.mrf.mxu0 }
 0x1e8   : > { %v2394_v48 = vadd.f32 %v2236_v43, %v7977_v51  ;;  %v2469_v9 = vadd.f32 %v8238_v62, %v2393_v5  ;;  %v2038_v5 = vadd.f32 %v7986_v46, %v8003_v6 }
 0x1e9   : > { %v2238_v12 = vpop.f32.mrf.mxu0 }
 0x1ea   : > { %v2395_v31 = vadd.f32 %v2238_v12, %v7983_v58  ;;  %v2470_v39 = vadd.f32 %v8243_v13, %v2394_v48  ;;  %v2533_v51 = vmax.f32 %v2469_v9, 0.0  ;;  %v2040_v48 = vadd.f32 %v7994_v40, %v8016_v0 }
 0x1eb   : > { %v2240_v30 = vpop.f32.mrf.mxu0  ;;  %v2042_v40 = vadd.f32 %v8008_v47, %v8029_v7 }
 0x1ec   : > { %v2471_v59 = vadd.f32 %v8238_v62, %v2395_v31  ;;  %v2396_v22 = vadd.f32 %v2240_v30, %v2034_v21  ;;  %v2534_v57 = vmax.f32 %v2470_v39, 0.0 }
 0x1ed   : > { %v2244_v17 = vpop.f32.mrf.mxu0 }
 0x1ee   : > { %v2535_v43 = vmax.f32 %v2471_v59, 0.0  ;;  %v2472_v14 = vadd.f32 %v8243_v13, %v2396_v22  ;;  %v2397_v23 = vadd.f32 %v2244_v17, %v7992_v19 }
 0x1ef   : > { %v2246_v34 = vpop.f32.mrf.mxu0 }
 0x1f0   : > { %v8253_v54 = vpack.c.bf16 %v2535_v43, %v2533_v51  ;;  %v2536_v15 = vmax.f32 %v2472_v14, 0.0  ;;  %v2398_v58 = vadd.f32 %v2246_v34, %v7997_v3  ;;  %v2473_v31 = vadd.f32 %v8238_v62, %v2397_v23 }
 0x1f1   : > { %v2248_v12 = vpop.f32.mrf.mxu0 }
 0x1f2   : > { %v2399_v9 = vadd.f32 %v2248_v12, %v8005_v60  ;;  %v8260_v21 = vpack.c.bf16 %v2536_v15, %v2534_v57  ;;  %v2474_v19 = vadd.f32 %v8243_v13, %v2398_v58  ;;  %v2537_v34 = vmax.f32 %v2473_v31, 0.0 }
 0x1f3   : > { %v2250_v22 = vpop.f32.mrf.mxu0  ;;  %v2041_v60 = vadd.f32 %v8000_v10, %v8023_v63  ;;  %v2044_v31 = vadd.f32 %v8020_v56, %v8042_v33 }
 0x1f4   : > { %v2475_v17 = vadd.f32 %v8238_v62, %v2399_v9  ;;  %v2400_v59 = vadd.f32 %v2250_v22, %v2038_v5  ;;  %v2538_v23 = vmax.f32 %v2474_v19, 0.0 }
 0x1f5   : > { %v2254_v3 = vpop.f32.mrf.mxu0 }
 0x1f6   : > { %v2539_v30 = vmax.f32 %v2475_v17, 0.0  ;;  %v2476_v46 = vadd.f32 %v8243_v13, %v2400_v59  ;;  %v2401_v6 = vadd.f32 %v2254_v3, %v8018_v24  ;;  %v2043_v24 = vadd.f32 %v8013_v20, %v8035_v50 }
 0x1f7   : > { %v2256_v57 = vpop.f32.mrf.mxu0  ;;  %v2045_v17 = vadd.f32 %v8026_v36, %v8047_v41  ;;  %v10179_v36 = vld [vmem:[#allocation40_spill] sm:$0xff] }
 0x1f8   : > { %v8270_v39 = vpack.c.bf16 %v2539_v30, %v2537_v34  ;;  %v2540_v51 = vmax.f32 %v2476_v46, 0.0  ;;  %v2402_v43 = vadd.f32 %v2256_v57, %v2040_v48  ;;  %v2477_v0 = vadd.f32 %v8238_v62, %v2401_v6  ;;  %v10177_v6 = vld [vmem:[#allocation4_spill] sm:$0xff] }
 0x1f9   : > { %v2258_v14 = vpop.f32.mrf.mxu0  ;;  %v2046_v30 = vadd.f32 %v8032_v29, %v8053_v2  ;;  %v2047_v41 = vadd.f32 %v10179_v36, %v8059_v1  ;;  %v2048_v29 = vadd.f32 %v8044_v16, %v8066_v42  ;;  %v8305_v1 = vpop.f32.mrf.mxu1  ;;  %v7003_v42 = vld [vmem:[%s10181_s20 + $0x4] ss:$8 sps:$4 sm:$0xff]  }
 0x1fa   : > { %v2403_v15 = vadd.f32 %v2258_v14, %v2041_v60  ;;  %v8275_v58 = vpack.c.bf16 %v2540_v51, %v2538_v23  ;;  %v2478_v10 = vadd.f32 %v8243_v13, %v2402_v43  ;;  %v2541_v22 = vmax.f32 %v2477_v0, 0.0  ;;  %v10178_v60 = vld [vmem:[#allocation3_spill] sm:$0xff]  ;;  %6418 = vmatprep.mubr.msk.bf16.mxu1 %vm2717_vm5, %v7003_v42 }
 0x1fb   : > { %v2260_v12 = vpop.f32.mrf.mxu0  ;;  %v1211_v57 = vadd.f32 %v10178_v60, %v10177_v6 }
 0x1fc   : > { %v2479_v63 = vadd.f32 %v8238_v62, %v2403_v15  ;;  %v2404_v5 = vadd.f32 %v2260_v12, %v2042_v40  ;;  %v2542_v48 = vmax.f32 %v2478_v10, 0.0  ;;  %v10180_v10 = vld [vmem:[#allocation41_spill] sm:$0xff] }
 0x1fd   : > { %v2264_v9 = vpop.f32.mrf.mxu0  ;;  %v1656_v2 = vadd.f32 %v8074_v18, %v1211_v57  ;;  %v10182_v18 = vld [vmem:[#allocation42_spill] sm:$0xff]  ;;  %v10186_v57 = vld [vmem:[#allocation44_spill] sm:$0xff] }
 0x1fe   : > { %v2543_v47 = vmax.f32 %v2479_v63, 0.0  ;;  %v2480_v7 = vadd.f32 %v8243_v13, %v2404_v5  ;;  %v2405_v19 = vadd.f32 %v2264_v9, %v2043_v24  ;;  %v2049_v63 = vadd.f32 %v10180_v10, %v8071_v27  ;;  %v10183_v27 = vld [vmem:[#allocation6_spill] sm:$0xff] }
 0x1ff   : > { %v2266_v59 = vpop.f32.mrf.mxu0 }
 0x200   : > { %v8286_v20 = vpack.c.bf16 %v2543_v47, %v2541_v22  ;;  %v2544_v50 = vmax.f32 %v2480_v7, 0.0  ;;  %v2406_v3 = vadd.f32 %v2266_v59, %v2044_v31  ;;  %v2481_v56 = vadd.f32 %v8238_v62, %v2405_v19 }
 0x201   : > { %v2268_v34 = vpop.f32.mrf.mxu0  ;;  %v2050_v7 = vadd.f32 %v10182_v18, %v1656_v2 }
 0x202   : > { %v2407_v33 = vadd.f32 %v2268_v34, %v2045_v17  ;;  %v8291_v46 = vpack.c.bf16 %v2544_v50, %v2542_v48  ;;  %v2482_v51 = vadd.f32 %v8243_v13, %v2406_v3  ;;  %v2545_v0 = vmax.f32 %v2481_v56, 0.0  ;;  %v10184_v48 = vld [vmem:[#allocation5_spill] sm:$0xff]  ;;  %v8318_v3 = vpop.f32.mrf.mxu1 }
 0x203   : > { %v2270_v23 = vpop.f32.mrf.mxu0  ;;  %v1221_v50 = vadd.f32 %v10184_v48, %v10183_v27 }
 0x204   : > { %v2483_v43 = vadd.f32 %v8238_v62, %v2407_v33  ;;  %v2408_v14 = vadd.f32 %v2270_v23, %v2046_v30  ;;  %v2546_v31 = vmax.f32 %v2482_v51, 0.0  ;;  %v10185_v30 = vld [vmem:[#allocation43_spill] sm:$0xff]  ;;  %v2052_v23 = vadd.f32 %v10186_v57, %v8089_v35 }
 0x205   : > { %v2274_v40 = vpop.f32.mrf.mxu0  ;;  %v2051_v56 = vadd.f32 %v10185_v30, %v8082_v25  ;;  %v1660_v36 = vadd.f32 %v8097_v38, %v1221_v50  ;;  %v10187_v25 = vld [vmem:[#allocation45_spill] sm:$0xff]  ;;  %v10192_v50 = vld [vmem:[#allocation52_spill] sm:$0xff] }
 0x206   : > { %v2547_v15 = vmax.f32 %v2483_v43, 0.0  ;;  %v2484_v12 = vadd.f32 %v8243_v13, %v2408_v14  ;;  %v2409_v24 = vadd.f32 %v2274_v40, %v2047_v41  ;;  %v2053_v2 = vadd.f32 %v10187_v25, %v8094_v52  ;;  %v8331_v40 = vpop.f32.mrf.mxu1 }
 0x207   : > { %v2276_v5 = vpop.f32.mrf.mxu0 }
 0x208   : > { %v8307_v9 = vpack.c.bf16 %v2547_v15, %v2545_v0  ;;  %v2548_v22 = vmax.f32 %v2484_v12, 0.0  ;;  %v2410_v47 = vadd.f32 %v2276_v5, %v2048_v29  ;;  %v2485_v19 = vadd.f32 %v8238_v62, %v2409_v24  ;;  %v8341_v52 = vpop.f32.mrf.mxu1 }
 0x209   : > { %v2278_v16 = vpop.f32.mrf.mxu0 }
 0x20a   : > { %v2411_v17 = vadd.f32 %v2278_v16, %v2049_v63  ;;  %v8314_v59 = vpack.c.bf16 %v2548_v22, %v2546_v31  ;;  %v2486_v33 = vadd.f32 %v8243_v13, %v2410_v47  ;;  %v2549_v51 = vmax.f32 %v2485_v19, 0.0  ;;  %v10188_v63 = vld [vmem:[#allocation46_spill] sm:$0xff]  ;;  %v10189_v47 = vld [vmem:[#allocation8_spill] sm:$0xff]  ;;  %v10190_v16 = vld [vmem:[#allocation7_spill] sm:$0xff] }
 0x20b   : > { %v2280_v34 = vpop.f32.mrf.mxu0  ;;  %v2054_v38 = vadd.f32 %v10188_v63, %v1660_v36  ;;  %v1231_v42 = vadd.f32 %v10190_v16, %v10189_v47 }
 0x20c   : > { %v2487_v6 = vadd.f32 %v8238_v62, %v2411_v17  ;;  %v2412_v60 = vadd.f32 %v2280_v34, %v2050_v7  ;;  %v2550_v15 = vmax.f32 %v2486_v33, 0.0  ;;  %v10191_v7 = vld [vmem:[#allocation47_spill] sm:$0xff]  ;;  %v10193_v34 = vld [vmem:[#allocation48_spill] sm:$0xff] }
 0x20d   : > { %v2284_v41 = vpop.f32.mrf.mxu0  ;;  %v2055_v19 = vadd.f32 %v10191_v7, %v8105_v44  ;;  %v2056_v30 = vadd.f32 %v10193_v34, %v10192_v50  ;;  %v8353_v44 = vpop.f32.mrf.mxu1  ;;  %v10201_v7 = vld [vmem:[#allocation51_spill] sm:$0xff]  ;;  %v10203_v34 = vld [vmem:[#allocation53_spill] sm:$0xff] }
 0x20e   : > { %v2551_v43 = vmax.f32 %v2487_v6, 0.0  ;;  %v2488_v14 = vadd.f32 %v8243_v13, %v2412_v60  ;;  %v2413_v29 = vadd.f32 %v2284_v41, %v2051_v56  ;;  %v10194_v56 = vld [vmem:[#allocation55_spill] sm:$0xff]  ;;  %v10195_v41 = vld [vmem:[#allocation54_spill] sm:$0xff] }
 0x20f   : > { %v2286_v0 = vpop.f32.mrf.mxu0  ;;  %v1664_v33 = vadd.f32 %v10194_v56, %v1231_v42  ;;  %v8363_v16 = vpop.f32.mrf.mxu1  ;;  %v10202_v50 = vld [vmem:[#allocation59_spill] sm:$0xff]  ;;  %v10204_v56 = vld [vmem:[#allocation61_spill] sm:$0xff] }
 0x210   : > { %v8333_v12 = vpack.c.bf16 %v2551_v43, %v2549_v51  ;;  %v2552_v24 = vmax.f32 %v2488_v14, 0.0  ;;  %v2414_v10 = vadd.f32 %v2286_v0, %v2052_v23  ;;  %v2489_v5 = vadd.f32 %v8238_v62, %v2413_v29  ;;  %v10196_v51 = vld [vmem:[#allocation49_spill] sm:$0xff] }
 0x211   : > { %v2288_v35 = vpop.f32.mrf.mxu0  ;;  %v2057_v43 = vadd.f32 %v10196_v51, %v10195_v41  ;;  %v10205_v41 = vld [vmem:[#allocation60_spill] sm:$0xff] }
 0x212   : > { %v2415_v31 = vadd.f32 %v2288_v35, %v2053_v2  ;;  %v8337_v22 = vpack.c.bf16 %v2552_v24, %v2550_v15  ;;  %v2490_v17 = vadd.f32 %v8243_v13, %v2414_v10  ;;  %v2553_v60 = vmax.f32 %v2489_v5, 0.0  ;;  %v10197_v24 = vld [vmem:[#allocation50_spill] sm:$0xff]  ;;  %v10206_v51 = vld [vmem:[#allocation56_spill] sm:$0xff] }
 0x213   : > { %v2290_v18 = vpop.f32.mrf.mxu0  ;;  %v2058_v10 = vadd.f32 %v10197_v24, %v1664_v33  ;;  %v10198_v5 = vld [vmem:[#allocation10_spill] sm:$0xff] }
 0x214   : > { %v2491_v27 = vadd.f32 %v8238_v62, %v2415_v31  ;;  %v2416_v48 = vadd.f32 %v2290_v18, %v2054_v38  ;;  %v2554_v29 = vmax.f32 %v2490_v17, 0.0  ;;  %v10199_v31 = vld [vmem:[#allocation9_spill] sm:$0xff]  ;;  %v10200_v18 = vld [vmem:[#allocation58_spill] sm:$0xff] }
 0x215   : > { %v2294_v6 = vpop.f32.mrf.mxu0  ;;  %v1241_v47 = vadd.f32 %v10199_v31, %v10198_v5 }
 0x216   : > { %v2555_v57 = vmax.f32 %v2491_v27, 0.0  ;;  %v2492_v23 = vadd.f32 %v8243_v13, %v2416_v48  ;;  %v2417_v36 = vadd.f32 %v2294_v6, %v2055_v19  ;;  %v2059_v19 = vadd.f32 %v10201_v7, %v10200_v18  ;;  %v10209_v18 = vld [vmem:[#allocation11_spill] sm:$0xff] }
 0x217   : > { %v2296_v14 = vpop.f32.mrf.mxu0  ;;  %v1668_v33 = vadd.f32 %v10204_v56, %v1241_v47 }
 0x218   : > { %v8355_v25 = vpack.c.bf16 %v2555_v57, %v2553_v60  ;;  %v2556_v2 = vmax.f32 %v2492_v23, 0.0  ;;  %v2418_v0 = vadd.f32 %v2296_v14, %v2056_v30  ;;  %v2493_v35 = vadd.f32 %v8238_v62, %v2417_v36  ;;  %v8375_v14 = vpop.f32.mrf.mxu1 }
 0x219   : > { %v2298_v15 = vpop.f32.mrf.mxu0  ;;  %v2060_v30 = vadd.f32 %v10203_v34, %v10202_v50 }
 0x21a   : > { %v2419_v63 = vadd.f32 %v2298_v15, %v2057_v43  ;;  %v8359_v38 = vpack.c.bf16 %v2556_v2, %v2554_v29  ;;  %v2494_v17 = vadd.f32 %v8243_v13, %v2418_v0  ;;  %v2557_v60 = vmax.f32 %v2493_v35, 0.0 }
 0x21b   : > { %v2300_v42 = vpop.f32.mrf.mxu0  ;;  %v2061_v43 = vadd.f32 %v10206_v51, %v10205_v41 }
 0x21c   : > { %v2495_v27 = vadd.f32 %v8238_v62, %v2419_v63  ;;  %v2420_v48 = vadd.f32 %v2300_v42, %v2058_v10  ;;  %v2558_v2 = vmax.f32 %v2494_v17, 0.0  ;;  %v10207_v63 = vld [vmem:[#allocation57_spill] sm:$0xff]  ;;  %v10208_v42 = vld [vmem:[#allocation12_spill] sm:$0xff] }
 0x21d   : > { %v2304_v6 = vpop.f32.mrf.mxu0  ;;  %v2062_v5 = vadd.f32 %v10207_v63, %v1668_v33  ;;  %v1251_v7 = vadd.f32 %v10209_v18, %v10208_v42  ;;  %v10211_v63 = vld [vmem:[#allocation14_spill] sm:$0xff] }
 0x21e   : > { %v2559_v57 = vmax.f32 %v2495_v27, 0.0  ;;  %v2496_v23 = vadd.f32 %v8243_v13, %v2420_v48  ;;  %v2421_v36 = vadd.f32 %v2304_v6, %v2059_v19  ;;  %v8385_v19 = vpop.f32.mrf.mxu1 }
 0x21f   : > { %v2306_v29 = vpop.f32.mrf.mxu0  ;;  %v1672_v34 = vadd.f32 %v8145_v49, %v1251_v7 }
 0x220   : > { %v8377_v0 = vpack.c.bf16 %v2559_v57, %v2557_v60  ;;  %v2560_v15 = vmax.f32 %v2496_v23, 0.0  ;;  %v2422_v24 = vadd.f32 %v2306_v29, %v2060_v30  ;;  %v2497_v35 = vadd.f32 %v8238_v62, %v2421_v36  ;;  %v8392_v57 = vpop.f32.mrf.mxu1 }
 0x221   : > { %v2308_v10 = vpop.f32.mrf.mxu0 }
 0x222   : > { %v2423_v31 = vadd.f32 %v2308_v10, %v2061_v43  ;;  %v8381_v47 = vpack.c.bf16 %v2560_v15, %v2558_v2  ;;  %v2498_v17 = vadd.f32 %v8243_v13, %v2422_v24  ;;  %v2561_v56 = vmax.f32 %v2497_v35, 0.0  ;;  %v10210_v2 = vld [vmem:[#allocation62_spill] sm:$0xff]  ;;  %v8404_v35 = vpop.f32.mrf.mxu1 }
 0x223   : > { %v2310_v27 = vpop.f32.mrf.mxu0  ;;  %v2066_v15 = vadd.f32 %v10210_v2, %v1672_v34  ;;  %v10215_v2 = vld [vmem:[#allocation15_spill] sm:$0xff] }
 0x224   : > { %v2499_v48 = vadd.f32 %v8238_v62, %v2423_v31  ;;  %v2424_v50 = vadd.f32 %v2310_v27, %v2062_v5  ;;  %v2562_v36 = vmax.f32 %v2498_v17, 0.0  ;;  %v8414_v34 = vpop.f32.mrf.mxu1 }
 0x225   : > { %v2314_v30 = vpop.f32.mrf.mxu0 }
 0x226   : > { %v2563_v33 = vmax.f32 %v2499_v48, 0.0  ;;  %v2500_v6 = vadd.f32 %v8243_v13, %v2424_v50  ;;  %v2425_v60 = vadd.f32 %v2314_v30, %v8140_v55  ;;  %v10212_v55 = vld [vmem:[#allocation13_spill] sm:$0xff] }
 0x227   : > { %v2316_v23 = vpop.f32.mrf.mxu0  ;;  %v1261_v5 = vadd.f32 %v10212_v55, %v10211_v63 }
 0x228   : > { %v8394_v41 = vpack.c.bf16 %v2563_v33, %v2561_v56  ;;  %v2564_v51 = vmax.f32 %v2500_v6, 0.0  ;;  %v2426_v43 = vadd.f32 %v2316_v23, %v8143_v61  ;;  %v2501_v49 = vadd.f32 %v8238_v62, %v2425_v60  ;;  %v10213_v23 = vld [vmem:[#allocation63_spill] sm:$0xff] }
 0x229   : > { %v2318_v29 = vpop.f32.mrf.mxu0  ;;  %v1676_v7 = vadd.f32 %v8158_v37, %v1261_v5  ;;  %v2072_v5 = vadd.f32 %v8305_v1, %v8164_v26 }
 0x22a   : > { %v2427_v24 = vadd.f32 %v2318_v29, %v8147_v4  ;;  %v8400_v10 = vpack.c.bf16 %v2564_v51, %v2562_v36  ;;  %v2502_v42 = vadd.f32 %v8243_v13, %v2426_v43  ;;  %v2565_v4 = vmax.f32 %v2501_v49, 0.0  ;;  %v10214_v29 = vld [vmem:[#allocation18_spill] sm:$0xff]  ;;  %v8428_v49 = vpop.f32.mrf.mxu1 }
 0x22b   : > { %v2320_v31 = vpop.f32.mrf.mxu0  ;;  %v2070_v36 = vadd.f32 %v10213_v23, %v1676_v7 }
 0x22c   : > { %v2503_v18 = vadd.f32 %v8238_v62, %v2427_v24  ;;  %v2428_v61 = vadd.f32 %v2320_v31, %v2066_v15  ;;  %2749 = vmatprep.subr.bf16.mxu1 %v8400_v10  ;;  %v2566_v56 = vmax.f32 %v2502_v42, 0.0  ;;  %v1271_v15 = vadd.f32 %v10215_v2, %v10214_v29 }
 0x22d   : > { %v2324_v27 = vpop.f32.mrf.mxu0  ;;  %2750 = vmatpush1.bf16.msra.mxu1 %v8394_v41 }
 0x22e   : > { %v2567_v17 = vmax.f32 %v2503_v18, 0.0  ;;  %v2504_v48 = vadd.f32 %v8243_v13, %v2428_v61  ;;  %v2429_v50 = vadd.f32 %v2324_v27, %v8151_v28  ;;  %2751 = vmatprep.subr.bf16.mxu1 %v8381_v47  ;;  %v10216_v27 = vld [vmem:[#allocation16_spill] sm:$0xff] }
 0x22f   : > { %v2326_v30 = vpop.f32.mrf.mxu0 }
 0x230   : > { %v8416_v33 = vpack.c.bf16 %v2567_v17, %v2565_v4  ;;  %v2568_v6 = vmax.f32 %v2504_v48, 0.0  ;;  %v2430_v37 = vadd.f32 %v2326_v30, %v8156_v53  ;;  %v2505_v51 = vadd.f32 %v8238_v62, %v2429_v50  ;;  %v8441_v17 = vpop.f32.mrf.mxu1 }
 0x231   : > { %v2328_v60 = vpop.f32.mrf.mxu0  ;;  %2752 = vmatpush1.bf16.msra.mxu1 %v8377_v0  ;;  %v2073_v4 = vadd.f32 %v8318_v3, %v10216_v27  ;;  %v10217_v3 = vld [vmem:[#allocation22_spill] sm:$0xff] }
 0x232   : > { %v2431_v28 = vadd.f32 %v2328_v60, %v8160_v45  ;;  %2753 = vmatprep.subr.bf16.mxu1 %v8359_v38  ;;  %v8424_v43 = vpack.c.bf16 %v2568_v6, %v2566_v56  ;;  %v2506_v53 = vadd.f32 %v8243_v13, %v2430_v37  ;;  %v1680_v45 = vadd.f32 %v8171_v32, %v1271_v15  ;;  %v10218_v60 = vld [vmem:[#allocation19_spill] sm:$0xff] }
 0x233   : > { %v2330_v24 = vpop.f32.mrf.mxu0  ;;  %v2569_v42 = vmax.f32 %v2505_v51, 0.0  ;;  %v1281_v23 = vadd.f32 %v10218_v60, %v10217_v3  ;;  %v10224_v60 = vld [vmem:[#allocation64_spill] sm:$0xff] }
 0x234   : > { %v2507_v63 = vadd.f32 %v8238_v62, %v2431_v28  ;;  %v2432_v55 = vadd.f32 %v2330_v24, %v2070_v36  ;;  %v2570_v26 = vmax.f32 %v2506_v53, 0.0  ;;  %v2074_v56 = vadd.f32 %v8331_v40, %v1680_v45  ;;  %v8453_v36 = vpop.f32.mrf.mxu1  ;;  %v10219_v28 = vld [vmem:[#allocation17_spill] sm:$0xff] }
 0x235   : > { %v2334_v31 = vpop.f32.mrf.mxu0  ;;  %2754 = vmatpush1.bf16.msra.mxu1 %v8355_v25  ;;  %v2075_v29 = vadd.f32 %v8341_v52, %v10219_v28  ;;  %v2076_v24 = vadd.f32 %v8353_v44, %v8177_v11  ;;  %v10220_v53 = vld [vmem:[#allocation21_spill] sm:$0xff]  ;;  %v10221_v52 = vld [vmem:[#allocation20_spill] sm:$0xff] }
 0x236   : > { %v2571_v18 = vmax.f32 %v2507_v63, 0.0  ;;  %v2508_v61 = vadd.f32 %v8243_v13, %v2432_v55  ;;  %v2433_v7 = vadd.f32 %v2334_v31, %v8166_v8  ;;  %2755 = vmatprep.subr.bf16.mxu1 %v8337_v22  ;;  %v1684_v63 = vadd.f32 %v10220_v53, %v1281_v23 }
 0x237   : > { %v2336_v48 = vpop.f32.mrf.mxu0  ;;  %v2079_v23 = vadd.f32 %v8385_v19, %v10224_v60  ;;  %v10227_v19 = vld [vmem:[#allocation25_spill] sm:$0xff] }
 0x238   : > { %v8443_v1 = vpack.c.bf16 %v2571_v18, %v2569_v42  ;;  %v2572_v32 = vmax.f32 %v2508_v61, 0.0  ;;  %v2434_v50 = vadd.f32 %v2336_v48, %v2072_v5  ;;  %v2509_v8 = vadd.f32 %v8238_v62, %v2433_v7  ;;  %v8467_v61 = vpop.f32.mrf.mxu1 }
 0x239   : > { %v2338_v30 = vpop.f32.mrf.mxu0  ;;  %2756 = vmatpush1.bf16.msra.mxu1 %v8333_v12  ;;  %v2077_v18 = vadd.f32 %v8363_v16, %v10221_v52  ;;  %v10222_v16 = vld [vmem:[#allocation26_spill] sm:$0xff] }
 0x23a   : > { %v2435_v6 = vadd.f32 %v2338_v30, %v2073_v4  ;;  %2757 = vmatprep.subr.bf16.mxu1 %v8314_v59  ;;  %v8449_v37 = vpack.c.bf16 %v2572_v32, %v2570_v26  ;;  %v2510_v2 = vadd.f32 %v8243_v13, %v2434_v50  ;;  %v2573_v5 = vmax.f32 %v2509_v8, 0.0 }
 0x23b   : > { %v2340_v51 = vpop.f32.mrf.mxu0  ;;  %v2078_v26 = vadd.f32 %v8375_v14, %v1684_v63 }
 0x23c   : > { %v2511_v40 = vadd.f32 %v8238_v62, %v2435_v6  ;;  %v2436_v15 = vadd.f32 %v2340_v51, %v2074_v56  ;;  %v2574_v27 = vmax.f32 %v2510_v2, 0.0  ;;  %v10223_v56 = vld [vmem:[#allocation23_spill] sm:$0xff]  ;;  %v2012_v6 = vpop.f32.mrf.mxu1 }
 0x23d   : > { %v2344_v55 = vpop.f32.mrf.mxu0  ;;  %2758 = vmatpush1.bf16.msra.mxu1 %v8307_v9  ;;  %v1291_v8 = vadd.f32 %v10223_v56, %v10222_v16 }
 0x23e   : > { %v2575_v45 = vmax.f32 %v2511_v40, 0.0  ;;  %v2512_v31 = vadd.f32 %v8243_v13, %v2436_v15  ;;  %v2437_v42 = vadd.f32 %v2344_v55, %v2075_v29  ;;  %2759 = vmatprep.subr.bf16.mxu1 %v8291_v46  ;;  %v10225_v29 = vld [vmem:[#allocation24_spill] sm:$0xff]  ;;  %v10226_v40 = vld [vmem:[#allocation65_spill] sm:$0xff] }
 0x23f   : > { %v2346_v7 = vpop.f32.mrf.mxu0  ;;  %v2080_v2 = vadd.f32 %v8392_v57, %v10225_v29  ;;  %v1688_v15 = vadd.f32 %v10226_v40, %v1291_v8  ;;  %v10230_v8 = vld [vmem:[#allocation66_spill] sm:$0xff] }
 0x240   : > { %v8469_v11 = vpack.c.bf16 %v2575_v45, %v2573_v5  ;;  %v2576_v44 = vmax.f32 %v2512_v31, 0.0  ;;  %v2438_v4 = vadd.f32 %v2346_v7, %v2076_v24  ;;  %v2513_v32 = vadd.f32 %v8238_v62, %v2437_v42  ;;  %v2014_v31 = vpop.f32.mrf.mxu1 }
 0x241   : > { %v2348_v48 = vpop.f32.mrf.mxu0  ;;  %2760 = vmatpush1.bf16.msra.mxu1 %v8286_v20  ;;  %v2081_v45 = vadd.f32 %v8404_v35, %v10227_v19 }
 0x242   : > { %v2439_v50 = vadd.f32 %v2348_v48, %v2077_v18  ;;  %2761 = vmatprep.subr.bf16.mxu1 %v8275_v58  ;;  %v8475_v30 = vpack.c.bf16 %v2576_v44, %v2574_v27  ;;  %v2514_v51 = vadd.f32 %v8243_v13, %v2438_v4  ;;  %v2577_v53 = vmax.f32 %v2513_v32, 0.0  ;;  %v10228_v32 = vld [vmem:[#allocation30_spill] sm:$0xff]  ;;  %v2016_v16 = vpop.f32.mrf.mxu1 }
 0x243   : > { %v2350_v3 = vpop.f32.mrf.mxu0  ;;  %v2082_v44 = vadd.f32 %v8414_v34, %v1688_v15 }
 0x244   : > { %v2515_v28 = vadd.f32 %v8238_v62, %v2439_v50  ;;  %v2440_v14 = vadd.f32 %v2350_v3, %v2078_v26  ;;  %v2578_v52 = vmax.f32 %v2514_v51, 0.0  ;;  %v10229_v50 = vld [vmem:[#allocation27_spill] sm:$0xff]  ;;  %v2083_v3 = vadd.f32 %v8428_v49, %v10230_v8  ;;  %v2018_v49 = vpop.f32.mrf.mxu1 }
 0x245   : > { %v2354_v24 = vpop.f32.mrf.mxu0  ;;  %2762 = vmatpush1.bf16.msra.mxu1 %v8270_v39  ;;  %v1301_v35 = vadd.f32 %v10229_v50, %v10228_v32 }
 0x246   : > { %v2579_v63 = vmax.f32 %v2515_v28, 0.0  ;;  %v2516_v55 = vadd.f32 %v8243_v13, %v2440_v14  ;;  %v2441_v5 = vadd.f32 %v2354_v24, %v2079_v23  ;;  %2763 = vmatprep.subr.bf16.mxu1 %v8260_v21  ;;  %v10231_v28 = vld [vmem:[#allocation28_spill] sm:$0xff]  ;;  %v10232_v14 = vld [vmem:[#allocation67_spill] sm:$0xff]  ;;  %v2022_v50 = vpop.f32.mrf.mxu1 }
 0x247   : > { %v2356_v42 = vpop.f32.mrf.mxu0  ;;  %v2084_v34 = vadd.f32 %v8441_v17, %v10231_v28  ;;  %v1692_v29 = vadd.f32 %v10232_v14, %v1301_v35  ;;  %v10236_v35 = vld [vmem:[#allocation68_spill] sm:$0xff] }
 0x248   : > { %v8491_v18 = vpack.c.bf16 %v2579_v63, %v2577_v53  ;;  %v2580_v57 = vmax.f32 %v2516_v55, 0.0  ;;  %v2442_v7 = vadd.f32 %v2356_v42, %v2080_v2  ;;  %v2517_v4 = vadd.f32 %v8238_v62, %v2441_v5  ;;  %v10233_v63 = vld [vmem:[#allocation29_spill] sm:$0xff] }
 0x249   : > { %v2358_v27 = vpop.f32.mrf.mxu0  ;;  %2764 = vmatpush1.bf16.msra.mxu1 %v8253_v54  ;;  %v2085_v55 = vadd.f32 %v8453_v36, %v10233_v63  ;;  %v2086_v17 = vadd.f32 %v8467_v61, %v1692_v29  ;;  %v10238_v61 = vld [vmem:[#allocation69_spill] sm:$0xff] }
 0x24a   : > { %v2443_v48 = vadd.f32 %v2358_v27, %v2081_v45  ;;  %v8496_v26 = vpack.c.bf16 %v2580_v57, %v2578_v52  ;;  %v2518_v60 = vadd.f32 %v8243_v13, %v2442_v7  ;;  %v2581_v40 = vmax.f32 %v2517_v4, 0.0  ;;  %v10234_v4 = vld [vmem:[#allocation34_spill] sm:$0xff] }
 0x24b   : > { %v2360_v56 = vpop.f32.mrf.mxu0 }
 0x24c   : > { %v2519_v23 = vadd.f32 %v8238_v62, %v2443_v48  ;;  %v2444_v51 = vadd.f32 %v2360_v56, %v2082_v44  ;;  %v2582_v19 = vmax.f32 %v2518_v60, 0.0  ;;  %v10235_v48 = vld [vmem:[#allocation31_spill] sm:$0xff]  ;;  %v2087_v56 = vadd.f32 %v2012_v6, %v10236_v35 }
 0x24d   : > { %v2364_v2 = vpop.f32.mrf.mxu0  ;;  %v1311_v32 = vadd.f32 %v10235_v48, %v10234_v4 }
 0x24e   : > { %v2583_v15 = vmax.f32 %v2519_v23, 0.0  ;;  %v2520_v24 = vadd.f32 %v8243_v13, %v2444_v51  ;;  %v2445_v53 = vadd.f32 %v2364_v2, %v2083_v3  ;;  %v10237_v23 = vld [vmem:[#allocation32_spill] sm:$0xff] }
 0x24f   : > { %v2366_v5 = vpop.f32.mrf.mxu0  ;;  %v2088_v51 = vadd.f32 %v2014_v31, %v10237_v23  ;;  %v1696_v28 = vadd.f32 %v10238_v61, %v1311_v32 }
 0x250   : > { %v8510_v45 = vpack.c.bf16 %v2583_v15, %v2581_v40  ;;  %v2584_v42 = vmax.f32 %v2520_v24, 0.0  ;;  %v2446_v52 = vadd.f32 %v2366_v5, %v2084_v34  ;;  %v2521_v7 = vadd.f32 %v8238_v62, %v2445_v53  ;;  %v10239_v15 = vld [vmem:[#allocation33_spill] sm:$0xff]  ;;  %v2024_v53 = vpop.f32.mrf.mxu1 }
 0x251   : > { %v2368_v57 = vpop.f32.mrf.mxu0  ;;  %v2089_v24 = vadd.f32 %v2016_v16, %v10239_v15  ;;  %v10242_v16 = vld [vmem:[#allocation70_spill] sm:$0xff] }
 0x252   : > { %v2447_v27 = vadd.f32 %v2368_v57, %v2085_v55  ;;  %v8514_v44 = vpack.c.bf16 %v2584_v42, %v2582_v19  ;;  %v2522_v8 = vadd.f32 %v8243_v13, %v2446_v52  ;;  %v2585_v14 = vmax.f32 %v2521_v7, 0.0  ;;  %v10240_v7 = vld [vmem:[#allocation38_spill] sm:$0xff]  ;;  %v2026_v48 = vpop.f32.mrf.mxu1 }
 0x253   : > { %v2370_v36 = vpop.f32.mrf.mxu0  ;;  %v2090_v52 = vadd.f32 %v2018_v49, %v1696_v28  ;;  %v10244_v49 = vld [vmem:[#allocation72_spill] sm:$0xff] }
 0x254   : > { %v2523_v3 = vadd.f32 %v8238_v62, %v2447_v27  ;;  %v2448_v60 = vadd.f32 %v2370_v36, %v2086_v17  ;;  %v2586_v6 = vmax.f32 %v2522_v8, 0.0  ;;  %v10241_v27 = vld [vmem:[#allocation35_spill] sm:$0xff]  ;;  %v2091_v36 = vadd.f32 %v2022_v50, %v10242_v16 }
 0x255   : > { %v2374_v34 = vpop.f32.mrf.mxu0  ;;  %v1321_v4 = vadd.f32 %v10241_v27, %v10240_v7 }
 0x256   : > { %v2587_v29 = vmax.f32 %v2523_v3, 0.0  ;;  %v2524_v2 = vadd.f32 %v8243_v13, %v2448_v60  ;;  %v2449_v40 = vadd.f32 %v2374_v34, %v2087_v56  ;;  %v10243_v3 = vld [vmem:[#allocation36_spill] sm:$0xff] }
 0x257   : > { %v2376_v63 = vpop.f32.mrf.mxu0  ;;  %v2092_v60 = vadd.f32 %v2024_v53, %v10243_v3  ;;  %v1700_v23 = vadd.f32 %v10244_v49, %v1321_v4  ;;  %v10246_v3 = vmov 0   ;;  %v7004_v49 = vld [vmem:[%s10181_s20 + $0x14] ss:$8 sps:$4 sm:$0xff]  }
 0x258   : > { %v8525_v55 = vpack.c.bf16 %v2587_v29, %v2585_v14  ;;  %v2588_v5 = vmax.f32 %v2524_v2, 0.0  ;;  %v2450_v19 = vadd.f32 %v2376_v63, %v2088_v51  ;;  %v2525_v31 = vadd.f32 %v8238_v62, %v2449_v40  ;;  %v10245_v29 = vld [vmem:[#allocation37_spill] sm:$0xff]  ;;  %v2028_v40 = vpop.f32.mrf.mxu1 }
 0x259   : > { %v2378_v42 = vpop.f32.mrf.mxu0  ;;  %v2093_v2 = vadd.f32 %v2026_v48, %v10245_v29  ;;  %v7045_v29 = vld [vmem:[%s10247_s4 + $0x60] ss:$8 sps:$4 sm:$0xff]  }
 0x25a   : > { %v2451_v57 = vadd.f32 %v2378_v42, %v2089_v24  ;;  %v8528_v17 = vpack.c.bf16 %v2588_v5, %v2586_v6  ;;  %v2526_v35 = vadd.f32 %v8243_v13, %v2450_v19  ;;  %v2589_v61 = vmax.f32 %v2525_v31, 0.0 }
 0x25b   : > { %v2380_v32 = vpop.f32.mrf.mxu0  ;;  %v2094_v19 = vadd.f32 %v2028_v40, %v1700_v23  ;;  %v7006_v23 = vld [vmem:[%s10181_s20 + $0x10] ss:$8 sps:$4 sm:$0xff]  }
 0x25c   : > { %v2527_v56 = vadd.f32 %v8238_v62, %v2451_v57  ;;  %v2452_v8 = vadd.f32 %v2380_v32, %v2090_v52  ;;  %v2590_v50 = vmax.f32 %v2526_v35, 0.0  ;;  %v7059_v40 = vld [vmem:[%s10044_s6 + $0x18] sm:$0xff]  }
 0x25d   : > { %v2384_v51 = vpop.f32.mrf.mxu0 }
 0x25e   : > { %v2591_v28 = vmax.f32 %v2527_v56, 0.0  ;;  %v2528_v34 = vadd.f32 %v8243_v13, %v2452_v8  ;;  %v2453_v14 = vadd.f32 %v2384_v51, %v2091_v36  ;;  %v7042_v51 = vld [vmem:[%s10247_s4 + $0x50] ss:$8 sps:$4 sm:$0xff]  }
 0x25f   : > { %v2386_v15 = vpop.f32.mrf.mxu0 }
 0x260   : > { %v8539_v24 = vpack.c.bf16 %v2591_v28, %v2589_v61  ;;  %v2592_v63 = vmax.f32 %v2528_v34, 0.0  ;;  %v2454_v6 = vadd.f32 %v2386_v15, %v2092_v60  ;;  %v2529_v53 = vadd.f32 %v8238_v62, %v2453_v14  ;;  %v7001_v60 = vld [vmem:[%s10181_s20] ss:$8 sps:$4 sm:$0xff]   ;;  %v7043_v61 = vld [vmem:[%s10247_s4 + $0x64] ss:$8 sps:$4 sm:$0xff]   ;;  %v7056_v34 = vld [vmem:[%s10043_s5 + $0x10] sm:$0xff]  }
 0x261   : > { %v2388_v5 = vpop.f32.mrf.mxu0  ;;  %v7057_v28 = vld [vmem:[%s10044_s6 + $0x28] sm:$0xff]   ;;  %v7058_v14 = vld [vmem:[%s10044_s6 + $0x20] sm:$0xff]  }
 0x262   : > { %v2455_v42 = vadd.f32 %v2388_v5, %v2093_v2  ;;  %v8542_v52 = vpack.c.bf16 %v2592_v63, %v2590_v50  ;;  %v2530_v57 = vadd.f32 %v8243_v13, %v2454_v6  ;;  %v2593_v4 = vmax.f32 %v2529_v53, 0.0  ;;  %v7046_v2 = vld [vmem:[%s10247_s4 + $0x74] ss:$8 sps:$4 sm:$0xff]   ;;  %v7060_v15 = vld [vmem:[%s10043_s5 + $0x8] sm:$0xff]   ;;  %v7063_v6 = vld [vmem:[%s10043_s5] sm:$0xff]  }
 0x263   : > { %v2390_v31 = vpop.f32.mrf.mxu0  ;;  %v7061_v50 = vld [vmem:[%s10044_s6 + $0x10] sm:$0xff]   ;;  %v7062_v63 = vld [vmem:[%s10044_s6 + $0x8] sm:$0xff]   ;;  %v7064_v5 = vld [vmem:[%s10044_s6] sm:$0xff]  }
 0x264   : > { %v2531_v7 = vadd.f32 %v8238_v62, %v2455_v42  ;;  %v2456_v27 = vadd.f32 %v2390_v31, %v2094_v19  ;;  %v2594_v16 = vmax.f32 %v2530_v57, 0.0  ;;  %v7049_v62 = vld [vmem:[%s10043_s5 + $0x38] sm:$0xff]   ;;  %v7065_v19 = vld [vmem:[%s10043_s5 + $0x50] ss:$0 sps:$4 sm:$0xff]   ;;  %v7067_v31 = vld [vmem:[%s10043_s5 + $0x48] sm:$0xff]  }
 0x265   : > { %3249 = vmatpush1.bf16.msra.mxu0 %v7049_v62  ;;  %v7066_v53 = vld [vmem:[%s10044_s6 + $0x50] ss:$0 sps:$4 sm:$0xff]   ;;  %v3246_v42 = vsel %vm3244_vm6, %v7065_v19, 0  ;;  %v7068_v57 = vld [vmem:[%s10044_s6 + $0x48] sm:$0xff]  }
 0x266   : > { %v2595_v48 = vmax.f32 %v2531_v7, 0.0  ;;  %v2532_v32 = vadd.f32 %v8243_v13, %v2456_v27  ;;  %v7050_v13 = vld [vmem:[%s10043_s5 + $0x30] sm:$0xff]   ;;  %3250 = vmatprep.subr.bf16.mxu0 %v10246_v3  ;;  %v7069_v7 = vld [vmem:[%s10043_s5 + $0x40] sm:$0xff]  }
 0x267   : > { %v7070_v27 = vld [vmem:[%s10044_s6 + $0x40] sm:$0xff]  }
 0x268   : > { %v2627_v36 = vpack.c.bf16 %v2595_v48, %v2593_v4  ;;  %v2596_v35 = vmax.f32 %v2532_v32, 0.0 }
 0x269   : > { %3251 = vmatpush1.bf16.msra.mxu0 %v7050_v13 }
 0x26a   : > { %v2628_v56 = vpack.c.bf16 %v2596_v35, %v2594_v16  ;;  %v2744_v8 = vsel %vm2100_vm4, %v2627_v36, 0  ;;  %3252 = vmatprep.subr.bf16.mxu0 %v10246_v3  ;;  %v3563_v16 = vld [vmem:[%s10045_s7 + $0x50] sm:$0x33]  ;;  %v6499_v35 = vld [vmem:[%s10045_s7 + $0xa8] sm:$0x33] }
 0x26b   : > { %v6532_v36 = vcombine.high %v3563_v16, %v3563_v16 }
 0x26c   : > { %6417 = vmatprep.subr.msk.bf16.mxu1 %vm2100_vm4, %v2628_v56 }
 0x26d   : > { %2766 = vmatpush2.bf16.msra.mxu1 %v2744_v8 }
 0x26e   : > { %2767 = vmatprep.subr.bf16.mxu1 %v8542_v52 }
 0x271   : > { %2768 = vmatpush2.bf16.msra.mxu1 %v8539_v24 }
 0x272   : > { %2769 = vmatprep.subr.bf16.mxu1 %v8528_v17 }
 0x275   : > { %2770 = vmatpush2.bf16.msra.mxu1 %v8525_v55 }
 0x276   : > { %2771 = vmatprep.subr.bf16.mxu1 %v8514_v44 }
 0x279   : > { %2772 = vmatpush2.bf16.msra.mxu1 %v8510_v45 }
 0x27a   : > { %2773 = vmatprep.subr.bf16.mxu1 %v8496_v26 }
 0x27d   : > { %2774 = vmatpush2.bf16.msra.mxu1 %v8491_v18 }
 0x27e   : > { %2775 = vmatprep.subr.bf16.mxu1 %v8475_v30 }
 0x281   : > { %2776 = vmatpush2.bf16.msra.mxu1 %v8469_v11 }
 0x282   : > { %2777 = vmatprep.subr.bf16.mxu1 %v8449_v37 }
 0x285   : > { %2778 = vmatpush2.bf16.msra.mxu1 %v8443_v1 }
 0x286   : > { %2779 = vmatprep.subr.bf16.mxu1 %v8424_v43 }
 0x289   : > { %2780 = vmatpush2.bf16.msra.mxu1 %v8416_v33 }
 0x28a   : > { %2974 = vmatprep.subr.bf16.mxu1 %v8400_v10  ;;  %v7007_v10 = vld [vmem:[%s10181_s20 + $0x24] ss:$8 sps:$4 sm:$0xff]  }
 0x28c   : > { %2782 = vmatmul.mubr.bf16.vlgmr.msra.gmra.mxu1 %v7001_v60 }
 0x28d   : > { %2975 = vmatpush1.bf16.msra.mxu1 %v8394_v41  ;;  %6419 = vmatprep.mubr.msk.bf16.mxu1 %vm2717_vm5, %v7004_v49  ;;  %v7030_v41 = vld [vmem:[%s10247_s4 + $0x10] ss:$8 sps:$4 sm:$0xff]  }
 0x28e   : > { %2976 = vmatprep.subr.bf16.mxu1 %v8381_v47  ;;  %v7009_v47 = vld [vmem:[%s10181_s20 + $0x20] ss:$8 sps:$4 sm:$0xff]  }
 0x291   : > { %2977 = vmatpush1.bf16.msra.mxu1 %v8377_v0  ;;  %v7010_v0 = vld [vmem:[%s10181_s20 + $0x34] ss:$8 sps:$4 sm:$0xff]  }
 0x292   : > { %2978 = vmatprep.subr.bf16.mxu1 %v8359_v38  ;;  %v7028_v38 = vld [vmem:[%s10247_s4 + $0x14] ss:$8 sps:$4 sm:$0xff]  }
 0x294   : > { %2792 = vmatmul.mubr.bf16.gmra.mxu1 %v7006_v23 }
 0x295   : > { %2979 = vmatpush1.bf16.msra.mxu1 %v8355_v25  ;;  %6420 = vmatprep.mubr.msk.bf16.mxu1 %vm2717_vm5, %v7007_v10  ;;  %v7025_v25 = vld [vmem:[%s10247_s4] ss:$8 sps:$4 sm:$0xff]  }
 0x296   : > { %2980 = vmatprep.subr.bf16.mxu1 %v8337_v22  ;;  %v7012_v22 = vld [vmem:[%s10181_s20 + $0x30] ss:$8 sps:$4 sm:$0xff]  }
 0x299   : > { %2981 = vmatpush1.bf16.msra.mxu1 %v8333_v12  ;;  %v7013_v12 = vld [vmem:[%s10181_s20 + $0x44] ss:$8 sps:$4 sm:$0xff]  }
 0x29a   : > { %2982 = vmatprep.subr.bf16.mxu1 %v8314_v59  ;;  %v7027_v59 = vld [vmem:[%s10247_s4 + $0x4] ss:$8 sps:$4 sm:$0xff]  }
 0x29c   : > { %2802 = vmatmul.mubr.bf16.gmra.mxu1 %v7009_v47 }
 0x29d   : > { %2983 = vmatpush1.bf16.msra.mxu1 %v8307_v9  ;;  %6421 = vmatprep.mubr.msk.bf16.mxu1 %vm2717_vm5, %v7010_v0  ;;  %v7024_v9 = vld [vmem:[%s10181_s20 + $0x70] ss:$8 sps:$4 sm:$0xff]  }
 0x29e   : > { %2984 = vmatprep.subr.bf16.mxu1 %v8291_v46  ;;  %v7015_v46 = vld [vmem:[%s10181_s20 + $0x40] ss:$8 sps:$4 sm:$0xff]  }
 0x2a1   : > { %2985 = vmatpush1.bf16.msra.mxu1 %v8286_v20  ;;  %v7016_v20 = vld [vmem:[%s10181_s20 + $0x54] ss:$8 sps:$4 sm:$0xff]  }
 0x2a2   : > { %2986 = vmatprep.subr.bf16.mxu1 %v8275_v58  ;;  %v7022_v58 = vld [vmem:[%s10181_s20 + $0x74] ss:$8 sps:$4 sm:$0xff]  }
 0x2a4   : > { %2812 = vmatmul.mubr.bf16.gmra.mxu1 %v7012_v22 }
 0x2a5   : > { %2987 = vmatpush1.bf16.msra.mxu1 %v8270_v39  ;;  %6422 = vmatprep.mubr.msk.bf16.mxu1 %vm2717_vm5, %v7013_v12  ;;  %v7021_v39 = vld [vmem:[%s10181_s20 + $0x60] ss:$8 sps:$4 sm:$0xff]  }
 0x2a6   : > { %2988 = vmatprep.subr.bf16.mxu1 %v8260_v21  ;;  %v7018_v21 = vld [vmem:[%s10181_s20 + $0x50] ss:$8 sps:$4 sm:$0xff]  }
 0x2a9   : > { %2989 = vmatpush1.bf16.msra.mxu1 %v8253_v54  ;;  %v7019_v54 = vld [vmem:[%s10181_s20 + $0x64] ss:$8 sps:$4 sm:$0xff]  }
 0x2aa   : > { %6442 = vmatprep.subr.msk.bf16.mxu1 %vm2100_vm4, %v2628_v56 }
 0x2ac   : > { %2822 = vmatmul.mubr.bf16.gmra.mxu1 %v7015_v46 }
 0x2ad   : > { %2991 = vmatpush2.bf16.msra.mxu1 %v2744_v8  ;;  %6423 = vmatprep.mubr.msk.bf16.mxu1 %vm2717_vm5, %v7016_v20  ;;  %v6511_v8 = vcombine.high %v6499_v35, %v6499_v35 }
 0x2ae   : > { %2992 = vmatprep.subr.bf16.mxu1 %v8542_v52  ;;  %v3430_v52 = vsel %vm3244_vm6, %v7066_v53, 0  ;;  %v7073_v53 = vld [vmem:[%s10045_s7 + $0x40] ss:$8 sps:$4 sm:$0xff]  }
 0x2b1   : > { %2993 = vmatpush2.bf16.msra.mxu1 %v8539_v24  ;;  %v7048_v24 = vld [vmem:[%s10247_s4 + $0x70] ss:$8 sps:$4 sm:$0xff]  }
 0x2b2   : > { %2994 = vmatprep.subr.bf16.mxu1 %v8528_v17  ;;  %v7055_v17 = vld [vmem:[%s10044_s6 + $0x30] sm:$0xff]  }
 0x2b4   : > { %2832 = vmatmul.mubr.bf16.gmra.mxu1 %v7018_v21 }
 0x2b5   : > { %2995 = vmatpush2.bf16.msra.mxu1 %v8525_v55  ;;  %6424 = vmatprep.mubr.msk.bf16.mxu1 %vm2717_vm5, %v7019_v54  ;;  %v7054_v55 = vld [vmem:[%s10044_s6 + $0x38] sm:$0xff]  }
 0x2b6   : > { %2996 = vmatprep.subr.bf16.mxu1 %v8514_v44  ;;  %v7040_v44 = vld [vmem:[%s10247_s4 + $0x54] ss:$8 sps:$4 sm:$0xff]  }
 0x2b9   : > { %2997 = vmatpush2.bf16.msra.mxu1 %v8510_v45  ;;  %v7053_v45 = vld [vmem:[%s10043_s5 + $0x18] sm:$0xff]  }
 0x2ba   : > { %2998 = vmatprep.subr.bf16.mxu1 %v8496_v26  ;;  %v7039_v26 = vld [vmem:[%s10247_s4 + $0x40] ss:$8 sps:$4 sm:$0xff]  }
 0x2bc   : > { %2842 = vmatmul.mubr.bf16.gmra.mxu1 %v7021_v39 }
 0x2bd   : > { %2999 = vmatpush2.bf16.msra.mxu1 %v8491_v18  ;;  %6425 = vmatprep.mubr.msk.bf16.mxu1 %vm2717_vm5, %v7022_v58  ;;  %v7037_v18 = vld [vmem:[%s10247_s4 + $0x44] ss:$8 sps:$4 sm:$0xff]  }
 0x2be   : > { %3000 = vmatprep.subr.bf16.mxu1 %v8475_v30  ;;  %v7036_v30 = vld [vmem:[%s10247_s4 + $0x30] ss:$8 sps:$4 sm:$0xff]  }
 0x2c1   : > { %3001 = vmatpush2.bf16.msra.mxu1 %v8469_v11  ;;  %v7052_v11 = vld [vmem:[%s10043_s5 + $0x20] sm:$0xff]  }
 0x2c2   : > { %3002 = vmatprep.subr.bf16.mxu1 %v8449_v37  ;;  %v7034_v37 = vld [vmem:[%s10247_s4 + $0x34] ss:$8 sps:$4 sm:$0xff]  }
 0x2c4   : > { %2852 = vmatmul.mubr.bf16.gmra.mxu1 %v7024_v9 }
 0x2c5   : > { %3003 = vmatpush2.bf16.msra.mxu1 %v8443_v1  ;;  %6443 = vmatprep.mubr.msk.bf16.mxu1 %vm2717_vm5, %v7027_v59  ;;  %v7033_v1 = vld [vmem:[%s10247_s4 + $0x20] ss:$8 sps:$4 sm:$0xff]  }
 0x2c6   : > { %3004 = vmatprep.subr.bf16.mxu1 %v8424_v43  ;;  %v7051_v43 = vld [vmem:[%s10043_s5 + $0x28] sm:$0xff]  }
 0x2c7   : > { %3253 = vmatpush1.bf16.msra.mxu0 %v7051_v43 }
 0x2c8   : > { %3254 = vmatprep.subr.bf16.mxu0 %v10246_v3 }
 0x2c9   : > { %3005 = vmatpush2.bf16.msra.mxu1 %v8416_v33  ;;  %v7031_v33 = vld [vmem:[%s10247_s4 + $0x24] ss:$8 sps:$4 sm:$0xff]  }
 0x2ca   : > { %3432 = vmatprep.subr.bf16.mxu1 %v10246_v3 }
 0x2cb   : > { %3255 = vmatpush1.bf16.msra.mxu0 %v7052_v11 }
 0x2cc   : > { %3007 = vmatmul.mubr.bf16.vlgmr.msra.gmra.mxu1 %v7025_v25  ;;  %3256 = vmatprep.subr.bf16.mxu0 %v10246_v3 }
 0x2cd   : > { %6444 = vmatprep.mubr.msk.bf16.mxu1 %vm2717_vm5, %v7028_v38  ;;  %3433 = vmatpush1.bf16.msra.mxu1 %v7054_v55 }
 0x2ce   : > { %3434 = vmatprep.subr.bf16.mxu1 %v10246_v3 }
 0x2cf   : > { %3257 = vmatpush1.bf16.msra.mxu0 %v7053_v45 }
 0x2d0   : > { %3258 = vmatprep.subr.bf16.mxu0 %v10246_v3 }
 0x2d1   : > { %3435 = vmatpush1.bf16.msra.mxu1 %v7055_v17 }
 0x2d2   : > { %3436 = vmatprep.subr.bf16.mxu1 %v10246_v3 }
 0x2d3   : > { %3259 = vmatpush1.bf16.msra.mxu0 %v7056_v34 }
 0x2d4   : > { %3017 = vmatmul.mubr.bf16.gmra.mxu1 %v7030_v41  ;;  %3260 = vmatprep.subr.bf16.mxu0 %v10246_v3 }
 0x2d5   : > { %6445 = vmatprep.mubr.msk.bf16.mxu1 %vm2717_vm5, %v7031_v33  ;;  %3437 = vmatpush1.bf16.msra.mxu1 %v7057_v28  ;;  %v6510_v28 = vcombine.low %v6499_v35, %v6499_v35 }
 0x2d6   : > { %3438 = vmatprep.subr.bf16.mxu1 %v10246_v3 }
 0x2d7   : > { %3261 = vmatpush1.bf16.msra.mxu0 %v7060_v15 }
 0x2d8   : > { %3262 = vmatprep.subr.bf16.mxu0 %v10246_v3 }
 0x2d9   : > { %3439 = vmatpush1.bf16.msra.mxu1 %v7058_v14 }
 0x2da   : > { %3440 = vmatprep.subr.bf16.mxu1 %v10246_v3 }
 0x2db   : > { %3263 = vmatpush1.bf16.msra.mxu0 %v7063_v6 }
 0x2dc   : > { %3027 = vmatmul.mubr.bf16.gmra.mxu1 %v7033_v1  ;;  %3274 = vmatprep.subr.bf16.mxu0 %v10246_v3 }
 0x2dd   : > { %6446 = vmatprep.mubr.msk.bf16.mxu1 %vm2717_vm5, %v7034_v37  ;;  %3441 = vmatpush1.bf16.msra.mxu1 %v7059_v40 }
 0x2de   : > { %3442 = vmatprep.subr.bf16.mxu1 %v10246_v3 }
 0x2df   : > { %3275 = vmatpush2.bf16.msra.mxu0 %v3246_v42 }
 0x2e0   : > { %3276 = vmatprep.subr.bf16.mxu0 %v10246_v3 }
 0x2e1   : > { %3443 = vmatpush1.bf16.msra.mxu1 %v7061_v50 }
 0x2e2   : > { %3444 = vmatprep.subr.bf16.mxu1 %v10246_v3 }
 0x2e3   : > { %3277 = vmatpush2.bf16.msra.mxu0 %v7067_v31 }
 0x2e4   : > { %3037 = vmatmul.mubr.bf16.gmra.mxu1 %v7036_v30  ;;  %3278 = vmatprep.subr.bf16.mxu0 %v10246_v3 }
 0x2e5   : > { %6447 = vmatprep.mubr.msk.bf16.mxu1 %vm2717_vm5, %v7037_v18  ;;  %3445 = vmatpush1.bf16.msra.mxu1 %v7062_v63  ;;  %v3721_v63 = vsel %vm3719_vm7, %v6510_v28, 0 }
 0x2e6   : > { %3446 = vmatprep.subr.bf16.mxu1 %v10246_v3 }
 0x2e7   : > { %3279 = vmatpush2.bf16.msra.mxu0 %v7069_v7 }
 0x2e8   : > { %6512 = vmatprep.subr.msk.bf16.mxu0 %vm3719_vm7, %v6511_v8  ;;  %v7081_v8 = vld [vmem:[%s10045_s7 + $0x20] ss:$8 sps:$4 sm:$0xff]  }
 0x2e9   : > { %3447 = vmatpush1.bf16.msra.mxu1 %v7064_v5 }
 0x2ea   : > { %3458 = vmatprep.subr.bf16.mxu1 %v10246_v3 }
 0x2ec   : > { %3047 = vmatmul.mubr.bf16.gmra.mxu1 %v7039_v26 }
 0x2ed   : > { %6448 = vmatprep.mubr.msk.bf16.mxu1 %vm2717_vm5, %v7040_v44  ;;  %3459 = vmatpush2.bf16.msra.mxu1 %v3430_v52  ;;  %v7080_v52 = vld [vmem:[%s10045_s7 + $0x34] ss:$8 sps:$4 sm:$0xff]  }
 0x2ee   : > { %3460 = vmatprep.subr.bf16.mxu1 %v10246_v3 }
 0x2f1   : > { %3461 = vmatpush2.bf16.msra.mxu1 %v7068_v57 }
 0x2f2   : > { %3462 = vmatprep.subr.bf16.mxu1 %v10246_v3 }
 0x2f4   : > { %3057 = vmatmul.mubr.bf16.gmra.mxu1 %v7042_v51 }
 0x2f5   : > { %6449 = vmatprep.mubr.msk.bf16.mxu1 %vm2717_vm5, %v7043_v61  ;;  %3463 = vmatpush2.bf16.msra.mxu1 %v7070_v27  ;;  %v6531_v61 = vcombine.low %v3563_v16, %v3563_v16  ;;  %v7083_v16 = vld [vmem:[%s10045_s7 + $0x24] ss:$8 sps:$4 sm:$0xff]  }
 0x2f6   : > { %6533 = vmatprep.subr.msk.bf16.mxu1 %vm3719_vm7, %v6532_v36 }
 0x2f7   : > { %v3911_v50 = vsel %vm3719_vm7, %v6531_v61, 0 }
 0x2fc   : > { %3067 = vmatmul.mubr.bf16.gmra.mxu1 %v7045_v29 }
 0x2fd   : > { %6450 = vmatprep.mubr.msk.bf16.mxu1 %vm2717_vm5, %v7046_v2 }
 0x304   : > { %3077 = vmatmul.mubr.bf16.gmra.mxu1 %v7048_v24  ;;  %v7075_v24 = vld [vmem:[%s10045_s7 + $0x44] ss:$8 sps:$4 sm:$0xff]  }
 0x34c   : > { %v2783_v4 = vpop.f32.mrf.mxu1 }
 0x34e   : > { %v2785_v48 = vpop.f32.mrf.mxu1 }
 0x350   : > { %v2787_v32 = vpop.f32.mrf.mxu1 }
 0x352   : > { %v2789_v56 = vpop.f32.mrf.mxu1 }
 0x354   : > { %v2793_v62 = vpop.f32.mrf.mxu1 }
 0x356   : > { %v8799_v13 = vpop.f32.mrf.mxu1 }
 0x358   : > { %v2797_v60 = vpop.f32.mrf.mxu1 }
 0x35a   : > { %v2799_v49 = vpop.f32.mrf.mxu1 }
 0x35c   : > { %v8801_v23 = vpop.f32.mrf.mxu1 }
 0x35e   : > { %v8803_v10 = vpop.f32.mrf.mxu1 }
 0x360   : > { %v8805_v47 = vpop.f32.mrf.mxu1 }
 0x362   : > { %v8807_v0 = vpop.f32.mrf.mxu1 }
 0x364   : > { %v8809_v22 = vpop.f32.mrf.mxu1 }
 0x366   : > { %v8811_v12 = vpop.f32.mrf.mxu1 }
 0x368   : > { %v8813_v46 = vpop.f32.mrf.mxu1 }
 0x36a   : > { %v8815_v20 = vpop.f32.mrf.mxu1 }
 0x36c   : > { %v8817_v21 = vpop.f32.mrf.mxu1 }
 0x36e   : > { %v8819_v54 = vpop.f32.mrf.mxu1 }
 0x370   : > { %v8821_v39 = vpop.f32.mrf.mxu1 }
 0x372   : > { %v8823_v58 = vpop.f32.mrf.mxu1 }
 0x374   : > { %v8825_v9 = vpop.f32.mrf.mxu1 }
 0x376   : > { %v8827_v59 = vpop.f32.mrf.mxu1 }
 0x378   : > { %v8829_v25 = vpop.f32.mrf.mxu1 }
 0x37a   : > { %v8831_v38 = vpop.f32.mrf.mxu1 }
 0x37c   : > { %v8833_v41 = vpop.f32.mrf.mxu1 }
 0x37e   : > { %v8835_v43 = vpop.f32.mrf.mxu1 }
 0x380   : > { %v8837_v33 = vpop.f32.mrf.mxu1 }
 0x382   : > { %v8839_v1 = vpop.f32.mrf.mxu1 }
 0x384   : > { %v8841_v37 = vpop.f32.mrf.mxu1 }
 0x386   : > { %v8843_v11 = vpop.f32.mrf.mxu1 }
 0x388   : > { %v8845_v30 = vpop.f32.mrf.mxu1 }
 0x38a   : > { %v8847_v18 = vpop.f32.mrf.mxu1 }
 0x38c   : > { %v3008_v26 = vpop.f32.mrf.mxu1 }
 0x38d   : > { %v3087_v55 = vmax.f32 %v2783_v4, %v3008_v26 }
 0x38e   : > { %v3010_v45 = vpop.f32.mrf.mxu1 }
 0x38f   : > { %v3088_v34 = vmax.f32 %v2785_v48, %v3010_v45  ;;  %v7078_v48 = vld [vmem:[%s10045_s7 + $0x30] ss:$8 sps:$4 sm:$0xff]  }
 0x390   : > { %v3012_v44 = vpop.f32.mrf.mxu1 }
 0x391   : > { %v3089_v17 = vmax.f32 %v2787_v32, %v3012_v44 }
 0x392   : > { %v3014_v51 = vpop.f32.mrf.mxu1 }
 0x393   : > { %v3119_v14 = vpack.c.bf16 %v3089_v17, %v3087_v55  ;;  %v3090_v29 = vmax.f32 %v2789_v56, %v3014_v51 }
 0x394   : > { %v3018_v2 = vpop.f32.mrf.mxu1 }
 0x395   : > { %v3120_v40 = vpack.c.bf16 %v3090_v29, %v3088_v34  ;;  %v3091_v5 = vmax.f32 %v2793_v62, %v3018_v2 }
 0x396   : > { %v3020_v15 = vpop.f32.mrf.mxu1 }
 0x397   : > { %6462 = vmatprep.mubr.msk.bf16.mxu0 %vm3219_vm8, %v3120_v40  ;;  %6481 = vmatprep.mubr.msk.bf16.mxu1 %vm3219_vm8, %v3120_v40  ;;  %v3092_v31 = vmax.f32 %v8799_v13, %v3020_v15 }
 0x398   : > { %v3022_v6 = vpop.f32.mrf.mxu1  ;;  %3281 = vmatmul.mubr.bf16.vlgmr.msra.gmra.mxu0 %v3119_v14  ;;  %3465 = vmatmul.mubr.bf16.vlgmr.msra.gmra.mxu1 %v3119_v14 }
 0x399   : > { %v3093_v19 = vmax.f32 %v2797_v60, %v3022_v6  ;;  %3921 = vmatpush1.bf16.msra.mxu1 %v3911_v50  ;;  %3731 = vmatpush1.bf16.msra.mxu0 %v3721_v63 }
 0x39a   : > { %v3024_v42 = vpop.f32.mrf.mxu1  ;;  %3922 = vmatprep.subr.bf16.mxu1 %v7075_v24 }
 0x39b   : > { %v3121_v57 = vpack.c.bf16 %v3093_v19, %v3091_v5  ;;  %v3094_v7 = vmax.f32 %v2799_v49, %v3024_v42 }
 0x39c   : > { %v3028_v27 = vpop.f32.mrf.mxu1 }
 0x39d   : > { %v3122_v4 = vpack.c.bf16 %v3094_v7, %v3092_v31  ;;  %3923 = vmatpush1.bf16.msra.mxu1 %v7073_v53  ;;  %v3095_v35 = vmax.f32 %v8801_v23, %v3028_v27 }
 0x39e   : > { %v3030_v32 = vpop.f32.mrf.mxu1  ;;  %3924 = vmatprep.subr.bf16.mxu1 %v7080_v52 }
 0x39f   : > { %6463 = vmatprep.mubr.msk.bf16.mxu0 %vm3219_vm8, %v3122_v4  ;;  %6482 = vmatprep.mubr.msk.bf16.mxu1 %vm3219_vm8, %v3122_v4  ;;  %v3096_v13 = vmax.f32 %v8803_v10, %v3030_v32 }
 0x3a0   : > { %v3032_v36 = vpop.f32.mrf.mxu1  ;;  %3289 = vmatmul.mubr.bf16.gmra.mxu0 %v3121_v57  ;;  %3473 = vmatmul.mubr.bf16.gmra.mxu1 %v3121_v57 }
 0x3a1   : > { %v3097_v56 = vmax.f32 %v8805_v47, %v3032_v36  ;;  %3925 = vmatpush1.bf16.msra.mxu1 %v7078_v48  ;;  %v7092_v36 = vld [vmem:[%s10045_s7 + $0x4] ss:$8 sps:$4 sm:$0xff]  }
 0x3a2   : > { %v3034_v62 = vpop.f32.mrf.mxu1  ;;  %3926 = vmatprep.subr.bf16.mxu1 %v7083_v16 }
 0x3a3   : > { %v3123_v60 = vpack.c.bf16 %v3097_v56, %v3095_v35  ;;  %v3098_v49 = vmax.f32 %v8807_v0, %v3034_v62  ;;  %v7090_v35 = vld [vmem:[%s10045_s7] ss:$8 sps:$4 sm:$0xff]   ;;  %v7095_v56 = vld [vmem:[%s10045_s7 + $0x8c] ss:$8 sps:$4 sm:$0xff]   ;;  %v7098_v62 = vld [vmem:[%s10045_s7 + $0x7c] ss:$8 sps:$4 sm:$0xff]  }
 0x3a4   : > { %v3038_v26 = vpop.f32.mrf.mxu1 }
 0x3a5   : > { %v3124_v45 = vpack.c.bf16 %v3098_v49, %v3096_v13  ;;  %3927 = vmatpush1.bf16.msra.mxu1 %v7081_v8  ;;  %v3099_v47 = vmax.f32 %v8809_v22, %v3038_v26  ;;  %v7093_v8 = vld [vmem:[%s10045_s7 + $0x88] ss:$8 sps:$4 sm:$0xff]   ;;  %v7096_v13 = vld [vmem:[%s10045_s7 + $0x78] ss:$8 sps:$4 sm:$0xff]   ;;  %v7104_v26 = vld [vmem:[%s10045_s7 + $0x5c] ss:$8 sps:$4 sm:$0xff]  }
 0x3a6   : > { %v3040_v44 = vpop.f32.mrf.mxu1  ;;  %v7099_v49 = vld [vmem:[%s10045_s7 + $0x68] ss:$8 sps:$4 sm:$0xff]  }
 0x3a7   : > { %6464 = vmatprep.mubr.msk.bf16.mxu0 %vm3219_vm8, %v3124_v45  ;;  %6483 = vmatprep.mubr.msk.bf16.mxu1 %vm3219_vm8, %v3124_v45  ;;  %v3100_v10 = vmax.f32 %v8811_v12, %v3040_v44  ;;  %v7102_v45 = vld [vmem:[%s10045_s7 + $0x58] ss:$8 sps:$4 sm:$0xff]  }
 0x3a8   : > { %v3042_v23 = vpop.f32.mrf.mxu1  ;;  %3297 = vmatmul.mubr.bf16.gmra.mxu0 %v3123_v60  ;;  %3481 = vmatmul.mubr.bf16.gmra.mxu1 %v3123_v60  ;;  %v7101_v60 = vld [vmem:[%s10045_s7 + $0x6c] ss:$8 sps:$4 sm:$0xff]   ;;  %v6584_v44 = vld [vmem:[%s10045_s7 + $0x158] sm:$0x33] }
 0x3a9   : > { %v3101_v55 = vmax.f32 %v8813_v46, %v3042_v23  ;;  %v6596_v23 = vcombine.high %v6584_v44, %v6584_v44 }
 0x3aa   : > { %v3044_v17 = vpop.f32.mrf.mxu1 }
 0x3ab   : > { %v3125_v51 = vpack.c.bf16 %v3101_v55, %v3099_v47  ;;  %v3102_v0 = vmax.f32 %v8815_v20, %v3044_v17  ;;  %v8961_v47 = vld [vmem:[%s10045_s7 + $0x100] sm:$0x33] }
 0x3ac   : > { %v3048_v61 = vpop.f32.mrf.mxu1  ;;  %v6564_v55 = vcombine.high %v8961_v47, %v8961_v47 }
 0x3ad   : > { %v3126_v28 = vpack.c.bf16 %v3102_v0, %v3100_v10  ;;  %v3103_v22 = vmax.f32 %v8817_v21, %v3048_v61  ;;  %v6595_v61 = vcombine.low %v6584_v44, %v6584_v44  ;;  %v7118_v44 = vld [vmem:[%s10045_s7 + $0xf0] ss:$8 sps:$4 sm:$0xff]  }
 0x3ae   : > { %v3050_v34 = vpop.f32.mrf.mxu1 }
 0x3af   : > { %6465 = vmatprep.mubr.msk.bf16.mxu0 %vm3219_vm8, %v3126_v28  ;;  %6484 = vmatprep.mubr.msk.bf16.mxu1 %vm3219_vm8, %v3126_v28  ;;  %v3104_v12 = vmax.f32 %v8819_v54, %v3050_v34 }
 0x3b0   : > { %v3052_v14 = vpop.f32.mrf.mxu1  ;;  %3305 = vmatmul.mubr.bf16.gmra.mxu0 %v3125_v51  ;;  %3489 = vmatmul.mubr.bf16.gmra.mxu1 %v3125_v51 }
 0x3b1   : > { %v3105_v46 = vmax.f32 %v8821_v39, %v3052_v14 }
 0x3b2   : > { %v3054_v29 = vpop.f32.mrf.mxu1 }
 0x3b3   : > { %v3127_v2 = vpack.c.bf16 %v3105_v46, %v3103_v22  ;;  %v3106_v20 = vmax.f32 %v8823_v58, %v3054_v29 }
 0x3b4   : > { %v3058_v40 = vpop.f32.mrf.mxu1 }
 0x3b5   : > { %v3128_v15 = vpack.c.bf16 %v3106_v20, %v3104_v12  ;;  %v3107_v21 = vmax.f32 %v8825_v9, %v3058_v40  ;;  %v7109_v20 = vld [vmem:[%s10045_s7 + $0x14c] ss:$8 sps:$4 sm:$0xff]  }
 0x3b6   : > { %v3060_v50 = vpop.f32.mrf.mxu1 }
 0x3b7   : > { %6466 = vmatprep.mubr.msk.bf16.mxu0 %vm3219_vm8, %v3128_v15  ;;  %6485 = vmatprep.mubr.msk.bf16.mxu1 %vm3219_vm8, %v3128_v15  ;;  %v3108_v54 = vmax.f32 %v8827_v59, %v3060_v50 }
 0x3b8   : > { %v3062_v24 = vpop.f32.mrf.mxu1  ;;  %3313 = vmatmul.mubr.bf16.gmra.mxu0 %v3127_v2  ;;  %3497 = vmatmul.mubr.bf16.gmra.mxu1 %v3127_v2  ;;  %v4417_v2 = vsel %vm3719_vm7, %v6595_v61, 0 }
 0x3b9   : > { %v3109_v39 = vmax.f32 %v8829_v25, %v3062_v24 }
 0x3ba   : > { %v3064_v63 = vpop.f32.mrf.mxu1 }
 0x3bb   : > { %v3129_v6 = vpack.c.bf16 %v3109_v39, %v3107_v21  ;;  %v3110_v58 = vmax.f32 %v8831_v38, %v3064_v63  ;;  %v7107_v21 = vld [vmem:[%s10045_s7 + $0x148] ss:$8 sps:$4 sm:$0xff]   ;;  %v7114_v63 = vld [vmem:[%s10045_s7 + $0x13c] ss:$8 sps:$4 sm:$0xff]  }
 0x3bc   : > { %v3068_v5 = vpop.f32.mrf.mxu1 }
 0x3bd   : > { %v3130_v19 = vpack.c.bf16 %v3110_v58, %v3108_v54  ;;  %v3111_v9 = vmax.f32 %v8833_v41, %v3068_v5 }
 0x3be   : > { %v3070_v53 = vpop.f32.mrf.mxu1 }
 0x3bf   : > { %6467 = vmatprep.mubr.msk.bf16.mxu0 %vm3219_vm8, %v3130_v19  ;;  %6486 = vmatprep.mubr.msk.bf16.mxu1 %vm3219_vm8, %v3130_v19  ;;  %v3112_v59 = vmax.f32 %v8835_v43, %v3070_v53 }
 0x3c0   : > { %v3072_v42 = vpop.f32.mrf.mxu1  ;;  %3321 = vmatmul.mubr.bf16.gmra.mxu0 %v3129_v6  ;;  %3505 = vmatmul.mubr.bf16.gmra.mxu1 %v3129_v6 }
 0x3c1   : > { %v3113_v25 = vmax.f32 %v8837_v33, %v3072_v42  ;;  %v7112_v42 = vld [vmem:[%s10045_s7 + $0x138] ss:$8 sps:$4 sm:$0xff]  }
 0x3c2   : > { %v3074_v52 = vpop.f32.mrf.mxu1 }
 0x3c3   : > { %v3131_v31 = vpack.c.bf16 %v3113_v25, %v3111_v9  ;;  %v3114_v38 = vmax.f32 %v8839_v1, %v3074_v52  ;;  %v7117_v52 = vld [vmem:[%s10045_s7 + $0x12c] ss:$8 sps:$4 sm:$0xff]  }
 0x3c4   : > { %v3078_v57 = vpop.f32.mrf.mxu1 }
 0x3c5   : > { %v3132_v7 = vpack.c.bf16 %v3114_v38, %v3112_v59  ;;  %v3115_v41 = vmax.f32 %v8841_v37, %v3078_v57  ;;  %v7089_v37 = vld [vmem:[%s10045_s7 + $0x14] ss:$8 sps:$4 sm:$0xff]  }
 0x3c6   : > { %v3080_v27 = vpop.f32.mrf.mxu1  ;;  %3928 = vmatprep.subr.bf16.mxu1 %v7089_v37 }
 0x3c7   : > { %6468 = vmatprep.mubr.msk.bf16.mxu0 %vm3219_vm8, %v3132_v7  ;;  %6487 = vmatprep.mubr.msk.bf16.mxu1 %vm3219_vm8, %v3132_v7  ;;  %v3116_v43 = vmax.f32 %v8843_v11, %v3080_v27  ;;  %v7086_v11 = vld [vmem:[%s10045_s7 + $0x9c] ss:$8 sps:$4 sm:$0xff]   ;;  %v6563_v7 = vcombine.low %v8961_v47, %v8961_v47 }
 0x3c8   : > { %v3082_v4 = vpop.f32.mrf.mxu1  ;;  %3329 = vmatmul.mubr.bf16.gmra.mxu0 %v3131_v31  ;;  %3513 = vmatmul.mubr.bf16.gmra.mxu1 %v3131_v31 }
 0x3c9   : > { %v3117_v33 = vmax.f32 %v8845_v30, %v3082_v4  ;;  %v7087_v30 = vld [vmem:[%s10045_s7 + $0x10] ss:$8 sps:$4 sm:$0xff]   ;;  %3732 = vmatprep.subr.bf16.mxu0 %v7086_v11 }
 0x3ca   : > { %v3084_v48 = vpop.f32.mrf.mxu1  ;;  %3929 = vmatpush1.bf16.msra.mxu1 %v7087_v30 }
 0x3cb   : > { %v3133_v32 = vpack.c.bf16 %v3117_v33, %v3115_v41  ;;  %v3118_v1 = vmax.f32 %v8847_v18, %v3084_v48  ;;  %v7084_v18 = vld [vmem:[%s10045_s7 + $0x98] ss:$8 sps:$4 sm:$0xff]   ;;  %3930 = vmatprep.subr.bf16.mxu1 %v7092_v36  ;;  %v4144_v36 = vsel %vm3719_vm7, %v6563_v7, 0 }
 0x3cc   : > { %3733 = vmatpush1.bf16.msra.mxu0 %v7084_v18 }
 0x3cd   : > { %v3134_v16 = vpack.c.bf16 %v3118_v1, %v3116_v43  ;;  %3734 = vmatprep.subr.bf16.mxu0 %v7095_v56  ;;  %v7123_v56 = vld [vmem:[%s10045_s7 + $0x11c] ss:$8 sps:$4 sm:$0xff]  }
 0x3ce   : > { %3931 = vmatpush1.bf16.msra.mxu1 %v7090_v35  ;;  %v7120_v35 = vld [vmem:[%s10045_s7 + $0xf4] ss:$8 sps:$4 sm:$0xff]  }
 0x3cf   : > { %6469 = vmatprep.mubr.msk.bf16.mxu0 %vm3219_vm8, %v3134_v16  ;;  %6488 = vmatprep.mubr.msk.bf16.mxu1 %vm3219_vm8, %v3134_v16 }
 0x3d0   : > { %3337 = vmatmul.mubr.bf16.gmra.mxu0 %v3133_v32  ;;  %3521 = vmatmul.mubr.bf16.gmra.mxu1 %v3133_v32  ;;  %v7115_v32 = vld [vmem:[%s10045_s7 + $0x128] ss:$8 sps:$4 sm:$0xff]  }
 0x3d1   : > { %3948 = vmatprep.mubr.bf16.mxu1 %v10246_v3  ;;  %3758 = vmatprep.mubr.bf16.mxu0 %v10246_v3 }
 0x3d2   : > { %3735 = vmatpush1.bf16.msra.mxu0 %v7093_v8  ;;  %6597 = vmatprep.subr.msk.bf16.mxu1 %vm3719_vm7, %v6596_v23  ;;  %v7126_v23 = vld [vmem:[%s10045_s7 + $0x10c] ss:$8 sps:$4 sm:$0xff]  }
 0x3d3   : > { %3736 = vmatprep.subr.bf16.mxu0 %v7098_v62 }
 0x3d6   : > { %3737 = vmatpush1.bf16.msra.mxu0 %v7096_v13 }
 0x3d7   : > { %3738 = vmatprep.subr.bf16.mxu0 %v7101_v60 }
 0x3da   : > { %3739 = vmatpush1.bf16.msra.mxu0 %v7099_v49 }
 0x3db   : > { %3740 = vmatprep.subr.bf16.mxu0 %v7104_v26  ;;  %v7121_v26 = vld [vmem:[%s10045_s7 + $0x118] ss:$8 sps:$4 sm:$0xff]  }
 0x3de   : > { %3741 = vmatpush1.bf16.msra.mxu0 %v7102_v45 }
 0x3df   : > { %6565 = vmatprep.subr.msk.bf16.mxu0 %vm3719_vm7, %v6564_v55 }
 0x458   : > { %v3282_v17 = vpop.f32.mrf.mxu0  ;;  %v3466_v10 = vpop.f32.mrf.mxu1 }
 0x459   : > { %v3529_v14 = vmax.f32 %v3282_v17, %v3466_v10  ;;  %v7129_v17 = vld [vmem:[%s10045_s7 + $0xe4] ss:$8 sps:$4 sm:$0xff]  }
 0x45a   : > { %v3284_v51 = vpop.f32.mrf.mxu0  ;;  %v3468_v0 = vpop.f32.mrf.mxu1 }
 0x45c   : > { %v3285_v28 = vpop.f32.mrf.mxu0  ;;  %v3469_v34 = vpop.f32.mrf.mxu1 }
 0x45d   : > { %v3530_v22 = vmax.f32 %v3285_v28, %v3469_v34  ;;  %v7124_v34 = vld [vmem:[%s10045_s7 + $0x108] ss:$8 sps:$4 sm:$0xff]  }
 0x45e   : > { %v3287_v46 = vpop.f32.mrf.mxu0  ;;  %v3471_v29 = vpop.f32.mrf.mxu1 }
 0x45f   : > { %v8966_v12 = vpack.c.bf16 %v3530_v22, %v3529_v14  ;;  %v7127_v29 = vld [vmem:[%s10045_s7 + $0xe0] ss:$8 sps:$4 sm:$0xff]  }
 0x460   : > { %v3290_v40 = vpop.f32.mrf.mxu0  ;;  %v3474_v15 = vpop.f32.mrf.mxu1 }
 0x461   : > { %6534 = vmatmul.mubr.msk.bf16.vlgmr.msra.gmra.mxu1 %vm3694_vm9, %v8966_v12  ;;  %v3579_v39 = vshll.u32 %v8966_v12, 16  ;;  %v3531_v58 = vmax.f32 %v3290_v40, %v3474_v15  ;;  %v3577_v59 = vshrl.u32 %v8966_v12, 16  ;;  %v4049_v31 = vrot.slane %v8966_v12, 1  ;;  %v7132_v15 = vld [vmem:[%s10045_s7 + $0xd4] ss:$8 sps:$4 sm:$0xff]  }
 0x462   : > { %v3292_v50 = vpop.f32.mrf.mxu0  ;;  %v3476_v24 = vpop.f32.mrf.mxu1  ;;  %3958 = vmatprep.mubr.bf16.mxu1 %v10246_v3  ;;  %4427 = vmatpush1.bf16.msra.mxu1 %v4417_v2  ;;  %v4579_v27 = vrot.slane %v8966_v12, 2 }
 0x463   : > { %4428 = vmatprep.subr.bf16.mxu1 %v7109_v20  ;;  %v3581_v9 = vrot.slane %v3579_v39, 1 }
 0x464   : > { %v3293_v54 = vpop.f32.mrf.mxu0  ;;  %v3477_v6 = vpop.f32.mrf.mxu1 }
 0x465   : > { %v3532_v5 = vmax.f32 %v3293_v54, %v3477_v6  ;;  %v3582_v1 = vor.u32 %v3581_v9, %v3577_v59 }
 0x466   : > { %v3295_v19 = vpop.f32.mrf.mxu0  ;;  %v3479_v53 = vpop.f32.mrf.mxu1  ;;  %4429 = vmatpush1.bf16.msra.mxu1 %v7107_v21 }
 0x467   : > { %v8987_v25 = vpack.c.bf16 %v3532_v5, %v3531_v58  ;;  %4430 = vmatprep.subr.bf16.mxu1 %v7114_v63  ;;  %v7130_v5 = vld [vmem:[%s10045_s7 + $0xd0] ss:$8 sps:$4 sm:$0xff]  }
 0x468   : > { %v3298_v38 = vpop.f32.mrf.mxu0  ;;  %v3482_v57 = vpop.f32.mrf.mxu1 }
 0x469   : > { %v3584_v4 = vshll.u32 %v8987_v25, 16  ;;  %v4050_v41 = vrot.slane %v8987_v25, 1  ;;  %v4580_v33 = vrot.slane %v8987_v25, 2  ;;  %6535 = vmatmul.mubr.msk.bf16.gmra.mxu1 %vm3694_vm9, %v8987_v25  ;;  %v3533_v8 = vmax.f32 %v3298_v38, %v3482_v57 }
 0x46a   : > { %v3300_v48 = vpop.f32.mrf.mxu0  ;;  %v3484_v43 = vpop.f32.mrf.mxu1  ;;  %3968 = vmatprep.mubr.bf16.mxu1 %v10246_v3  ;;  %4431 = vmatpush1.bf16.msra.mxu1 %v7112_v42  ;;  %v3588_v10 = vshrl.u32 %v8987_v25, 16  ;;  %v7135_v42 = vld [vmem:[%s10045_s7 + $0xc4] ss:$8 sps:$4 sm:$0xff]  }
 0x46b   : > { %v3586_v16 = vrot.slane %v3584_v4, 1  ;;  %4432 = vmatprep.subr.bf16.mxu1 %v7117_v52  ;;  %v9011_v37 = vsel %vm1344_vm3, %v4049_v31, %v4050_v41  ;;  %v9014_v11 = vsel %vm2100_vm4, %v4579_v27, %v4580_v33 }
 0x46c   : > { %v3301_v30 = vpop.f32.mrf.mxu0  ;;  %v3485_v18 = vpop.f32.mrf.mxu1 }
 0x46d   : > { %v3534_v62 = vmax.f32 %v3301_v30, %v3485_v18  ;;  %v3587_v13 = vsel %vm688_vm1, %v3582_v1, %v3586_v16  ;;  %v3590_v22 = vor.u32 %v3588_v10, %v3586_v16  ;;  %v7138_v1 = vld [vmem:[%s10045_s7 + $0xb4] ss:$8 sps:$4 sm:$0xff]  }
 0x46e   : > { %v3303_v60 = vpop.f32.mrf.mxu0  ;;  %v3487_v49 = vpop.f32.mrf.mxu1  ;;  %6513 = vmatmul.mubr.msk.bf16.vlgmr.msra.gmra.mxu0 %vm3694_vm9, %v3587_v13  ;;  %4433 = vmatpush1.bf16.msra.mxu1 %v7115_v32  ;;  %v7136_v13 = vld [vmem:[%s10045_s7 + $0xb0] ss:$8 sps:$4 sm:$0xff]  }
 0x46f   : > { %v9028_v45 = vpack.c.bf16 %v3534_v62, %v3533_v8  ;;  %3768 = vmatprep.mubr.bf16.mxu0 %v10246_v3  ;;  %4154 = vmatpush1.bf16.msra.mxu0 %v4144_v36 }
 0x470   : > { %v3306_v47 = vpop.f32.mrf.mxu0  ;;  %v3490_v55 = vpop.f32.mrf.mxu1  ;;  %4155 = vmatprep.subr.bf16.mxu0 %v7120_v35  ;;  %4434 = vmatprep.subr.bf16.mxu1 %v7123_v56  ;;  %v9104_v35 = vld [vmem:[%s10045_s7 + $0x1b0] sm:$0x33] }
 0x471   : > { %6536 = vmatmul.mubr.msk.bf16.gmra.mxu1 %vm3694_vm9, %v9028_v45  ;;  %v3592_v51 = vshll.u32 %v9028_v45, 16  ;;  %v4052_v0 = vrot.slane %v9028_v45, 1  ;;  %v4582_v14 = vrot.slane %v9028_v45, 2  ;;  %v3535_v24 = vmax.f32 %v3306_v47, %v3490_v55 }
 0x472   : > { %v3308_v61 = vpop.f32.mrf.mxu0  ;;  %v3492_v28 = vpop.f32.mrf.mxu1  ;;  %3978 = vmatprep.mubr.bf16.mxu1 %v10246_v3  ;;  %4435 = vmatpush1.bf16.msra.mxu1 %v7121_v26  ;;  %v3596_v9 = vshrl.u32 %v9028_v45, 16  ;;  %v6628_v26 = vcombine.high %v9104_v35, %v9104_v35 }
 0x473   : > { %v3594_v46 = vrot.slane %v3592_v51, 1  ;;  %4156 = vmatpush1.bf16.msra.mxu0 %v7118_v44  ;;  %4436 = vmatprep.subr.bf16.mxu1 %v7126_v23  ;;  %v9058_v2 = vsel %vm1344_vm3, %v4050_v41, %v4052_v0  ;;  %v9064_v50 = vsel %vm2100_vm4, %v4580_v33, %v4582_v14  ;;  %v7133_v33 = vld [vmem:[%s10045_s7 + $0xc0] ss:$8 sps:$4 sm:$0xff]  }
 0x474   : > { %v3309_v20 = vpop.f32.mrf.mxu0  ;;  %v3493_v40 = vpop.f32.mrf.mxu1  ;;  %4157 = vmatprep.subr.bf16.mxu0 %v7129_v17 }
 0x475   : > { %v3536_v21 = vmax.f32 %v3309_v20, %v3493_v40  ;;  %v3595_v63 = vsel %vm688_vm1, %v3590_v22, %v3594_v46  ;;  %v3598_v27 = vor.u32 %v3596_v9, %v3594_v46 }
 0x476   : > { %v3311_v54 = vpop.f32.mrf.mxu0  ;;  %v3495_v6 = vpop.f32.mrf.mxu1  ;;  %6514 = vmatmul.mubr.msk.bf16.gmra.mxu0 %vm3694_vm9, %v3595_v63  ;;  %4437 = vmatpush1.bf16.msra.mxu1 %v7124_v34 }
 0x477   : > { %v9068_v58 = vpack.c.bf16 %v3536_v21, %v3535_v24  ;;  %3778 = vmatprep.mubr.bf16.mxu0 %v10246_v3  ;;  %4158 = vmatpush1.bf16.msra.mxu0 %v7127_v29 }
 0x478   : > { %v3314_v19 = vpop.f32.mrf.mxu0  ;;  %v3498_v53 = vpop.f32.mrf.mxu1  ;;  %4159 = vmatprep.subr.bf16.mxu0 %v7132_v15 }
 0x479   : > { %6537 = vmatmul.mubr.msk.bf16.gmra.mxu1 %vm3694_vm9, %v9068_v58  ;;  %v3600_v52 = vshll.u32 %v9068_v58, 16  ;;  %v4054_v31 = vrot.slane %v9068_v58, 1  ;;  %v4584_v7 = vrot.slane %v9068_v58, 2  ;;  %v3537_v30 = vmax.f32 %v3314_v19, %v3498_v53 }
 0x47a   : > { %v3316_v38 = vpop.f32.mrf.mxu0  ;;  %v3500_v57 = vpop.f32.mrf.mxu1  ;;  %3988 = vmatprep.mubr.bf16.mxu1 %v10246_v3  ;;  %v3604_v44 = vshrl.u32 %v9068_v58, 16  ;;  %v7141_v58 = vld [vmem:[%s10045_s7 + $0x1a0] ss:$8 sps:$4 sm:$0xff]  }
 0x47b   : > { %v3602_v41 = vrot.slane %v3600_v52, 1  ;;  %4160 = vmatpush1.bf16.msra.mxu0 %v7130_v5  ;;  %v9092_v48 = vsel %vm1344_vm3, %v4052_v0, %v4054_v31  ;;  %v9098_v16 = vsel %vm2100_vm4, %v4582_v14, %v4584_v7 }
 0x47c   : > { %v3317_v43 = vpop.f32.mrf.mxu0  ;;  %v3501_v32 = vpop.f32.mrf.mxu1  ;;  %4161 = vmatprep.subr.bf16.mxu0 %v7135_v42  ;;  %v4317_v45 = vrot.slane %v3604_v44, 1 }
 0x47d   : > { %v3538_v18 = vmax.f32 %v3317_v43, %v3501_v32  ;;  %v3603_v36 = vsel %vm688_vm1, %v3598_v27, %v3602_v41  ;;  %v3606_v61 = vor.u32 %v3604_v44, %v3602_v41 }
 0x47e   : > { %v3319_v56 = vpop.f32.mrf.mxu0  ;;  %v3503_v8 = vpop.f32.mrf.mxu1  ;;  %6515 = vmatmul.mubr.msk.bf16.gmra.mxu0 %vm3694_vm9, %v3603_v36 }
 0x47f   : > { %v9107_v62 = vpack.c.bf16 %v3538_v18, %v3537_v30  ;;  %3788 = vmatprep.mubr.bf16.mxu0 %v10246_v3  ;;  %4162 = vmatpush1.bf16.msra.mxu0 %v7133_v33 }
 0x480   : > { %v3322_v60 = vpop.f32.mrf.mxu0  ;;  %v3506_v49 = vpop.f32.mrf.mxu1  ;;  %4163 = vmatprep.subr.bf16.mxu0 %v7138_v1 }
 0x481   : > { %6538 = vmatmul.mubr.msk.bf16.gmra.mxu1 %vm3694_vm9, %v9107_v62  ;;  %v3608_v23 = vshll.u32 %v9107_v62, 16  ;;  %v4056_v47 = vrot.slane %v9107_v62, 1  ;;  %v4586_v0 = vrot.slane %v9107_v62, 2  ;;  %v3539_v29 = vmax.f32 %v3322_v60, %v3506_v49 }
 0x482   : > { %v3324_v55 = vpop.f32.mrf.mxu0  ;;  %v3508_v17 = vpop.f32.mrf.mxu1  ;;  %3998 = vmatprep.mubr.bf16.mxu1 %v10246_v3  ;;  %v3612_v6 = vshrl.u32 %v9107_v62, 16  ;;  %v7149_v62 = vld [vmem:[%s10045_s7 + $0x184] ss:$8 sps:$4 sm:$0xff]  }
 0x483   : > { %v3610_v28 = vrot.slane %v3608_v23, 1  ;;  %4164 = vmatpush1.bf16.msra.mxu0 %v7136_v13  ;;  %v9127_v34 = vsel %vm1344_vm3, %v4054_v31, %v4056_v47  ;;  %v9131_v46 = vsel %vm2100_vm4, %v4584_v7, %v4586_v0  ;;  %v4322_v44 = vrot.slane %v3608_v23, 2  ;;  %v7147_v23 = vld [vmem:[%s10045_s7 + $0x180] ss:$8 sps:$4 sm:$0xff]  }
 0x484   : > { %v3325_v14 = vpop.f32.mrf.mxu0  ;;  %v3509_v22 = vpop.f32.mrf.mxu1  ;;  %6629 = vmatprep.subr.msk.bf16.mxu0 %vm3719_vm7, %v6628_v26 }
 0x485   : > { %v3540_v20 = vmax.f32 %v3325_v14, %v3509_v22  ;;  %v3611_v40 = vsel %vm688_vm1, %v3606_v61, %v3610_v28  ;;  %v3614_v38 = vor.u32 %v3612_v6, %v3610_v28 }
 0x486   : > { %v3327_v15 = vpop.f32.mrf.mxu0  ;;  %v3511_v24 = vpop.f32.mrf.mxu1  ;;  %6516 = vmatmul.mubr.msk.bf16.gmra.mxu0 %vm3694_vm9, %v3611_v40 }
 0x487   : > { %v9135_v21 = vpack.c.bf16 %v3540_v20, %v3539_v29  ;;  %3798 = vmatprep.mubr.bf16.mxu0 %v10246_v3 }
 0x488   : > { %v3330_v63 = vpop.f32.mrf.mxu0  ;;  %v3514_v54 = vpop.f32.mrf.mxu1 }
 0x489   : > { %6539 = vmatmul.mubr.msk.bf16.gmra.mxu1 %vm3694_vm9, %v9135_v21  ;;  %v3616_v5 = vshll.u32 %v9135_v21, 16  ;;  %v4058_v19 = vrot.slane %v9135_v21, 1  ;;  %v4588_v31 = vrot.slane %v9135_v21, 2  ;;  %v3541_v43 = vmax.f32 %v3330_v63, %v3514_v54 }
 0x48a   : > { %v3332_v53 = vpop.f32.mrf.mxu0  ;;  %v3516_v42 = vpop.f32.mrf.mxu1  ;;  %4008 = vmatprep.mubr.bf16.mxu1 %v10246_v3  ;;  %v3620_v13 = vshrl.u32 %v9135_v21, 16  ;;  %v4310_v54 = vrot.slane %v3584_v4, 2  ;;  %v4307_v4 = vrot.slane %v3579_v39, 2  ;;  %v7155_v21 = vld [vmem:[%s10045_s7 + $0x164] ss:$8 sps:$4 sm:$0xff]  }
 0x48b   : > { %v3618_v57 = vrot.slane %v3616_v5, 1  ;;  %v9150_v7 = vsel %vm1344_vm3, %v4056_v47, %v4058_v19  ;;  %v9153_v33 = vsel %vm2100_vm4, %v4586_v0, %v4588_v31 }
 0x48c   : > { %v3333_v27 = vpop.f32.mrf.mxu0  ;;  %v3517_v41 = vpop.f32.mrf.mxu1 }
 0x48d   : > { %v3542_v32 = vmax.f32 %v3333_v27, %v3517_v41  ;;  %v3619_v1 = vsel %vm688_vm1, %v3614_v38, %v3618_v57  ;;  %v3622_v17 = vor.u32 %v3620_v13, %v3618_v57  ;;  %v4306_v57 = vrot.slane %v3577_v59, 1 }
 0x48e   : > { %v3335_v30 = vpop.f32.mrf.mxu0  ;;  %v3519_v18 = vpop.f32.mrf.mxu1  ;;  %6517 = vmatmul.mubr.msk.bf16.gmra.mxu0 %vm3694_vm9, %v3619_v1  ;;  %v4314_v1 = vrot.slane %v3592_v51, 2  ;;  %v4318_v51 = vrot.slane %v3600_v52, 2 }
 0x48f   : > { %v9157_v36 = vpack.c.bf16 %v3542_v32, %v3541_v43  ;;  %3808 = vmatprep.mubr.bf16.mxu0 %v10246_v3  ;;  %v4308_v39 = vor.u32 %v4307_v4, %v4306_v57  ;;  %v4313_v32 = vrot.slane %v3596_v9, 1  ;;  %v6627_v9 = vcombine.low %v9104_v35, %v9104_v35 }
 0x490   : > { %v3338_v56 = vpop.f32.mrf.mxu0  ;;  %v3522_v8 = vpop.f32.mrf.mxu1  ;;  %v4321_v35 = vrot.slane %v3612_v6, 1 }
 0x491   : > { %6540 = vmatmul.mubr.msk.bf16.gmra.mxu1 %vm3694_vm9, %v9157_v36  ;;  %v3624_v60 = vshll.u32 %v9157_v36, 16  ;;  %v4060_v49 = vrot.slane %v9157_v36, 1  ;;  %v4590_v55 = vrot.slane %v9157_v36, 2  ;;  %v3543_v29 = vmax.f32 %v3338_v56, %v3522_v8 }
 0x492   : > { %v3340_v26 = vpop.f32.mrf.mxu0  ;;  %v3524_v47 = vpop.f32.mrf.mxu1  ;;  %4018 = vmatprep.mubr.bf16.mxu1 %v10246_v3  ;;  %v3628_v53 = vshrl.u32 %v9157_v36, 16  ;;  %v4315_v56 = vor.u32 %v4314_v1, %v4313_v32 }
 0x493   : > { %v3626_v0 = vrot.slane %v3624_v60, 1  ;;  %v9172_v61 = vsel %vm1344_vm3, %v4058_v19, %v4060_v49  ;;  %v9175_v22 = vsel %vm2100_vm4, %v4588_v31, %v4590_v55  ;;  %v4309_v19 = vrot.slane %v3588_v10, 1  ;;  %v7143_v47 = vld [vmem:[%s10045_s7 + $0x1a4] ss:$8 sps:$4 sm:$0xff]  }
 0x494   : > { %v3341_v28 = vpop.f32.mrf.mxu0  ;;  %v3525_v14 = vpop.f32.mrf.mxu1  ;;  %v4674_v26 = vsel %vm3719_vm7, %v6627_v9, 0 }
 0x495   : > { %v3544_v20 = vmax.f32 %v3341_v28, %v3525_v14  ;;  %v3627_v40 = vsel %vm688_vm1, %v3622_v17, %v3626_v0  ;;  %v3630_v25 = vor.u32 %v3628_v53, %v3626_v0  ;;  %v4311_v41 = vor.u32 %v4310_v54, %v4309_v19  ;;  %v7150_v14 = vld [vmem:[%s10045_s7 + $0x170] ss:$8 sps:$4 sm:$0xff]  }
 0x496   : > { %v3343_v15 = vpop.f32.mrf.mxu0  ;;  %v3527_v24 = vpop.f32.mrf.mxu1  ;;  %6518 = vmatmul.mubr.msk.bf16.gmra.mxu0 %vm3694_vm9, %v3627_v40  ;;  %v4323_v17 = vor.u32 %v4322_v44, %v4321_v35  ;;  %v4325_v0 = vrot.slane %v3620_v13, 1  ;;  %v4326_v28 = vrot.slane %v3616_v5, 2  ;;  %v7153_v5 = vld [vmem:[%s10045_s7 + $0x160] ss:$8 sps:$4 sm:$0xff]   ;;  %v4330_v40 = vrot.slane %v3624_v60, 2 }
 0x497   : > { %v9179_v63 = vpack.c.bf16 %v3544_v20, %v3543_v29  ;;  %3818 = vmatprep.mubr.bf16.mxu0 %v10246_v3  ;;  %v4312_v43 = vsel %vm1706_vm2, %v4308_v39, %v4311_v41  ;;  %v4316_v8 = vsel %vm1706_vm2, %v4311_v41, %v4315_v56  ;;  %v4329_v20 = vrot.slane %v3628_v53, 1 }
 0x498   : > { %v4327_v29 = vor.u32 %v4326_v28, %v4325_v0 }
 0x499   : > { %6541 = vmatmul.mubr.msk.bf16.gmra.mxu1 %vm3694_vm9, %v9179_v63  ;;  %v3632_v42 = vshll.u32 %v9179_v63, 16  ;;  %v4062_v31 = vrot.slane %v9179_v63, 1  ;;  %v4592_v38 = vrot.slane %v9179_v63, 2  ;;  %v3636_v30 = vshrl.u32 %v9179_v63, 16 }
 0x49a   : > { %4454 = vmatprep.mubr.bf16.mxu1 %v10246_v3  ;;  %v4328_v13 = vsel %vm1706_vm2, %v4323_v17, %v4327_v29 }
 0x49b   : > { %v3634_v10 = vrot.slane %v3632_v42, 1  ;;  %v9204_v27 = vsel %vm1344_vm3, %v4060_v49, %v4062_v31  ;;  %v9209_v59 = vsel %vm2100_vm4, %v4590_v55, %v4592_v38  ;;  %v4319_v49 = vor.u32 %v4318_v51, %v4317_v45  ;;  %v7144_v55 = vld [vmem:[%s10045_s7 + $0x190] ss:$8 sps:$4 sm:$0xff]  }
 0x49c   : > { %v4333_v36 = vrot.slane %v3636_v30, 1  ;;  %v4334_v60 = vrot.slane %v3632_v42, 2 }
 0x49d   : > { %v3635_v12 = vsel %vm688_vm1, %v3630_v25, %v3634_v10  ;;  %v3638_v18 = vor.u32 %v3636_v30, %v3634_v10  ;;  %v4320_v52 = vsel %vm1706_vm2, %v4315_v56, %v4319_v49  ;;  %v4324_v6 = vsel %vm1706_vm2, %v4319_v49, %v4323_v17 }
 0x49e   : > { %6519 = vmatmul.mubr.msk.bf16.gmra.mxu0 %vm3694_vm9, %v3635_v12  ;;  %v4335_v24 = vor.u32 %v4334_v60, %v4333_v36 }
 0x49f   : > { %3828 = vmatprep.mubr.bf16.mxu0 %v10246_v3 }
 0x4a1   : > { %6598 = vmatmul.mubr.msk.bf16.vlgmr.msra.gmra.mxu1 %vm3694_vm9, %v4312_v43 }
 0x4a2   : > { %4464 = vmatprep.mubr.bf16.mxu1 %v10246_v3 }
 0x4a6   : > { %6520 = vmatmul.mubr.msk.bf16.gmra.mxu0 %vm3694_vm9, %v3638_v18 }
 0x4a7   : > { %4181 = vmatprep.mubr.bf16.mxu0 %v10246_v3 }
 0x4a9   : > { %6599 = vmatmul.mubr.msk.bf16.gmra.mxu1 %vm3694_vm9, %v4316_v8 }
 0x4aa   : > { %4474 = vmatprep.mubr.bf16.mxu1 %v10246_v3 }
 0x4ae   : > { %6566 = vmatmul.mubr.msk.bf16.vlgmr.msra.gmra.mxu0 %vm3694_vm9, %v9011_v37  ;;  %v7146_v37 = vld [vmem:[%s10045_s7 + $0x194] ss:$8 sps:$4 sm:$0xff]  }
 0x4af   : > { %4191 = vmatprep.mubr.bf16.mxu0 %v10246_v3  ;;  %4684 = vmatpush1.bf16.msra.mxu0 %v4674_v26 }
 0x4b0   : > { %4685 = vmatprep.subr.bf16.mxu0 %v7143_v47 }
 0x4b1   : > { %6600 = vmatmul.mubr.msk.bf16.gmra.mxu1 %vm3694_vm9, %v4320_v52 }
 0x4b2   : > { %4484 = vmatprep.mubr.bf16.mxu1 %v10246_v3 }
 0x4b3   : > { %4686 = vmatpush1.bf16.msra.mxu0 %v7141_v58 }
 0x4b4   : > { %4687 = vmatprep.subr.bf16.mxu0 %v7146_v37 }
 0x4b6   : > { %6567 = vmatmul.mubr.msk.bf16.gmra.mxu0 %vm3694_vm9, %v9058_v2  ;;  %v7152_v2 = vld [vmem:[%s10045_s7 + $0x174] ss:$8 sps:$4 sm:$0xff]  }
 0x4b7   : > { %4201 = vmatprep.mubr.bf16.mxu0 %v10246_v3  ;;  %4688 = vmatpush1.bf16.msra.mxu0 %v7144_v55 }
 0x4b8   : > { %4689 = vmatprep.subr.bf16.mxu0 %v7149_v62 }
 0x4b9   : > { %6601 = vmatmul.mubr.msk.bf16.gmra.mxu1 %vm3694_vm9, %v4324_v6 }
 0x4ba   : > { %4494 = vmatprep.mubr.bf16.mxu1 %v10246_v3 }
 0x4bb   : > { %4690 = vmatpush1.bf16.msra.mxu0 %v7147_v23 }
 0x4bc   : > { %4691 = vmatprep.subr.bf16.mxu0 %v7152_v2 }
 0x4be   : > { %6568 = vmatmul.mubr.msk.bf16.gmra.mxu0 %vm3694_vm9, %v9092_v48  ;;  %v4331_v48 = vor.u32 %v4330_v40, %v4329_v20 }
 0x4bf   : > { %4211 = vmatprep.mubr.bf16.mxu0 %v10246_v3  ;;  %4692 = vmatpush1.bf16.msra.mxu0 %v7150_v14 }
 0x4c0   : > { %4693 = vmatprep.subr.bf16.mxu0 %v7155_v21  ;;  %v4332_v15 = vsel %vm1706_vm2, %v4327_v29, %v4331_v48 }
 0x4c1   : > { %6602 = vmatmul.mubr.msk.bf16.gmra.mxu1 %vm3694_vm9, %v4328_v13 }
 0x4c2   : > { %4504 = vmatprep.mubr.bf16.mxu1 %v10246_v3 }
 0x4c3   : > { %4694 = vmatpush1.bf16.msra.mxu0 %v7153_v5 }
 0x4c4   : > { %5264 = vmatprep.subr.bf16.mxu0 %v10246_v3 }
 0x4c6   : > { %6569 = vmatmul.mubr.msk.bf16.gmra.mxu0 %vm3694_vm9, %v9127_v34  ;;  %v4336_v34 = vsel %vm1706_vm2, %v4331_v48, %v4335_v24 }
 0x4c7   : > { %4221 = vmatprep.mubr.bf16.mxu0 %v10246_v3 }
 0x4c9   : > { %6603 = vmatmul.mubr.msk.bf16.gmra.mxu1 %vm3694_vm9, %v4332_v15 }
 0x4ca   : > { %4514 = vmatprep.mubr.bf16.mxu1 %v10246_v3 }
 0x4ce   : > { %6570 = vmatmul.mubr.msk.bf16.gmra.mxu0 %vm3694_vm9, %v9150_v7 }
 0x4cf   : > { %4231 = vmatprep.mubr.bf16.mxu0 %v10246_v3 }
 0x4d1   : > { %6604 = vmatmul.mubr.msk.bf16.gmra.mxu1 %vm3694_vm9, %v4336_v34 }
 0x4d2   : > { %4524 = vmatprep.mubr.bf16.mxu1 %v10246_v3 }
 0x4d6   : > { %6571 = vmatmul.mubr.msk.bf16.gmra.mxu0 %vm3694_vm9, %v9172_v61 }
 0x4d7   : > { %4241 = vmatprep.mubr.bf16.mxu0 %v10246_v3 }
 0x4d9   : > { %6605 = vmatmul.mubr.msk.bf16.gmra.mxu1 %vm3694_vm9, %v4335_v24 }
 0x4da   : > { %4994 = vmatprep.mubr.bf16.mxu1 %v10246_v3 }
 0x4de   : > { %6572 = vmatmul.mubr.msk.bf16.gmra.mxu0 %vm3694_vm9, %v9204_v27 }
 0x4df   : > { %4251 = vmatprep.mubr.bf16.mxu0 %v10246_v3 }
 0x4e6   : > { %6573 = vmatmul.mubr.msk.bf16.gmra.mxu0 %vm3694_vm9, %v4062_v31 }
 0x4e7   : > { %4711 = vmatprep.mubr.bf16.mxu0 %v10246_v3 }
 0x4ee   : > { %6630 = vmatmul.mubr.msk.bf16.vlgmr.msra.gmra.mxu0 %vm3694_vm9, %v9014_v11 }
 0x4ef   : > { %4721 = vmatprep.mubr.bf16.mxu0 %v10246_v3 }
 0x4f6   : > { %6631 = vmatmul.mubr.msk.bf16.gmra.mxu0 %vm3694_vm9, %v9064_v50 }
 0x4f7   : > { %4731 = vmatprep.mubr.bf16.mxu0 %v10246_v3 }
 0x4fe   : > { %6632 = vmatmul.mubr.msk.bf16.gmra.mxu0 %vm3694_vm9, %v9098_v16 }
 0x4ff   : > { %4741 = vmatprep.mubr.bf16.mxu0 %v10246_v3 }
 0x506   : > { %6633 = vmatmul.mubr.msk.bf16.gmra.mxu0 %vm3694_vm9, %v9131_v46 }
 0x507   : > { %4751 = vmatprep.mubr.bf16.mxu0 %v10246_v3 }
 0x50e   : > { %6634 = vmatmul.mubr.msk.bf16.gmra.mxu0 %vm3694_vm9, %v9153_v33 }
 0x50f   : > { %4761 = vmatprep.mubr.bf16.mxu0 %v10246_v3 }
 0x516   : > { %6635 = vmatmul.mubr.msk.bf16.gmra.mxu0 %vm3694_vm9, %v9175_v22 }
 0x517   : > { %4771 = vmatprep.mubr.bf16.mxu0 %v10246_v3 }
 0x51e   : > { %6636 = vmatmul.mubr.msk.bf16.gmra.mxu0 %vm3694_vm9, %v9209_v59 }
 0x51f   : > { %4781 = vmatprep.mubr.bf16.mxu0 %v10246_v3 }
 0x521   : > { %v3950_v11 = vpop.f32.mrf.mxu1 }
 0x523   : > { %v3952_v50 = vpop.f32.mrf.mxu1 }
 0x525   : > { %v3954_v16 = vpop.f32.mrf.mxu1 }
 0x526   : > { %6637 = vmatmul.mubr.msk.bf16.gmra.mxu0 %vm3694_vm9, %v4592_v38 }
 0x527   : > { %v9349_v46 = vpop.f32.mrf.mxu1 }
 0x529   : > { %v3960_v7 = vpop.f32.mrf.mxu1 }
 0x52b   : > { %v3962_v33 = vpop.f32.mrf.mxu1 }
 0x52d   : > { %v3964_v61 = vpop.f32.mrf.mxu1 }
 0x52e   : > { %v3760_v22 = vpop.f32.mrf.mxu0 }
 0x52f   : > { %v9351_v54 = vadd.f32 %v3950_v11, %v3760_v22  ;;  %v9353_v19 = vpop.f32.mrf.mxu1 }
 0x530   : > { %v3762_v53 = vpop.f32.mrf.mxu0 }
 0x531   : > { %v9355_v42 = vadd.f32 %v3952_v50, %v3762_v53  ;;  %v3970_v31 = vpop.f32.mrf.mxu1 }
 0x532   : > { %v3764_v57 = vpop.f32.mrf.mxu0 }
 0x533   : > { %v9357_v4 = vadd.f32 %v3954_v16, %v3764_v57  ;;  %v3972_v63 = vpop.f32.mrf.mxu1 }
 0x534   : > { %v9359_v25 = vpop.f32.mrf.mxu0 }
 0x535   : > { %v3974_v38 = vpop.f32.mrf.mxu1 }
 0x536   : > { %v3770_v10 = vpop.f32.mrf.mxu0 }
 0x537   : > { %v9361_v27 = vadd.f32 %v3960_v7, %v3770_v10  ;;  %v9363_v41 = vpop.f32.mrf.mxu1 }
 0x538   : > { %v3772_v59 = vpop.f32.mrf.mxu0 }
 0x539   : > { %v9365_v12 = vadd.f32 %v3962_v33, %v3772_v59  ;;  %v3980_v39 = vpop.f32.mrf.mxu1 }
 0x53a   : > { %v3774_v43 = vpop.f32.mrf.mxu0 }
 0x53b   : > { %v9367_v32 = vadd.f32 %v3964_v61, %v3774_v43  ;;  %v3982_v1 = vpop.f32.mrf.mxu1 }
 0x53c   : > { %v9369_v30 = vpop.f32.mrf.mxu0 }
 0x53d   : > { %v3984_v18 = vpop.f32.mrf.mxu1 }
 0x53e   : > { %v3780_v56 = vpop.f32.mrf.mxu0 }
 0x53f   : > { %v9371_v8 = vadd.f32 %v3970_v31, %v3780_v56  ;;  %v9373_v45 = vpop.f32.mrf.mxu1 }
 0x540   : > { %v3782_v51 = vpop.f32.mrf.mxu0 }
 0x541   : > { %v9375_v9 = vadd.f32 %v3972_v63, %v3782_v51  ;;  %v3990_v49 = vpop.f32.mrf.mxu1 }
 0x542   : > { %v3784_v26 = vpop.f32.mrf.mxu0 }
 0x543   : > { %v9377_v47 = vadd.f32 %v3974_v38, %v3784_v26  ;;  %v3992_v58 = vpop.f32.mrf.mxu1 }
 0x544   : > { %v9379_v52 = vpop.f32.mrf.mxu0 }
 0x545   : > { %v3994_v35 = vpop.f32.mrf.mxu1 }
 0x546   : > { %v3790_v44 = vpop.f32.mrf.mxu0 }
 0x547   : > { %v9381_v37 = vadd.f32 %v3980_v39, %v3790_v44  ;;  %v9383_v55 = vpop.f32.mrf.mxu1 }
 0x548   : > { %v3792_v17 = vpop.f32.mrf.mxu0 }
 0x549   : > { %v9385_v62 = vadd.f32 %v3982_v1, %v3792_v17  ;;  %v4000_v23 = vpop.f32.mrf.mxu1 }
 0x54a   : > { %v3794_v6 = vpop.f32.mrf.mxu0 }
 0x54b   : > { %v9387_v0 = vadd.f32 %v3984_v18, %v3794_v6  ;;  %v4002_v28 = vpop.f32.mrf.mxu1 }
 0x54c   : > { %v9389_v2 = vpop.f32.mrf.mxu0 }
 0x54d   : > { %v4004_v14 = vpop.f32.mrf.mxu1 }
 0x54e   : > { %v3800_v29 = vpop.f32.mrf.mxu0 }
 0x54f   : > { %v9391_v21 = vadd.f32 %v3990_v49, %v3800_v29  ;;  %v9393_v5 = vpop.f32.mrf.mxu1 }
 0x550   : > { %v3802_v13 = vpop.f32.mrf.mxu0 }
 0x551   : > { %v9395_v20 = vadd.f32 %v3992_v58, %v3802_v13  ;;  %v4010_v40 = vpop.f32.mrf.mxu1 }
 0x552   : > { %v3804_v48 = vpop.f32.mrf.mxu0 }
 0x553   : > { %v9397_v15 = vadd.f32 %v3994_v35, %v3804_v48  ;;  %v4012_v36 = vpop.f32.mrf.mxu1 }
 0x554   : > { %v9399_v60 = vpop.f32.mrf.mxu0 }
 0x555   : > { %v4014_v24 = vpop.f32.mrf.mxu1 }
 0x556   : > { %v3810_v34 = vpop.f32.mrf.mxu0 }
 0x557   : > { %v9401_v11 = vadd.f32 %v4000_v23, %v3810_v34  ;;  %v4016_v50 = vpop.f32.mrf.mxu1  ;;  %v3957_v34 = vadd.f32 %v9349_v46, %v9359_v25 }
 0x558   : > { %v3812_v16 = vpop.f32.mrf.mxu0 }
 0x559   : > { %v9403_v7 = vadd.f32 %v4002_v28, %v3812_v16  ;;  %v4020_v33 = vpop.f32.mrf.mxu1 }
 0x55a   : > { %v3814_v61 = vpop.f32.mrf.mxu0 }
 0x55b   : > { %v9405_v22 = vadd.f32 %v4004_v14, %v3814_v61  ;;  %v4022_v53 = vpop.f32.mrf.mxu1 }
 0x55c   : > { %v9407_v31 = vpop.f32.mrf.mxu0 }
 0x55d   : > { %v9409_v57 = vpop.f32.mrf.mxu1 }
 0x55e   : > { %v3820_v63 = vpop.f32.mrf.mxu0 }
 0x55f   : > { %v9411_v38 = vadd.f32 %v4010_v40, %v3820_v63  ;;  %v9413_v10 = vpop.f32.mrf.mxu1 }
 0x560   : > { %v3822_v59 = vpop.f32.mrf.mxu0 }
 0x561   : > { %v9415_v39 = vadd.f32 %v4012_v36, %v3822_v59  ;;  %v4456_v43 = vpop.f32.mrf.mxu1 }
 0x562   : > { %v3824_v1 = vpop.f32.mrf.mxu0 }
 0x563   : > { %v9417_v18 = vadd.f32 %v4014_v24, %v3824_v1  ;;  %v4458_v56 = vpop.f32.mrf.mxu1 }
 0x564   : > { %v3826_v51 = vpop.f32.mrf.mxu0 }
 0x565   : > { %v9419_v49 = vadd.f32 %v4016_v50, %v3826_v51  ;;  %v4460_v35 = vpop.f32.mrf.mxu1 }
 0x566   : > { %v3830_v26 = vpop.f32.mrf.mxu0 }
 0x567   : > { %v9421_v58 = vadd.f32 %v4020_v33, %v3830_v26  ;;  %v4462_v6 = vpop.f32.mrf.mxu1 }
 0x568   : > { %v3832_v44 = vpop.f32.mrf.mxu0 }
 0x569   : > { %v9423_v17 = vadd.f32 %v4022_v53, %v3832_v44  ;;  %v4466_v13 = vpop.f32.mrf.mxu1 }
 0x56a   : > { %v9425_v23 = vpop.f32.mrf.mxu0 }
 0x56b   : > { %v4468_v33 = vpop.f32.mrf.mxu1 }
 0x56c   : > { %v9427_v28 = vpop.f32.mrf.mxu0 }
 0x56e   : > { %v4183_v14 = vpop.f32.mrf.mxu0 }
 0x56f   : > { %v4262_v29 = vadd.f32 %v4183_v14, %v9351_v54 }
 0x570   : > { %v4185_v40 = vpop.f32.mrf.mxu0 }
 0x571   : > { %v4263_v48 = vadd.f32 %v4185_v40, %v9355_v42  ;;  %v9431_v36 = vadd.f32 %v4456_v43, %v4262_v29  ;;  %v4470_v42 = vpop.f32.mrf.mxu1 }
 0x572   : > { %v4187_v24 = vpop.f32.mrf.mxu0 }
 0x573   : > { %v4264_v50 = vadd.f32 %v4187_v24, %v9357_v4  ;;  %v9436_v16 = vadd.f32 %v4458_v56, %v4263_v48  ;;  %v3967_v4 = vadd.f32 %v9353_v19, %v9369_v30 }
 0x574   : > { %v4189_v61 = vpop.f32.mrf.mxu0 }
 0x575   : > { %v4265_v53 = vadd.f32 %v4189_v61, %v3957_v34  ;;  %v9438_v63 = vadd.f32 %v4460_v35, %v4264_v50  ;;  %v4472_v35 = vpop.f32.mrf.mxu1 }
 0x576   : > { %v4193_v54 = vpop.f32.mrf.mxu0 }
 0x577   : > { %v4266_v59 = vadd.f32 %v4193_v54, %v9361_v27  ;;  %v9441_v1 = vadd.f32 %v4462_v6, %v4265_v53 }
 0x578   : > { %v4195_v43 = vpop.f32.mrf.mxu0 }
 0x579   : > { %v4267_v51 = vadd.f32 %v4195_v43, %v9365_v12  ;;  %v9444_v26 = vadd.f32 %v4466_v13, %v4266_v59  ;;  %v4476_v12 = vpop.f32.mrf.mxu1 }
 0x57a   : > { %v4197_v46 = vpop.f32.mrf.mxu0 }
 0x57b   : > { %v4268_v25 = vadd.f32 %v4197_v46, %v9367_v32  ;;  %v9449_v56 = vadd.f32 %v4468_v33, %v4267_v51 }
 0x57c   : > { %v4199_v44 = vpop.f32.mrf.mxu0 }
 0x57d   : > { %v4269_v14 = vadd.f32 %v4199_v44, %v3967_v4  ;;  %v9451_v27 = vadd.f32 %v4470_v42, %v4268_v25 }
 0x57e   : > { %v4203_v6 = vpop.f32.mrf.mxu0 }
 0x57f   : > { %v4270_v29 = vadd.f32 %v4203_v6, %v9371_v8  ;;  %v9454_v40 = vadd.f32 %v4472_v35, %v4269_v14 }
 0x580   : > { %v4205_v13 = vpop.f32.mrf.mxu0 }
 0x581   : > { %v9457_v48 = vadd.f32 %v4205_v13, %v9375_v9  ;;  %v9459_v19 = vadd.f32 %v4476_v12, %v4270_v29 }
 0x582   : > { %v4207_v32 = vpop.f32.mrf.mxu0 }
 0x583   : > { %v9462_v30 = vadd.f32 %v4207_v32, %v9377_v47 }
 0x584   : > { %v9464_v24 = vpop.f32.mrf.mxu0 }
 0x586   : > { %v4213_v34 = vpop.f32.mrf.mxu0 }
 0x587   : > { %v9467_v50 = vadd.f32 %v4213_v34, %v9381_v37  ;;  %v9483_v37 = vpop.f32.mrf.mxu1 }
 0x588   : > { %v4215_v8 = vpop.f32.mrf.mxu0 }
 0x589   : > { %v9470_v33 = vadd.f32 %v4215_v8, %v9385_v62  ;;  %v3997_v62 = vadd.f32 %v9383_v55, %v9399_v60  ;;  %v9492_v4 = vpop.f32.mrf.mxu1  ;;  %v4007_v55 = vadd.f32 %v9393_v5, %v9407_v31 }
 0x58a   : > { %v4217_v61 = vpop.f32.mrf.mxu0 }
 0x58b   : > { %v9473_v9 = vadd.f32 %v4217_v61, %v9387_v0  ;;  %v9500_v44 = vpop.f32.mrf.mxu1 }
 0x58c   : > { %v9475_v53 = vpop.f32.mrf.mxu0 }
 0x58d   : > { %v9509_v29 = vpop.f32.mrf.mxu1 }
 0x58e   : > { %v4223_v54 = vpop.f32.mrf.mxu0 }
 0x58f   : > { %v9478_v47 = vadd.f32 %v4223_v54, %v9391_v21  ;;  %v9517_v32 = vpop.f32.mrf.mxu1 }
 0x590   : > { %v4225_v59 = vpop.f32.mrf.mxu0 }
 0x591   : > { %v9481_v42 = vadd.f32 %v4225_v59, %v9395_v20  ;;  %v9525_v8 = vpop.f32.mrf.mxu1 }
 0x592   : > { %v4227_v43 = vpop.f32.mrf.mxu0 }
 0x593   : > { %v9488_v51 = vadd.f32 %v4227_v43, %v9397_v15  ;;  %v9533_v59 = vpop.f32.mrf.mxu1 }
 0x594   : > { %v4229_v0 = vpop.f32.mrf.mxu0 }
 0x595   : > { %v9490_v46 = vadd.f32 %v4229_v0, %v3997_v62  ;;  %v9542_v62 = vpop.f32.mrf.mxu1 }
 0x596   : > { %v4233_v21 = vpop.f32.mrf.mxu0 }
 0x597   : > { %v9495_v25 = vadd.f32 %v4233_v21, %v9401_v11  ;;  %v10250_v21 = vld [vmem:[#allocation71_spill] sm:$0xff] }
 0x598   : > { %v4235_v20 = vpop.f32.mrf.mxu0 }
 0x599   : > { %v9498_v35 = vadd.f32 %v4235_v20, %v9403_v7  ;;  %v10251_v20 = vsub.s32 0, %v10250_v21 }
 0x59a   : > { %v4237_v14 = vpop.f32.mrf.mxu0 }
 0x59b   : > { %v9505_v15 = vadd.f32 %v4237_v14, %v9405_v22 }
 0x59c   : > { %v4239_v60 = vpop.f32.mrf.mxu0 }
 0x59d   : > { %v9507_v6 = vadd.f32 %v4239_v60, %v4007_v55  ;;  %v10252_v60 = vsub.s32 1, %v10250_v21 }
 0x59e   : > { %v4243_v11 = vpop.f32.mrf.mxu0 }
 0x59f   : > { %v9512_v12 = vadd.f32 %v4243_v11, %v9411_v38 }
 0x5a0   : > { %v4245_v7 = vpop.f32.mrf.mxu0 }
 0x5a1   : > { %v9515_v13 = vadd.f32 %v4245_v7, %v9415_v39  ;;  %v9554_v7 = vpop.f32.mrf.mxu1 }
 0x5a2   : > { %v4247_v34 = vpop.f32.mrf.mxu0 }
 0x5a3   : > { %v9520_v5 = vadd.f32 %v4247_v34, %v9417_v18  ;;  %v9561_v3 = vpop.f32.mrf.mxu1 }
 0x5a4   : > { %v4249_v22 = vpop.f32.mrf.mxu0 }
 0x5a5   : > { %v9523_v31 = vadd.f32 %v4249_v22, %v9419_v49  ;;  %v4824_v49 = vld [vmem:[%s10046_s8] sm:$0x3] }
 0x5a6   : > { %v4253_v61 = vpop.f32.mrf.mxu0  ;;  %v9547_v14 = vrot.slane %v4824_v49, %v10251_v20  ;;  %v9552_v11 = vrot.slane %v4824_v49, %v10252_v60 }
 0x5a7   : > { %v9528_v38 = vadd.f32 %v4253_v61, %v9421_v58 }
 0x5a8   : > { %v4255_v54 = vpop.f32.mrf.mxu0 }
 0x5a9   : > { %v9531_v39 = vadd.f32 %v4255_v54, %v9423_v17 }
 0x5aa   : > { %v9535_v43 = vpop.f32.mrf.mxu0 }
 0x5ab   : > { %10248 = vst [vmem:[#allocation39_spill] sm:$0xff] %v9531_v39 }
 0x5ac   : > { %v9537_v18 = vpop.f32.mrf.mxu0 }
 0x5ad   : > { %10249 = vst [vmem:[#allocation4_spill] sm:$0xff] %v9537_v18 }
 0x5ae   : > { %v4713_v0 = vpop.f32.mrf.mxu0 }
 0x5af   : > { %v4792_v58 = vadd.f32 %v4713_v0, %v9431_v36 }
 0x5b0   : > { %v4715_v17 = vpop.f32.mrf.mxu0 }
 0x5b1   : > { %v4793_v55 = vadd.f32 %v4715_v17, %v9436_v16  ;;  %v4836_v22 = vadd.f32 %v9547_v14, %v4792_v58 }
 0x5b2   : > { %v4717_v34 = vpop.f32.mrf.mxu0 }
 0x5b3   : > { %v4794_v61 = vadd.f32 %v4717_v34, %v9438_v63  ;;  %v4837_v36 = vadd.f32 %v9552_v11, %v4793_v55  ;;  %v4868_v21 = vmax.f32 %v4836_v22, 0.0  ;;  %v9568_v34 = vpop.f32.mrf.mxu1 }
 0x5b4   : > { %v4719_v54 = vpop.f32.mrf.mxu0 }
 0x5b5   : > { %v4838_v0 = vadd.f32 %v9547_v14, %v4794_v61  ;;  %v4795_v20 = vadd.f32 %v4719_v54, %v9441_v1  ;;  %v4869_v58 = vmax.f32 %v4837_v36, 0.0 }
 0x5b6   : > { %v4723_v16 = vpop.f32.mrf.mxu0 }
 0x5b7   : > { %v4870_v49 = vmax.f32 %v4838_v0, 0.0  ;;  %v4839_v17 = vadd.f32 %v9552_v11, %v4795_v20  ;;  %v4796_v60 = vadd.f32 %v4723_v16, %v9444_v26  ;;  %v3977_v0 = vadd.f32 %v9363_v41, %v9379_v52 }
 0x5b8   : > { %v4725_v39 = vpop.f32.mrf.mxu0 }
 0x5b9   : > { %v9565_v18 = vpack.c.bf16 %v4870_v49, %v4868_v21  ;;  %v4871_v63 = vmax.f32 %v4839_v17, 0.0  ;;  %v4797_v55 = vadd.f32 %v4725_v39, %v9449_v56  ;;  %v4840_v1 = vadd.f32 %v9547_v14, %v4796_v60  ;;  %v9580_v39 = vpop.f32.mrf.mxu1 }
 0x5ba   : > { %v4727_v61 = vpop.f32.mrf.mxu0  ;;  %v4273_v56 = vadd.f32 %v9464_v24, %v3977_v0 }
 0x5bb   : > { %v4798_v54 = vadd.f32 %v4727_v61, %v9451_v27  ;;  %v9572_v22 = vpack.c.bf16 %v4871_v63, %v4869_v58  ;;  %v4841_v36 = vadd.f32 %v9552_v11, %v4797_v55  ;;  %v4544_v27 = vadd.f32 %v9483_v37, %v9457_v48  ;;  %v9590_v61 = vpop.f32.mrf.mxu1 }
 0x5bc   : > { %v4729_v26 = vpop.f32.mrf.mxu0  ;;  %v4872_v49 = vmax.f32 %v4840_v1, 0.0  ;;  %v4545_v58 = vadd.f32 %v9492_v4, %v9462_v30  ;;  %v4546_v1 = vadd.f32 %v9500_v44, %v4273_v56  ;;  %v4548_v44 = vadd.f32 %v9517_v32, %v9470_v33 }
 0x5bd   : > { %v4842_v20 = vadd.f32 %v9547_v14, %v4798_v54  ;;  %v4799_v16 = vadd.f32 %v4729_v26, %v9454_v40  ;;  %v4873_v63 = vmax.f32 %v4841_v36, 0.0 }
 0x5be   : > { %v4733_v21 = vpop.f32.mrf.mxu0 }
 0x5bf   : > { %v4874_v17 = vmax.f32 %v4842_v20, 0.0  ;;  %v4843_v60 = vadd.f32 %v9552_v11, %v4799_v16  ;;  %v4800_v41 = vadd.f32 %v4733_v21, %v9459_v19  ;;  %v3987_v19 = vadd.f32 %v9373_v45, %v9389_v2  ;;  %v4510_v21 = vpop.f32.mrf.mxu1 }
 0x5c0   : > { %v4735_v52 = vpop.f32.mrf.mxu0  ;;  %v4547_v20 = vadd.f32 %v9509_v29, %v9467_v50 }
 0x5c1   : > { %v9588_v40 = vpack.c.bf16 %v4874_v17, %v4872_v49  ;;  %v4875_v24 = vmax.f32 %v4843_v60, 0.0  ;;  %v4801_v55 = vadd.f32 %v4735_v52, %v4544_v27  ;;  %v4844_v48 = vadd.f32 %v9547_v14, %v4800_v41 }
 0x5c2   : > { %v4737_v54 = vpop.f32.mrf.mxu0  ;;  %v4277_v16 = vadd.f32 %v9475_v53, %v3987_v19  ;;  %v4549_v60 = vadd.f32 %v9525_v8, %v9473_v9  ;;  %v4512_v53 = vpop.f32.mrf.mxu1  ;;  %v4551_v8 = vadd.f32 %v9542_v62, %v9478_v47  ;;  %v4552_v19 = vadd.f32 %v9554_v7, %v9481_v42 }
 0x5c3   : > { %v4802_v37 = vadd.f32 %v4737_v54, %v4545_v58  ;;  %v9594_v0 = vpack.c.bf16 %v4875_v24, %v4873_v63  ;;  %v4845_v30 = vadd.f32 %v9552_v11, %v4801_v55  ;;  %v4876_v56 = vmax.f32 %v4844_v48, 0.0 }
 0x5c4   : > { %v4739_v26 = vpop.f32.mrf.mxu0  ;;  %v4550_v33 = vadd.f32 %v9533_v59, %v4277_v16  ;;  %v4554_v42 = vadd.f32 %v9568_v34, %v9490_v46 }
 0x5c5   : > { %v4846_v4 = vadd.f32 %v9547_v14, %v4802_v37  ;;  %v4803_v36 = vadd.f32 %v4739_v26, %v4546_v1  ;;  %v4877_v41 = vmax.f32 %v4845_v30, 0.0  ;;  %v4516_v37 = vpop.f32.mrf.mxu1 }
 0x5c6   : > { %v4743_v27 = vpop.f32.mrf.mxu0 }
 0x5c7   : > { %v4878_v49 = vmax.f32 %v4846_v4, 0.0  ;;  %v4847_v45 = vadd.f32 %v9552_v11, %v4803_v36  ;;  %v4804_v2 = vadd.f32 %v4743_v27, %v4547_v20  ;;  %v4553_v20 = vadd.f32 %v9561_v3, %v9488_v51  ;;  %v4518_v47 = vpop.f32.mrf.mxu1 }
 0x5c8   : > { %v4745_v17 = vpop.f32.mrf.mxu0 }
 0x5c9   : > { %v9608_v52 = vpack.c.bf16 %v4878_v49, %v4876_v56  ;;  %v4879_v50 = vmax.f32 %v4847_v45, 0.0  ;;  %v4805_v29 = vadd.f32 %v4745_v17, %v4548_v44  ;;  %v4848_v63 = vadd.f32 %v9547_v14, %v4804_v2 }
 0x5ca   : > { %v4747_v58 = vpop.f32.mrf.mxu0 }
 0x5cb   : > { %v4806_v24 = vadd.f32 %v4747_v58, %v4549_v60  ;;  %v9612_v32 = vpack.c.bf16 %v4879_v50, %v4877_v41  ;;  %v4849_v54 = vadd.f32 %v9552_v11, %v4805_v29  ;;  %v4880_v26 = vmax.f32 %v4848_v63, 0.0  ;;  %v4520_v41 = vpop.f32.mrf.mxu1 }
 0x5cc   : > { %v4749_v55 = vpop.f32.mrf.mxu0  ;;  %v4555_v60 = vadd.f32 %v9580_v39, %v9495_v25  ;;  %v4556_v29 = vadd.f32 %v9590_v61, %v9498_v35  ;;  %v4558_v35 = vadd.f32 %v4512_v53, %v9507_v6  ;;  %v4561_v53 = vadd.f32 %v4520_v41, %v9520_v5 }
 0x5cd   : > { %v4850_v48 = vadd.f32 %v9547_v14, %v4806_v24  ;;  %v4807_v9 = vadd.f32 %v4749_v55, %v4550_v33  ;;  %v4881_v16 = vmax.f32 %v4849_v54, 0.0  ;;  %v4557_v33 = vadd.f32 %v4510_v21, %v9505_v15 }
 0x5ce   : > { %v4753_v1 = vpop.f32.mrf.mxu0  ;;  %v4559_v21 = vadd.f32 %v4516_v37, %v9512_v12  ;;  %v4025_v12 = vadd.f32 %v9409_v57, %v9425_v23  ;;  %v4027_v5 = vadd.f32 %v9413_v10, %v9427_v28 }
 0x5cf   : > { %v4882_v30 = vmax.f32 %v4850_v48, 0.0  ;;  %v4851_v59 = vadd.f32 %v9552_v11, %v4807_v9  ;;  %v4808_v4 = vadd.f32 %v4753_v1, %v4551_v8  ;;  %v4522_v8 = vpop.f32.mrf.mxu1 }
 0x5d0   : > { %v4755_v36 = vpop.f32.mrf.mxu0 }
 0x5d1   : > { %v9623_v27 = vpack.c.bf16 %v4882_v30, %v4880_v26  ;;  %v4883_v44 = vmax.f32 %v4851_v59, 0.0  ;;  %v4809_v56 = vadd.f32 %v4755_v36, %v4552_v19  ;;  %v4852_v49 = vadd.f32 %v9547_v14, %v4808_v4  ;;  %v4526_v59 = vpop.f32.mrf.mxu1 }
 0x5d2   : > { %v4757_v62 = vpop.f32.mrf.mxu0  ;;  %v4560_v36 = vadd.f32 %v4518_v47, %v9515_v13  ;;  %v4563_v23 = vadd.f32 %v4526_v59, %v9528_v38 }
 0x5d3   : > { %v4810_v45 = vadd.f32 %v4757_v62, %v4553_v20  ;;  %v9628_v7 = vpack.c.bf16 %v4883_v44, %v4881_v16  ;;  %v4853_v17 = vadd.f32 %v9552_v11, %v4809_v56  ;;  %v4884_v58 = vmax.f32 %v4852_v49, 0.0  ;;  %v4528_v37 = vpop.f32.mrf.mxu1 }
 0x5d4   : > { %v4759_v2 = vpop.f32.mrf.mxu0 }
 0x5d5   : > { %v4854_v3 = vadd.f32 %v9547_v14, %v4810_v45  ;;  %v4811_v51 = vadd.f32 %v4759_v2, %v4554_v42  ;;  %v4885_v55 = vmax.f32 %v4853_v17, 0.0  ;;  %v4562_v17 = vadd.f32 %v4522_v8, %v9523_v31  ;;  %v10254_v31 = vld [vmem:[#allocation39_spill] sm:$0xff] }
 0x5d6   : > { %v4763_v50 = vpop.f32.mrf.mxu0 }
 0x5d7   : > { %v4886_v63 = vmax.f32 %v4854_v3, 0.0  ;;  %v4855_v46 = vadd.f32 %v9552_v11, %v4811_v51  ;;  %v4812_v34 = vadd.f32 %v4763_v50, %v4555_v60  ;;  %v4292_v51 = vadd.f32 %v9535_v43, %v4025_v12  ;;  %v7171_v12 = vld [vmem:[%s10050_s12 + $0x20] sm:$0xff]  }
 0x5d8   : > { %v4765_v24 = vpop.f32.mrf.mxu0 }
 0x5d9   : > { %v9638_v54 = vpack.c.bf16 %v4886_v63, %v4884_v58  ;;  %v4887_v48 = vmax.f32 %v4855_v46, 0.0  ;;  %v4813_v9 = vadd.f32 %v4765_v24, %v4556_v29  ;;  %v4856_v39 = vadd.f32 %v9547_v14, %v4812_v34  ;;  %v4530_v29 = vpop.f32.mrf.mxu1  ;;  %v10253_v58 = vld [vmem:[#allocation4_spill] sm:$0xff] }
 0x5da   : > { %v4767_v25 = vpop.f32.mrf.mxu0  ;;  %v4293_v63 = vadd.f32 %v10253_v58, %v4027_v5  ;;  %v4564_v34 = vadd.f32 %v4528_v37, %v10254_v31  ;;  %v7172_v37 = vld [vmem:[%s10049_s11 + $0x18] sm:$0xff]   ;;  %v7178_v5 = vld [vmem:[%s10049_s11] sm:$0xff]  }
 0x5db   : > { %v4814_v1 = vadd.f32 %v4767_v25, %v4557_v33  ;;  %v9642_v61 = vpack.c.bf16 %v4887_v48, %v4885_v55  ;;  %v4857_v26 = vadd.f32 %v9552_v11, %v4813_v9  ;;  %v4888_v20 = vmax.f32 %v4856_v39, 0.0  ;;  %v4532_v39 = vpop.f32.mrf.mxu1 }
 0x5dc   : > { %v4769_v19 = vpop.f32.mrf.mxu0  ;;  %v4565_v55 = vadd.f32 %v4530_v29, %v4292_v51  ;;  %v7179_v51 = vld [vmem:[%s10050_s12] sm:$0xff]  }
 0x5dd   : > { %v4858_v30 = vadd.f32 %v9547_v14, %v4814_v1  ;;  %v4815_v15 = vadd.f32 %v4769_v19, %v4558_v35  ;;  %v4889_v62 = vmax.f32 %v4857_v26, 0.0  ;;  %v4566_v19 = vadd.f32 %v4532_v39, %v4293_v63 }
 0x5de   : > { %v4773_v4 = vpop.f32.mrf.mxu0 }
 0x5df   : > { %v4890_v16 = vmax.f32 %v4858_v30, 0.0  ;;  %v4859_v44 = vadd.f32 %v9552_v11, %v4815_v15  ;;  %v4816_v56 = vadd.f32 %v4773_v4, %v4559_v21 }
 0x5e0   : > { %v4775_v6 = vpop.f32.mrf.mxu0 }
 0x5e1   : > { %v9650_v49 = vpack.c.bf16 %v4890_v16, %v4888_v20  ;;  %v4891_v45 = vmax.f32 %v4859_v44, 0.0  ;;  %v4817_v42 = vadd.f32 %v4775_v6, %v4560_v36  ;;  %v4860_v13 = vadd.f32 %v9547_v14, %v4816_v56 }
 0x5e2   : > { %v4777_v2 = vpop.f32.mrf.mxu0 }
 0x5e3   : > { %v4818_v47 = vadd.f32 %v4777_v2, %v4561_v53  ;;  %v9656_v3 = vpack.c.bf16 %v4891_v45, %v4889_v62  ;;  %v4861_v41 = vadd.f32 %v9552_v11, %v4817_v42  ;;  %v4892_v24 = vmax.f32 %v4860_v13, 0.0  ;;  %v7157_v62 = vld [vmem:[%s10047_s9 + $0x8] sm:$0xff]   ;;  %v7158_v45 = vld [vmem:[%s10047_s9 + $0x10] sm:$0xff]   ;;  %v7170_v42 = vld [vmem:[%s10049_s11 + $0x20] sm:$0xff]  }
 0x5e4   : > { %v4779_v60 = vpop.f32.mrf.mxu0  ;;  %v7173_v2 = vld [vmem:[%s10050_s12 + $0x18] sm:$0xff]   ;;  %v7174_v13 = vld [vmem:[%s10049_s11 + $0x10] sm:$0xff]  }
 0x5e5   : > { %v4862_v50 = vadd.f32 %v9547_v14, %v4818_v47  ;;  %v4819_v57 = vadd.f32 %v4779_v60, %v4562_v17  ;;  %v4893_v48 = vmax.f32 %v4861_v41, 0.0  ;;  %v7175_v47 = vld [vmem:[%s10050_s12 + $0x10] sm:$0xff]   ;;  %v7176_v17 = vld [vmem:[%s10049_s11 + $0x8] sm:$0xff]  }
 0x5e6   : > { %v4783_v46 = vpop.f32.mrf.mxu0  ;;  %v7180_v60 = vld [vmem:[%s10049_s11 + $0x48] sm:$0xff]  }
 0x5e7   : > { %v4894_v33 = vmax.f32 %v4862_v50, 0.0  ;;  %v4863_v10 = vadd.f32 %v9552_v11, %v4819_v57  ;;  %v4820_v28 = vadd.f32 %v4783_v46, %v4563_v23  ;;  %v7181_v41 = vld [vmem:[%s10050_s12 + $0x48] sm:$0xff]   ;;  %v7182_v50 = vld [vmem:[%s10049_s11 + $0x40] sm:$0xff]  }
 0x5e8   : > { %v4785_v43 = vpop.f32.mrf.mxu0  ;;  %v7183_v57 = vld [vmem:[%s10050_s12 + $0x40] sm:$0xff]  }
 0x5e9   : > { %v4912_v9 = vpack.c.bf16 %v4894_v33, %v4892_v24  ;;  %v4895_v8 = vmax.f32 %v4863_v10, 0.0  ;;  %v4821_v25 = vadd.f32 %v4785_v43, %v4564_v34  ;;  %v4864_v38 = vadd.f32 %v9547_v14, %v4820_v28 }
 0x5ea   : > { %v4787_v1 = vpop.f32.mrf.mxu0 }
 0x5eb   : > { %v4822_v35 = vadd.f32 %v4787_v1, %v4565_v55  ;;  %v4913_v26 = vpack.c.bf16 %v4895_v8, %v4893_v48  ;;  %v4865_v15 = vadd.f32 %v9552_v11, %v4821_v25  ;;  %v4896_v4 = vmax.f32 %v4864_v38, 0.0 }
 0x5ec   : > { %v4789_v30 = vpop.f32.mrf.mxu0 }
 0x5ed   : > { %v4866_v21 = vadd.f32 %v9547_v14, %v4822_v35  ;;  %v4823_v59 = vadd.f32 %v4789_v30, %v4566_v19  ;;  %v4897_v16 = vmax.f32 %v4865_v15, 0.0  ;;  %v7156_v14 = vld [vmem:[%s10047_s9] sm:$0xff]  }
 0x5ef   : > { %v4898_v36 = vmax.f32 %v4866_v21, 0.0  ;;  %v4867_v20 = vadd.f32 %v9552_v11, %v4823_v59  ;;  %v10255_v11 = vmov 0  }
 0x5f1   : > { %v4914_v44 = vpack.c.bf16 %v4898_v36, %v4896_v4  ;;  %v4899_v56 = vmax.f32 %v4867_v20, 0.0 }
 0x5f3   : > { %v4915_v6 = vpack.c.bf16 %v4899_v56, %v4897_v16  ;;  %v4957_v53 = vsel %vm2100_vm4, %v4914_v44, 0 }
 0x5f5   : > { %6642 = vmatprep.subr.msk.bf16.mxu1 %vm2100_vm4, %v4915_v6 }
 0x5f6   : > { %4963 = vmatpush1.bf16.msra.mxu1 %v4957_v53 }
 0x5f7   : > { %4964 = vmatprep.subr.bf16.mxu1 %v4913_v26 }
 0x5fa   : > { %4965 = vmatpush1.bf16.msra.mxu1 %v4912_v9 }
 0x5fb   : > { %4966 = vmatprep.subr.bf16.mxu1 %v9656_v3 }
 0x5fe   : > { %4967 = vmatpush1.bf16.msra.mxu1 %v9650_v49 }
 0x5ff   : > { %4968 = vmatprep.subr.bf16.mxu1 %v9642_v61 }
 0x602   : > { %4969 = vmatpush1.bf16.msra.mxu1 %v9638_v54 }
 0x603   : > { %4970 = vmatprep.subr.bf16.mxu1 %v9628_v7 }
 0x606   : > { %4971 = vmatpush1.bf16.msra.mxu1 %v9623_v27 }
 0x607   : > { %4972 = vmatprep.subr.bf16.mxu1 %v9612_v32 }
 0x60a   : > { %4973 = vmatpush1.bf16.msra.mxu1 %v9608_v52 }
 0x60b   : > { %4974 = vmatprep.subr.bf16.mxu1 %v9594_v0 }
 0x60e   : > { %4975 = vmatpush1.bf16.msra.mxu1 %v9588_v40 }
 0x60f   : > { %4976 = vmatprep.subr.bf16.mxu1 %v9572_v22 }
 0x612   : > { %4977 = vmatpush1.bf16.msra.mxu1 %v9565_v18 }
 0x613   : > { %6651 = vmatprep.subr.msk.bf16.mxu1 %vm2100_vm4, %v4915_v6 }
 0x615   : > { %6643 = vmatmul.mubr.msk.bf16.vlgmr.msra.gmra.mxu1 %vm2717_vm5, %v7156_v14 }
 0x616   : > { %5076 = vmatpush1.bf16.msra.mxu1 %v4957_v53  ;;  %5004 = vmatprep.mubr.bf16.mxu1 %v10255_v11 }
 0x617   : > { %5077 = vmatprep.subr.bf16.mxu1 %v4913_v26 }
 0x61a   : > { %5078 = vmatpush1.bf16.msra.mxu1 %v4912_v9 }
 0x61b   : > { %5079 = vmatprep.subr.bf16.mxu1 %v9656_v3  ;;  %v7177_v3 = vld [vmem:[%s10050_s12 + $0x8] sm:$0xff]  }
 0x61d   : > { %6644 = vmatmul.mubr.msk.bf16.gmra.mxu1 %vm2717_vm5, %v7157_v62 }
 0x61e   : > { %5080 = vmatpush1.bf16.msra.mxu1 %v9650_v49  ;;  %5014 = vmatprep.mubr.bf16.mxu1 %v10255_v11  ;;  %v7169_v49 = vld [vmem:[%s10050_s12 + $0x28] sm:$0xff]  }
 0x61f   : > { %5081 = vmatprep.subr.bf16.mxu1 %v9642_v61  ;;  %v7159_v61 = vld [vmem:[%s10047_s9 + $0x18] sm:$0xff]  }
 0x622   : > { %5082 = vmatpush1.bf16.msra.mxu1 %v9638_v54  ;;  %v7168_v54 = vld [vmem:[%s10049_s11 + $0x28] sm:$0xff]  }
 0x623   : > { %5083 = vmatprep.subr.bf16.mxu1 %v9628_v7  ;;  %v7167_v7 = vld [vmem:[%s10050_s12 + $0x30] sm:$0xff]  }
 0x625   : > { %6645 = vmatmul.mubr.msk.bf16.gmra.mxu1 %vm2717_vm5, %v7158_v45 }
 0x626   : > { %5084 = vmatpush1.bf16.msra.mxu1 %v9623_v27  ;;  %5024 = vmatprep.mubr.bf16.mxu1 %v10255_v11  ;;  %v7166_v27 = vld [vmem:[%s10049_s11 + $0x30] sm:$0xff]  }
 0x627   : > { %5085 = vmatprep.subr.bf16.mxu1 %v9612_v32  ;;  %v7160_v32 = vld [vmem:[%s10048_s10] sm:$0xff]  }
 0x62a   : > { %5086 = vmatpush1.bf16.msra.mxu1 %v9608_v52  ;;  %v7165_v52 = vld [vmem:[%s10050_s12 + $0x38] sm:$0xff]  }
 0x62b   : > { %5087 = vmatprep.subr.bf16.mxu1 %v9594_v0  ;;  %v7164_v0 = vld [vmem:[%s10049_s11 + $0x38] sm:$0xff]  }
 0x62c   : > { %5265 = vmatpush1.bf16.msra.mxu0 %v7164_v0 }
 0x62d   : > { %6646 = vmatmul.mubr.msk.bf16.gmra.mxu1 %vm2717_vm5, %v7159_v61  ;;  %5266 = vmatprep.subr.bf16.mxu0 %v10255_v11 }
 0x62e   : > { %5088 = vmatpush1.bf16.msra.mxu1 %v9588_v40  ;;  %5107 = vmatprep.mubr.bf16.mxu1 %v10255_v11  ;;  %v7161_v40 = vld [vmem:[%s10048_s10 + $0x8] sm:$0xff]  }
 0x62f   : > { %5089 = vmatprep.subr.bf16.mxu1 %v9572_v22  ;;  %v7162_v22 = vld [vmem:[%s10048_s10 + $0x10] sm:$0xff]  }
 0x630   : > { %5267 = vmatpush1.bf16.msra.mxu0 %v7166_v27 }
 0x631   : > { %5268 = vmatprep.subr.bf16.mxu0 %v10255_v11 }
 0x632   : > { %5090 = vmatpush1.bf16.msra.mxu1 %v9565_v18  ;;  %v7163_v18 = vld [vmem:[%s10048_s10 + $0x18] sm:$0xff]  }
 0x633   : > { %5409 = vmatprep.subr.bf16.mxu1 %v10255_v11 }
 0x634   : > { %5269 = vmatpush1.bf16.msra.mxu0 %v7168_v54 }
 0x635   : > { %6652 = vmatmul.mubr.msk.bf16.vlgmr.msra.gmra.mxu1 %vm2717_vm5, %v7160_v32  ;;  %5270 = vmatprep.subr.bf16.mxu0 %v10255_v11 }
 0x636   : > { %5117 = vmatprep.mubr.bf16.mxu1 %v10255_v11  ;;  %5410 = vmatpush1.bf16.msra.mxu1 %v7165_v52 }
 0x637   : > { %5411 = vmatprep.subr.bf16.mxu1 %v10255_v11 }
 0x638   : > { %5271 = vmatpush1.bf16.msra.mxu0 %v7170_v42 }
 0x639   : > { %5272 = vmatprep.subr.bf16.mxu0 %v10255_v11 }
 0x63a   : > { %5412 = vmatpush1.bf16.msra.mxu1 %v7167_v7 }
 0x63b   : > { %5413 = vmatprep.subr.bf16.mxu1 %v10255_v11 }
 0x63c   : > { %5273 = vmatpush1.bf16.msra.mxu0 %v7172_v37 }
 0x63d   : > { %6653 = vmatmul.mubr.msk.bf16.gmra.mxu1 %vm2717_vm5, %v7161_v40  ;;  %5274 = vmatprep.subr.bf16.mxu0 %v10255_v11 }
 0x63e   : > { %5127 = vmatprep.mubr.bf16.mxu1 %v10255_v11  ;;  %5414 = vmatpush1.bf16.msra.mxu1 %v7169_v49 }
 0x63f   : > { %5415 = vmatprep.subr.bf16.mxu1 %v10255_v11 }
 0x640   : > { %5275 = vmatpush1.bf16.msra.mxu0 %v7174_v13 }
 0x641   : > { %5276 = vmatprep.subr.bf16.mxu0 %v10255_v11 }
 0x642   : > { %5416 = vmatpush1.bf16.msra.mxu1 %v7171_v12 }
 0x643   : > { %5417 = vmatprep.subr.bf16.mxu1 %v10255_v11 }
 0x644   : > { %5277 = vmatpush1.bf16.msra.mxu0 %v7176_v17  ;;  %v7235_v17 = vmov 0.0  }
 0x645   : > { %6654 = vmatmul.mubr.msk.bf16.gmra.mxu1 %vm2717_vm5, %v7162_v22  ;;  %5278 = vmatprep.subr.bf16.mxu0 %v10255_v11 }
 0x646   : > { %5137 = vmatprep.mubr.bf16.mxu1 %v10255_v11  ;;  %5418 = vmatpush1.bf16.msra.mxu1 %v7173_v2 }
 0x647   : > { %5419 = vmatprep.subr.bf16.mxu1 %v10255_v11 }
 0x648   : > { %5279 = vmatpush1.bf16.msra.mxu0 %v7178_v5  ;;  %v7188_v5 = vld [vmem:[%s10052_s14 + $0x40] sm:$0xff]  }
 0x649   : > { %5292 = vmatprep.subr.bf16.mxu0 %v10255_v11 }
 0x64a   : > { %5420 = vmatpush1.bf16.msra.mxu1 %v7175_v47 }
 0x64b   : > { %5421 = vmatprep.subr.bf16.mxu1 %v10255_v11 }
 0x64c   : > { %5293 = vmatpush2.bf16.msra.mxu0 %v7180_v60 }
 0x64d   : > { %6655 = vmatmul.mubr.msk.bf16.gmra.mxu1 %vm2717_vm5, %v7163_v18  ;;  %5294 = vmatprep.subr.bf16.mxu0 %v10255_v11 }
 0x64e   : > { %5422 = vmatpush1.bf16.msra.mxu1 %v7177_v3  ;;  %v7187_v3 = vld [vmem:[%s10052_s14 + $0x48] sm:$0xff]  }
 0x64f   : > { %5423 = vmatprep.subr.bf16.mxu1 %v10255_v11 }
 0x650   : > { %5295 = vmatpush2.bf16.msra.mxu0 %v7182_v50 }
 0x651   : > { %6834 = vmatprep.subr.bf16.mxu0 %v7235_v17 }
 0x652   : > { %5424 = vmatpush1.bf16.msra.mxu1 %v7179_v51  ;;  %v7189_v51 = vld [vmem:[%s10052_s14 + $0x38] sm:$0xff]  }
 0x653   : > { %5437 = vmatprep.subr.bf16.mxu1 %v10255_v11 }
 0x656   : > { %5438 = vmatpush2.bf16.msra.mxu1 %v7181_v41 }
 0x657   : > { %5439 = vmatprep.subr.bf16.mxu1 %v10255_v11 }
 0x65a   : > { %5440 = vmatpush2.bf16.msra.mxu1 %v7183_v57 }
 0x65b   : > { %6854 = vmatprep.subr.bf16.mxu1 %v7235_v17 }
 0x6d5   : > { %v4996_v23 = vpop.f32.mrf.mxu1 }
 0x6d7   : > { %v4998_v29 = vpop.f32.mrf.mxu1 }
 0x6d9   : > { %v5000_v58 = vpop.f32.mrf.mxu1 }
 0x6db   : > { %v5002_v63 = vpop.f32.mrf.mxu1 }
 0x6dd   : > { %v5006_v46 = vpop.f32.mrf.mxu1 }
 0x6df   : > { %v5008_v31 = vpop.f32.mrf.mxu1 }
 0x6e1   : > { %v5010_v34 = vpop.f32.mrf.mxu1 }
 0x6e3   : > { %v5012_v24 = vpop.f32.mrf.mxu1 }
 0x6e5   : > { %v5016_v33 = vpop.f32.mrf.mxu1 }
 0x6e7   : > { %v5018_v10 = vpop.f32.mrf.mxu1 }
 0x6e9   : > { %v5020_v28 = vpop.f32.mrf.mxu1 }
 0x6eb   : > { %v5022_v43 = vpop.f32.mrf.mxu1 }
 0x6ed   : > { %v5026_v55 = vpop.f32.mrf.mxu1 }
 0x6ef   : > { %v5028_v48 = vpop.f32.mrf.mxu1 }
 0x6f1   : > { %v5030_v9 = vpop.f32.mrf.mxu1 }
 0x6f3   : > { %v5032_v8 = vpop.f32.mrf.mxu1 }
 0x6f5   : > { %v5109_v25 = vpop.f32.mrf.mxu1 }
 0x6f6   : > { %v5148_v30 = vmax.f32 %v4996_v23, %v5109_v25 }
 0x6f7   : > { %v5111_v39 = vpop.f32.mrf.mxu1 }
 0x6f8   : > { %v5149_v19 = vmax.f32 %v4998_v29, %v5111_v39 }
 0x6f9   : > { %v5113_v1 = vpop.f32.mrf.mxu1 }
 0x6fa   : > { %v5150_v38 = vmax.f32 %v5000_v58, %v5113_v1 }
 0x6fb   : > { %v5115_v35 = vpop.f32.mrf.mxu1 }
 0x6fc   : > { %v5151_v26 = vmax.f32 %v5002_v63, %v5115_v35  ;;  %v5164_v59 = vpack.c.bf16 %v5150_v38, %v5148_v30 }
 0x6fd   : > { %v5119_v15 = vpop.f32.mrf.mxu1 }
 0x6fe   : > { %v5165_v21 = vpack.c.bf16 %v5151_v26, %v5149_v19  ;;  %v5152_v6 = vmax.f32 %v5006_v46, %v5119_v15 }
 0x6ff   : > { %v5121_v4 = vpop.f32.mrf.mxu1 }
 0x700   : > { %6666 = vmatprep.mubr.msk.bf16.mxu0 %vm836_vm0, %v5165_v21  ;;  %6680 = vmatprep.mubr.msk.bf16.mxu1 %vm836_vm0, %v5165_v21  ;;  %v5153_v44 = vmax.f32 %v5008_v31, %v5121_v4 }
 0x701   : > { %v5123_v36 = vpop.f32.mrf.mxu1  ;;  %5297 = vmatmul.mubr.bf16.vlgmr.msra.gmra.mxu0 %v5164_v59  ;;  %5442 = vmatmul.mubr.bf16.vlgmr.msra.gmra.mxu1 %v5164_v59 }
 0x702   : > { %v5154_v20 = vmax.f32 %v5010_v34, %v5123_v36  ;;  %6855 = vmatpush3.bf16.msra.mxu1 %v7187_v3 }
 0x703   : > { %v5125_v16 = vpop.f32.mrf.mxu1  ;;  %6856 = vmatprep.subr.bf16.mxu1 %v7235_v17 }
 0x704   : > { %v5155_v56 = vmax.f32 %v5012_v24, %v5125_v16  ;;  %v5166_v11 = vpack.c.bf16 %v5154_v20, %v5152_v6 }
 0x705   : > { %v5129_v53 = vpop.f32.mrf.mxu1 }
 0x706   : > { %v5167_v14 = vpack.c.bf16 %v5155_v56, %v5153_v44  ;;  %v5156_v18 = vmax.f32 %v5016_v33, %v5129_v53  ;;  %6857 = vmatpush3.bf16.msra.mxu1 %v7188_v5 }
 0x707   : > { %v5131_v62 = vpop.f32.mrf.mxu1  ;;  %6858 = vmatprep.subr.bf16.mxu1 %v7235_v17 }
 0x708   : > { %6667 = vmatprep.mubr.msk.bf16.mxu0 %vm836_vm0, %v5167_v14  ;;  %6681 = vmatprep.mubr.msk.bf16.mxu1 %vm836_vm0, %v5167_v14  ;;  %v5157_v40 = vmax.f32 %v5018_v10, %v5131_v62 }
 0x709   : > { %v5133_v45 = vpop.f32.mrf.mxu1  ;;  %5305 = vmatmul.mubr.bf16.gmra.mxu0 %v5166_v11  ;;  %5450 = vmatmul.mubr.bf16.gmra.mxu1 %v5166_v11 }
 0x70a   : > { %v5158_v61 = vmax.f32 %v5020_v28, %v5133_v45  ;;  %6859 = vmatpush3.bf16.msra.mxu1 %v7189_v51 }
 0x70b   : > { %v5135_v32 = vpop.f32.mrf.mxu1  ;;  %6860 = vmatprep.subr.bf16.mxu1 %v7235_v17 }
 0x70c   : > { %v5159_v22 = vmax.f32 %v5022_v43, %v5135_v32  ;;  %v5168_v27 = vpack.c.bf16 %v5158_v61, %v5156_v18  ;;  %v7184_v32 = vld [vmem:[%s10051_s13] sm:$0xff]  }
 0x70d   : > { %v5139_v0 = vpop.f32.mrf.mxu1  ;;  %v7191_v18 = vld [vmem:[%s10052_s14 + $0x20] sm:$0xff]  }
 0x70e   : > { %v5169_v52 = vpack.c.bf16 %v5159_v22, %v5157_v40  ;;  %v5160_v2 = vmax.f32 %v5026_v55, %v5139_v0  ;;  %v7185_v40 = vld [vmem:[%s10051_s13 + $0x8] sm:$0xff]   ;;  %v7186_v22 = vld [vmem:[%s10051_s13 + $0x10] ss:$0 sps:$4 sm:$0xff]   ;;  %v7193_v0 = vld [vmem:[%s10052_s14 + $0x18] sm:$0xff]  }
 0x70f   : > { %v5141_v7 = vpop.f32.mrf.mxu1 }
 0x710   : > { %6668 = vmatprep.mubr.msk.bf16.mxu0 %vm836_vm0, %v5169_v52  ;;  %6682 = vmatprep.mubr.msk.bf16.mxu1 %vm836_vm0, %v5169_v52  ;;  %v5161_v12 = vmax.f32 %v5028_v48, %v5141_v7  ;;  %v7194_v52 = vld [vmem:[%s10052_s14 + $0x10] sm:$0xff]  }
 0x711   : > { %v5143_v54 = vpop.f32.mrf.mxu1  ;;  %5313 = vmatmul.mubr.bf16.gmra.mxu0 %v5168_v27  ;;  %5458 = vmatmul.mubr.bf16.gmra.mxu1 %v5168_v27  ;;  %v7196_v27 = vld [vmem:[%s10052_s14 + $0x8] sm:$0xff]   ;;  %v7190_v7 = vld [vmem:[%s10052_s14 + $0x30] sm:$0xff]  }
 0x712   : > { %v5162_v49 = vmax.f32 %v5030_v9, %v5143_v54  ;;  %6861 = vmatpush3.bf16.msra.mxu1 %v7190_v7  ;;  %v7198_v54 = vld [vmem:[%s10052_s14] sm:$0xff]  }
 0x713   : > { %v5145_v42 = vpop.f32.mrf.mxu1  ;;  %6862 = vmatprep.subr.bf16.mxu1 %v7235_v17 }
 0x714   : > { %v5163_v37 = vmax.f32 %v5032_v8, %v5145_v42  ;;  %v5170_v47 = vpack.c.bf16 %v5162_v49, %v5160_v2  ;;  %v7192_v49 = vld [vmem:[%s10052_s14 + $0x28] sm:$0xff]   ;;  %v7201_v2 = vld [vmem:[%s10052_s14 + $0x98] sm:$0xff]  }
 0x716   : > { %v5171_v13 = vpack.c.bf16 %v5163_v37, %v5161_v12  ;;  %6863 = vmatpush3.bf16.msra.mxu1 %v7192_v49 }
 0x717   : > { %6882 = vmatprep.subr.bf16.mxu1 %v7235_v17 }
 0x718   : > { %6669 = vmatprep.mubr.msk.bf16.mxu0 %vm836_vm0, %v5171_v13  ;;  %6683 = vmatprep.mubr.msk.bf16.mxu1 %vm836_vm0, %v5171_v13 }
 0x719   : > { %5321 = vmatmul.mubr.bf16.gmra.mxu0 %v5170_v47  ;;  %5466 = vmatmul.mubr.bf16.gmra.mxu1 %v5170_v47  ;;  %v7195_v47 = vld [vmem:[%s10052_s14 + $0x70] sm:$0xff]  }
 0x71a   : > { %6842 = vmatprep.mubr.msk.bf16.mxu0 %vm7236_vm10, %v7235_v17  ;;  %6864 = vmatprep.mubr.msk.bf16.mxu1 %vm7236_vm10, %v7235_v17 }
 0x7c1   : > { %v5298_v60 = vpop.f32.mrf.mxu0  ;;  %v5443_v41 = vpop.f32.mrf.mxu1 }
 0x7c2   : > { %v5474_v45 = vmax.f32 %v5298_v60, %v5443_v41  ;;  %v7203_v60 = vld [vmem:[%s10052_s14 + $0x90] sm:$0xff]   ;;  %v7197_v41 = vld [vmem:[%s10052_s14 + $0x68] sm:$0xff]  }
 0x7c3   : > { %v5300_v50 = vpop.f32.mrf.mxu0  ;;  %v5445_v57 = vpop.f32.mrf.mxu1 }
 0x7c5   : > { %v5301_v23 = vpop.f32.mrf.mxu0  ;;  %v5446_v29 = vpop.f32.mrf.mxu1 }
 0x7c6   : > { %v5475_v11 = vmax.f32 %v5301_v23, %v5446_v29  ;;  %v7204_v23 = vld [vmem:[%s10052_s14 + $0x88] sm:$0xff]   ;;  %v7199_v29 = vld [vmem:[%s10052_s14 + $0x60] sm:$0xff]  }
 0x7c7   : > { %v5303_v58 = vpop.f32.mrf.mxu0  ;;  %v5448_v63 = vpop.f32.mrf.mxu1 }
 0x7c8   : > { %v5487_v61 = vpack.c.bf16 %v5475_v11, %v5474_v45  ;;  %v7206_v63 = vld [vmem:[%s10052_s14 + $0x80] sm:$0xff]  }
 0x7c9   : > { %v5306_v46 = vpop.f32.mrf.mxu0  ;;  %v5451_v31 = vpop.f32.mrf.mxu1 }
 0x7ca   : > { %v5476_v14 = vmax.f32 %v5306_v46, %v5451_v31  ;;  %v7200_v31 = vld [vmem:[%s10052_s14 + $0x58] sm:$0xff]  }
 0x7cb   : > { %v5308_v34 = vpop.f32.mrf.mxu0  ;;  %v5453_v24 = vpop.f32.mrf.mxu1 }
 0x7cd   : > { %v5309_v33 = vpop.f32.mrf.mxu0  ;;  %v5454_v10 = vpop.f32.mrf.mxu1 }
 0x7ce   : > { %v5477_v6 = vmax.f32 %v5309_v33, %v5454_v10  ;;  %v7208_v33 = vld [vmem:[%s10052_s14 + $0x78] sm:$0xff]  }
 0x7cf   : > { %v5311_v28 = vpop.f32.mrf.mxu0  ;;  %v5456_v43 = vpop.f32.mrf.mxu1 }
 0x7d0   : > { %v5488_v62 = vpack.c.bf16 %v5477_v6, %v5476_v14  ;;  %v7212_v28 = vld [vmem:[%s10054_s16 + $0x38] ss:$0 sps:$4 sm:$0xff]   ;;  %v7202_v43 = vld [vmem:[%s10052_s14 + $0x50] sm:$0xff]  }
 0x7d1   : > { %v5314_v55 = vpop.f32.mrf.mxu0  ;;  %v5459_v48 = vpop.f32.mrf.mxu1 }
 0x7d2   : > { %v5478_v56 = vmax.f32 %v5314_v55, %v5459_v48 }
 0x7d3   : > { %v5316_v9 = vpop.f32.mrf.mxu0  ;;  %v5461_v8 = vpop.f32.mrf.mxu1 }
 0x7d4   : > { %v6082_v9 = vsel %vm3244_vm6, %v7212_v28, 0  ;;  %v7205_v8 = vld [vmem:[%s10052_s14 + $0xc0] sm:$0xff]  }
 0x7d5   : > { %v5317_v25 = vpop.f32.mrf.mxu0  ;;  %v5462_v39 = vpop.f32.mrf.mxu1 }
 0x7d6   : > { %v5479_v16 = vmax.f32 %v5317_v25, %v5462_v39  ;;  %v7207_v25 = vld [vmem:[%s10052_s14 + $0xb8] sm:$0xff]   ;;  %v7209_v39 = vld [vmem:[%s10052_s14 + $0xb0] sm:$0xff]  }
 0x7d7   : > { %v5319_v1 = vpop.f32.mrf.mxu0  ;;  %v5464_v38 = vpop.f32.mrf.mxu1 }
 0x7d8   : > { %v5489_v53 = vpack.c.bf16 %v5479_v16, %v5478_v56  ;;  %v7210_v1 = vld [vmem:[%s10052_s14 + $0xa8] sm:$0xff]   ;;  %v7211_v38 = vld [vmem:[%s10052_s14 + $0xa0] sm:$0xff]   ;;  %v7223_v56 = vld [vmem:[%s10056_s18 + $0x10] sm:$0xff]  }
 0x7d9   : > { %v5322_v35 = vpop.f32.mrf.mxu0  ;;  %v5467_v19 = vpop.f32.mrf.mxu1  ;;  %v7221_v16 = vld [vmem:[%s10056_s18 + $0x20] sm:$0xff]  }
 0x7da   : > { %v5480_v59 = vmax.f32 %v5322_v35, %v5467_v19  ;;  %v7213_v19 = vld [vmem:[%s10054_s16 + $0x30] sm:$0xff]  }
 0x7db   : > { %v5324_v26 = vpop.f32.mrf.mxu0  ;;  %v5469_v30 = vpop.f32.mrf.mxu1 }
 0x7dc   : > { %v7214_v26 = vld [vmem:[%s10054_s16 + $0x28] sm:$0xff]   ;;  %v7215_v30 = vld [vmem:[%s10054_s16 + $0x20] sm:$0xff]  }
 0x7dd   : > { %v5325_v15 = vpop.f32.mrf.mxu0  ;;  %v5470_v21 = vpop.f32.mrf.mxu1 }
 0x7de   : > { %v5481_v4 = vmax.f32 %v5325_v15, %v5470_v21  ;;  %v7216_v15 = vld [vmem:[%s10054_s16 + $0x18] sm:$0xff]   ;;  %v7217_v21 = vld [vmem:[%s10054_s16 + $0x10] sm:$0xff]  }
 0x7df   : > { %v5327_v36 = vpop.f32.mrf.mxu0  ;;  %v5472_v20 = vpop.f32.mrf.mxu1 }
 0x7e0   : > { %v5490_v44 = vpack.c.bf16 %v5481_v4, %v5480_v59  ;;  %v7218_v59 = vld [vmem:[%s10054_s16 + $0x8] sm:$0xff]   ;;  %v7219_v4 = vld [vmem:[%s10054_s16] sm:$0xff]  }
 0x7e1   : > { %v7220_v36 = vld [vmem:[%s10056_s18 + $0x28] ss:$0 sps:$4 sm:$0x33]  }
 0x7e2   : > { %6835 = vmatpush3.bf16.msra.mxu0 %v5490_v44  ;;  %v6181_v20 = vsel %vm3719_vm7, %v7220_v36, 0  ;;  %v7222_v44 = vld [vmem:[%s10056_s18 + $0x18] sm:$0xff]  }
 0x7e3   : > { %6836 = vmatprep.subr.bf16.mxu0 %v7235_v17 }
 0x7e6   : > { %6837 = vmatpush3.bf16.msra.mxu0 %v5489_v53 }
 0x7e7   : > { %6838 = vmatprep.subr.bf16.mxu0 %v7235_v17 }
 0x7ea   : > { %6839 = vmatpush3.bf16.msra.mxu0 %v5488_v62 }
 0x7eb   : > { %6840 = vmatprep.subr.bf16.mxu0 %v7235_v17 }
 0x7ee   : > { %6841 = vmatpush3.bf16.msra.mxu0 %v5487_v61 }
 0x7ef   : > { %6868 = vmatprep.subr.bf16.mxu0 %v7235_v17 }
 0x7f1   : > { %6843 = vmatmul.mubr.msk.bf16.vlgmr.msra.gmra.mxu0 %vm5504_vm11, %v7184_v32 }
 0x7f2   : > { %6846 = vmatprep.mubr.msk.bf16.mxu0 %vm7236_vm10, %v7235_v17  ;;  %6869 = vmatpush3.bf16.msra.mxu0 %v7191_v18 }
 0x7f3   : > { %6870 = vmatprep.subr.bf16.mxu0 %v7235_v17 }
 0x7f6   : > { %6871 = vmatpush3.bf16.msra.mxu0 %v7193_v0 }
 0x7f7   : > { %6872 = vmatprep.subr.bf16.mxu0 %v7235_v17 }
 0x7f9   : > { %6847 = vmatmul.mubr.msk.bf16.gmra.mxu0 %vm5504_vm11, %v7185_v40 }
 0x7fa   : > { %6850 = vmatprep.mubr.msk.bf16.mxu0 %vm7236_vm10, %v7235_v17  ;;  %6873 = vmatpush3.bf16.msra.mxu0 %v7194_v52 }
 0x7fb   : > { %6874 = vmatprep.subr.bf16.mxu0 %v7235_v17 }
 0x7fe   : > { %6875 = vmatpush3.bf16.msra.mxu0 %v7196_v27 }
 0x7ff   : > { %6876 = vmatprep.subr.bf16.mxu0 %v7235_v17 }
 0x801   : > { %6851 = vmatmul.mubr.msk.bf16.gmra.mxu0 %vm5504_vm11, %v7186_v22 }
 0x802   : > { %6878 = vmatprep.mubr.msk.bf16.mxu0 %vm7236_vm10, %v7235_v17  ;;  %6877 = vmatpush3.bf16.msra.mxu0 %v7198_v54 }
 0x803   : > { %6896 = vmatprep.subr.bf16.mxu0 %v7235_v17 }
 0x8b1   : > { %v5548_v42 = vpop.f32.mrf.mxu0 }
 0x8b3   : > { %v6844_v12 = vpop.f32.mrf.mxu0 }
 0x8b5   : > { %v5551_v37 = vpop.f32.mrf.mxu0 }
 0x8b6   : > { %v5570_v13 = vpack.c.bf16 %v5551_v37, %v5548_v42 }
 0x8b7   : > { %v6845_v3 = vpop.f32.mrf.mxu0 }
 0x8b8   : > { %v5595_v5 = vrot.slane %v5570_v13, 4  ;;  %6879 = vmatmul.mubr.msk.bf16.vlgmr.msra.gmra.mxu0 %vm5626_vm12, %v5570_v13 }
 0x8b9   : > { %6897 = vmatpush3.bf16.msra.mxu0 %v7201_v2  ;;  %v5556_v51 = vpop.f32.mrf.mxu0  ;;  %6906 = vmatprep.mubr.msk.bf16.mxu0 %vm7236_vm10, %v7235_v17  ;;  %v6760_v2 = vld [vmem:[%s10053_s15] ss:$0 sm:$0xff] }
 0x8ba   : > { %6865 = vmatmul.mubr.msk.bf16.vlgmr.msra.gmra.mxu1 %vm5626_vm12, %v5595_v5  ;;  %6898 = vmatprep.subr.bf16.mxu0 %v7235_v17 }
 0x8bb   : > { %6883 = vmatpush3.bf16.msra.mxu1 %v7195_v47  ;;  %v6848_v50 = vpop.f32.mrf.mxu0  ;;  %6892 = vmatprep.mubr.msk.bf16.mxu1 %vm7236_vm10, %v7235_v17 }
 0x8bc   : > { %6884 = vmatprep.subr.bf16.mxu1 %v7235_v17  ;;  %v7224_v50 = vld [vmem:[%s10056_s18 + $0x8] sm:$0xff]  }
 0x8bd   : > { %6899 = vmatpush3.bf16.msra.mxu0 %v7203_v60  ;;  %v5559_v57 = vpop.f32.mrf.mxu0 }
 0x8be   : > { %6900 = vmatprep.subr.bf16.mxu0 %v7235_v17  ;;  %v5571_v24 = vpack.c.bf16 %v5559_v57, %v5556_v51  ;;  %v7225_v57 = vld [vmem:[%s10056_s18] sm:$0xff]  }
 0x8bf   : > { %6885 = vmatpush3.bf16.msra.mxu1 %v7197_v41  ;;  %v6849_v58 = vpop.f32.mrf.mxu0 }
 0x8c0   : > { %6886 = vmatprep.subr.bf16.mxu1 %v7235_v17  ;;  %v5840_v48 = vrot.slane %v5571_v24, 4 }
 0x8c1   : > { %6901 = vmatpush3.bf16.msra.mxu0 %v7204_v23  ;;  %v5564_v46 = vpop.f32.mrf.mxu0  ;;  %v6761_v23 = vld [vmem:[%s10055_s17] ss:$0 sm:$0xff] }
 0x8c2   : > { %6902 = vmatprep.subr.bf16.mxu0 %v7235_v17  ;;  %v5572_v35 = vpack.c.bf16 %v5564_v46, %v5564_v46 }
 0x8c3   : > { %6887 = vmatpush3.bf16.msra.mxu1 %v7199_v29  ;;  %v6852_v34 = vpop.f32.mrf.mxu0 }
 0x8c4   : > { %6888 = vmatprep.subr.bf16.mxu1 %v7235_v17 }
 0x8c5   : > { %6903 = vmatpush3.bf16.msra.mxu0 %v7206_v63  ;;  %v5567_v10 = vpop.f32.mrf.mxu0 }
 0x8c6   : > { %6904 = vmatprep.subr.bf16.mxu0 %v7235_v17 }
 0x8c7   : > { %6889 = vmatpush3.bf16.msra.mxu1 %v7200_v31  ;;  %v6853_v55 = vpop.f32.mrf.mxu0 }
 0x8c8   : > { %6890 = vmatprep.subr.bf16.mxu1 %v7235_v17 }
 0x8c9   : > { %6905 = vmatpush3.bf16.msra.mxu0 %v7208_v33 }
 0x8ca   : > { %6924 = vmatprep.subr.bf16.mxu0 %v7235_v17 }
 0x8cb   : > { %6891 = vmatpush3.bf16.msra.mxu1 %v7202_v43 }
 0x8cc   : > { %6910 = vmatprep.subr.bf16.mxu1 %v7235_v17  ;;  %6907 = vmatmul.mubr.msk.bf16.vlgmr.msra.gmra.mxu0 %vm5626_vm12, %v5840_v48 }
 0x8cd   : > { %6925 = vmatpush3.bf16.msra.mxu0 %v6082_v9  ;;  %6940 = vmatprep.mubr.msk.bf16.mxu0 %vm7236_vm10, %v7235_v17 }
 0x8ce   : > { %6893 = vmatmul.mubr.msk.bf16.vlgmr.msra.gmra.mxu1 %vm5626_vm12, %v5571_v24  ;;  %6926 = vmatprep.subr.bf16.mxu0 %v7235_v17 }
 0x8cf   : > { %6911 = vmatpush3.bf16.msra.mxu1 %v7205_v8  ;;  %6920 = vmatprep.mubr.msk.bf16.mxu1 %vm7236_vm10, %v7235_v17 }
 0x8d0   : > { %6912 = vmatprep.subr.bf16.mxu1 %v7235_v17 }
 0x8d1   : > { %6927 = vmatpush3.bf16.msra.mxu0 %v7213_v19 }
 0x8d2   : > { %6928 = vmatprep.subr.bf16.mxu0 %v7235_v17 }
 0x8d3   : > { %6913 = vmatpush3.bf16.msra.mxu1 %v7207_v25 }
 0x8d4   : > { %6914 = vmatprep.subr.bf16.mxu1 %v7235_v17 }
 0x8d5   : > { %6929 = vmatpush3.bf16.msra.mxu0 %v7214_v26 }
 0x8d6   : > { %6930 = vmatprep.subr.bf16.mxu0 %v7235_v17 }
 0x8d7   : > { %6915 = vmatpush3.bf16.msra.mxu1 %v7209_v39 }
 0x8d8   : > { %6916 = vmatprep.subr.bf16.mxu1 %v7235_v17 }
 0x8d9   : > { %6931 = vmatpush3.bf16.msra.mxu0 %v7215_v30 }
 0x8da   : > { %6932 = vmatprep.subr.bf16.mxu0 %v7235_v17 }
 0x8db   : > { %6917 = vmatpush3.bf16.msra.mxu1 %v7210_v1 }
 0x8dc   : > { %6918 = vmatprep.subr.bf16.mxu1 %v7235_v17 }
 0x8dd   : > { %6933 = vmatpush3.bf16.msra.mxu0 %v7216_v15 }
 0x8de   : > { %6934 = vmatprep.subr.bf16.mxu0 %v7235_v17 }
 0x8df   : > { %6919 = vmatpush3.bf16.msra.mxu1 %v7211_v38 }
 0x8e0   : > { %6944 = vmatprep.subr.bf16.mxu1 %v7235_v17 }
 0x8e1   : > { %6935 = vmatpush3.bf16.msra.mxu0 %v7217_v21 }
 0x8e2   : > { %6921 = vmatmul.mubr.msk.bf16.vlgmr.msra.gmra.mxu1 %vm5626_vm12, %v5572_v35  ;;  %6936 = vmatprep.subr.bf16.mxu0 %v7235_v17 }
 0x8e3   : > { %6956 = vmatprep.mubr.msk.bf16.mxu1 %vm7236_vm10, %v7235_v17  ;;  %6945 = vmatpush3.bf16.msra.mxu1 %v6181_v20 }
 0x8e4   : > { %6946 = vmatprep.subr.bf16.mxu1 %v7235_v17 }
 0x8e5   : > { %6937 = vmatpush3.bf16.msra.mxu0 %v7218_v59 }
 0x8e6   : > { %6938 = vmatprep.subr.bf16.mxu0 %v7235_v17 }
 0x8e7   : > { %6947 = vmatpush3.bf16.msra.mxu1 %v7221_v16 }
 0x8e8   : > { %6948 = vmatprep.subr.bf16.mxu1 %v7235_v17 }
 0x8e9   : > { %6939 = vmatpush3.bf16.msra.mxu0 %v7219_v4 }
 0x8eb   : > { %6949 = vmatpush3.bf16.msra.mxu1 %v7222_v44 }
 0x8ec   : > { %6950 = vmatprep.subr.bf16.mxu1 %v7235_v17 }
 0x8ef   : > { %6951 = vmatpush3.bf16.msra.mxu1 %v7223_v56 }
 0x8f0   : > { %6952 = vmatprep.subr.bf16.mxu1 %v7235_v17 }
 0x8f3   : > { %6953 = vmatpush3.bf16.msra.mxu1 %v7224_v50 }
 0x8f4   : > { %6954 = vmatprep.subr.bf16.mxu1 %v7235_v17  ;;  %v6771_v17 = vld [vmem:[%s10057_s19] ss:$0 sm:$0xff] }
 0x8f7   : > { %6955 = vmatpush3.bf16.msra.mxu1 %v7225_v57 }
 0x978   : > { %v5737_v6 = vpop.f32.mrf.mxu0 }
 0x97a   : > { %v5664_v53 = vpop.f32.mrf.mxu1  ;;  %v6880_v14 = vpop.f32.mrf.mxu0 }
 0x97b   : > { %v5738_v49 = vadd.f32 %v5737_v6, %v5664_v53 }
 0x97c   : > { %v6866_v11 = vpop.f32.mrf.mxu1  ;;  %v5740_v62 = vpop.f32.mrf.mxu0 }
 0x97e   : > { %v5667_v45 = vpop.f32.mrf.mxu1  ;;  %v6881_v61 = vpop.f32.mrf.mxu0 }
 0x980   : > { %v6867_v32 = vpop.f32.mrf.mxu1 }
 0x98c   : > { %v5908_v40 = vpop.f32.mrf.mxu0 }
 0x98e   : > { %v5821_v22 = vpop.f32.mrf.mxu1  ;;  %v6908_v18 = vpop.f32.mrf.mxu0 }
 0x98f   : > { %v5827_v42 = vadd.f32 %v5821_v22, %v5738_v49 }
 0x990   : > { %v6894_v0 = vpop.f32.mrf.mxu1  ;;  %v5911_v52 = vpop.f32.mrf.mxu0 }
 0x991   : > { %v5914_v12 = vadd.f32 %v5908_v40, %v5827_v42 }
 0x992   : > { %v5824_v27 = vpop.f32.mrf.mxu1  ;;  %v6909_v7 = vpop.f32.mrf.mxu0 }
 0x994   : > { %v6895_v54 = vpop.f32.mrf.mxu1 }
 0x9a2   : > { %v5993_v37 = vpop.f32.mrf.mxu1 }
 0x9a3   : > { %v5999_v13 = vadd.f32 %v5993_v37, %v5914_v12 }
 0x9a4   : > { %v6922_v47 = vpop.f32.mrf.mxu1 }
 0x9a5   : > { %v6007_v3 = vadd.f32 %v6760_v2, %v5999_v13 }
 0x9a6   : > { %v5996_v5 = vpop.f32.mrf.mxu1 }
 0x9a7   : > { %v6008_v51 = vmax.f32 %v6007_v3, 0.0 }
 0x9a8   : > { %v6923_v60 = vpop.f32.mrf.mxu1 }
 0x9a9   : > { %v6009_v41 = vpack.c.bf16 %v6008_v51, %v6008_v51 }
 0x9ab   : > { %6941 = vmatmul.mubr.msk.bf16.vlgmr.msra.gmra.mxu0 %vm6077_vm13, %v6009_v41 }
 0xa6b   : > { %v6118_v29 = vpop.f32.mrf.mxu0 }
 0xa6c   : > { %v6119_v58 = vadd.f32 %v6761_v23, %v6118_v29 }
 0xa6d   : > { %v6942_v63 = vpop.f32.mrf.mxu0 }
 0xa6e   : > { %v6124_v46 = vmax.f32 %v6119_v58, 0.0 }
 0xa6f   : > { %v6121_v31 = vpop.f32.mrf.mxu0 }
 0xa70   : > { %v6125_v34 = vpack.c.bf16 %v6124_v46, %v6124_v46 }
 0xa71   : > { %v6943_v24 = vpop.f32.mrf.mxu0 }
 0xa72   : > { %6957 = vmatmul.mubr.msk.bf16.vlgmr.msra.gmra.mxu1 %vm3694_vm9, %v6125_v34 }
 0xb32   : > { %v6217_v33 = vpop.f32.mrf.mxu1 }
 0xb33   : > { %v6218_v10 = vadd.f32 %v6771_v17, %v6217_v33 }
 0xb34   : > { %v6958_v28 = vpop.f32.mrf.mxu1 }
 0xb35   : > { %6223 = vst [vmem:[%s629_s3] sm:$0xff] %v6218_v10 }
 0xb36   : > { %v6220_v43 = vpop.f32.mrf.mxu1 }
 0xb38   : > { %v6959_v55 = vpop.f32.mrf.mxu1 }
 0xb39 PF: > { %s10257_s26 = sld [smem:[#allocation2_spill]] }
 0xb3f   : > { %s30_s1 = sadd.s32 1, %s10257_s26  }
 0xb40   : > { %p27_p5 = scmp.ge.s32.totalorder %s30_s1, 4  }
 0xb42   :  { %29 = sbr.rel (!%p27_p5) target bundleno = 7 (0x7), region = 142 }

</bundles_post_ra>
